<compile_context>
chip_gen: v6e
topology: v6e:2x2x1
jax: 0.10.0
libtpu: 0.0.40
codegen_flags: <defaults>
</compile_context>

<pallas_src>
import functools
import math

import jax
import jax.numpy as jnp
from jax.experimental import pallas as pl
from jax.experimental.pallas import tpu as pltpu


# ---------------------------------------------------------------------------
# Per-generation tiling / compiler configuration
# ---------------------------------------------------------------------------

_CFG_CACHE = None


def _cfg():
    """(row_tile, vmem_limit_bytes) chosen from the TPU generation's VMEM size."""
    global _CFG_CACHE
    if _CFG_CACHE is None:
        vmem_bytes = 64 * 1024 * 1024                 # conservative (v7x-sized) default
        try:
            vmem_bytes = int(pltpu.get_tpu_info().vmem_capacity_bytes)
        except Exception:
            pass
        if vmem_bytes >= 100 * 1024 * 1024:           # v5e / v6e: 128 MiB physical VMEM
            _CFG_CACHE = (512, 96 * 1024 * 1024)
        else:                                         # v7x: 64 MiB physical VMEM
            _CFG_CACHE = (256, 48 * 1024 * 1024)
    return _CFG_CACHE


def _cparams(dimension_semantics):
    return pltpu.CompilerParams(
        dimension_semantics=dimension_semantics,
        vmem_limit_bytes=_cfg()[1],
    )


def _row_tile(n):
    """Token-axis tile: as large as the generation allows, but split into >=2 row
    blocks when legal so a 2-TC chip (v7x) gets work even for small batches."""
    tile = _cfg()[0]
    if n > tile:
        return tile
    if n >= 16 and n % 16 == 0:
        return n // 2
    return n


def _seq_tile(n, limit):
    """Largest multiple-of-8 divisor of n that is <= limit (else the full axis)."""
    if n <= limit:
        return n
    for t in range(limit - limit % 8, 7, -8):
        if n % t == 0:
            return t
    return n


def _ff_tile(dff):
    """d_ff tile for the fused FFN: multiple of 128 (lane-dense w1 columns)."""
    limit = 2048
    if dff <= limit:
        return dff
    for t in range(limit - limit % 128, 127, -128):
        if dff % t == 0:
            return t
    return dff


def _block(shape, index_map, buffers=None):
    """BlockSpec helper; buffers=1 keeps a never-reindexed block single-buffered."""
    if buffers is None:
        return pl.BlockSpec(shape, index_map)
    return pl.BlockSpec(shape, index_map, pipeline_mode=pl.Buffered(buffers))


# ---------------------------------------------------------------------------
# Pallas kernels
# ---------------------------------------------------------------------------

def _linear_kernel(x_ref, w_ref, b_ref, o_ref):
    # (tn, Din) @ (Din, Dout) + (1, Dout); native-dtype MXU feed, f32 accumulate.
    acc = jnp.dot(x_ref[...], w_ref[...], preferred_element_type=jnp.float32)
    o_ref[...] = (acc + b_ref[...]).astype(o_ref.dtype)


def linear(x2d, w, b):
    """Row-tiled dense layer; the weight block stays resident (single-buffered)."""
    N, Din = x2d.shape
    Dout = w.shape[1]
    tn = _row_tile(N)
    return pl.pallas_call(
        _linear_kernel,
        out_shape=jax.ShapeDtypeStruct((N, Dout), x2d.dtype),
        grid=(pl.cdiv(N, tn),),
        in_specs=[
            pl.BlockSpec((tn, Din), lambda i: (i, 0)),
            _block((Din, Dout), lambda i: (0, 0), 1),
            _block((1, Dout), lambda i: (0, 0), 1),
        ],
        out_specs=pl.BlockSpec((tn, Dout), lambda i: (i, 0)),
        compiler_params=_cparams(("parallel",)),
    )(x2d, w, b.reshape(1, Dout))


def _flash_mha_kernel(q_ref, k_ref, v_ref, o_ref, m_sc, l_sc, acc_sc,
                      *, n_heads, head_dim):
    """One (batch, q-block) tile; kv blocks stream on grid axis 2 (online softmax).

    Blocks are lane-dense (last dim = n_heads*head_dim); heads are split with
    static lane slices.  The QK^T contraction is only head_dim wide, so this
    kernel is softmax (EUP/XLU) bound, not MXU bound — the scale is folded into
    q (L*E mults) and the denominator uses the approximate EUP reciprocal.
    """
    kv_i = pl.program_id(2)

    @pl.when(kv_i == 0)
    def _init():
        m_sc[...] = jnp.full_like(m_sc, -jnp.inf)
        l_sc[...] = jnp.zeros_like(l_sc)
        acc_sc[...] = jnp.zeros_like(acc_sc)

    scale = 1.0 / math.sqrt(head_dim)
    for h in range(n_heads):
        sl = slice(h * head_dim, (h + 1) * head_dim)
        qh = q_ref[:, sl] * scale            # native dtype (bf16/f32) -> MXU
        kh = k_ref[:, sl]
        vh = v_ref[:, sl]

        s = jax.lax.dot_general(qh, kh, (((1,), (1,)), ((), ())),
                                preferred_element_type=jnp.float32)   # (tl, ts) f32

        m_prev = m_sc[h]                                               # (tl, 1) f32
        m_new = jnp.maximum(m_prev, jnp.max(s, axis=-1, keepdims=True))
        alpha = jnp.exp(m_prev - m_new)
        p = jnp.exp(s - m_new)

        l_sc[h] = alpha * l_sc[h] + jnp.sum(p, axis=-1, keepdims=True)
        pv = jnp.dot(p.astype(vh.dtype), vh, preferred_element_type=jnp.float32)
        acc_sc[:, sl] = alpha * acc_sc[:, sl] + pv
        m_sc[h] = m_new

    @pl.when(kv_i == pl.num_programs(2) - 1)
    def _finalize():
        for h in range(n_heads):
            sl = slice(h * head_dim, (h + 1) * head_dim)
            inv = pl.reciprocal(l_sc[h], approx=True)   # EUP slot, ~free
            o_ref[:, sl] = (acc_sc[:, sl] * inv).astype(o_ref.dtype)


def flash_attention(q_arr, kv_arr, *, n_heads, d_model, q_col, k_col, v_col,
                    kv_block=None):
    """Flash-style MHA over lane-dense packed projection outputs.

    q_arr:  (B, L, nq*d_model)  — query projection lives in column block `q_col`.
    kv_arr: (B, S, nkv*d_model) — key/value projections live in column blocks
            `k_col` / `v_col` (read in place from the fused QKV / KV matmul
            output: no XLA slice or head-transpose HBM passes).
    Returns (B, L, d_model) in the token-major layout the out-projection wants.
    """
    B, L, _ = q_arr.shape
    S = kv_arr.shape[1]
    D = d_model
    assert D % n_heads == 0
    E = D // n_heads

    tl = _seq_tile(L, 512)
    if kv_block is not None and S % kv_block == 0 and (kv_block % 8 == 0 or kv_block == S):
        ts = kv_block
    else:
        ts = _seq_tile(S, 512)

    kernel = functools.partial(_flash_mha_kernel, n_heads=n_heads, head_dim=E)
    return pl.pallas_call(
        kernel,
        out_shape=jax.ShapeDtypeStruct((B, L, D), q_arr.dtype),
        grid=(B, pl.cdiv(L, tl), pl.cdiv(S, ts)),
        in_specs=[
            pl.BlockSpec((None, tl, D), lambda b, l, s: (b, l, q_col)),
            pl.BlockSpec((None, ts, D), lambda b, l, s: (b, s, k_col)),
            pl.BlockSpec((None, ts, D), lambda b, l, s: (b, s, v_col)),
        ],
        out_specs=pl.BlockSpec((None, tl, D), lambda b, l, s: (b, l, 0)),
        scratch_shapes=[
            pltpu.VMEM((n_heads, tl, 1), jnp.float32),   # running max, per head
            pltpu.VMEM((n_heads, tl, 1), jnp.float32),   # running sum, per head
            pltpu.VMEM((tl, D), jnp.float32),            # running output accumulator
        ],
        compiler_params=_cparams(("parallel", "parallel", "arbitrary")),
    )(q_arr, kv_arr, kv_arr)


def _proj_add_ln_kernel(a_ref, r_ref, w_ref, b_ref, g_ref, beta_ref, o_ref):
    # out-projection + residual add + LayerNorm (eps=1e-5, biased var), fused.
    proj = jnp.dot(a_ref[...], w_ref[...], preferred_element_type=jnp.float32)
    z = r_ref[...].astype(jnp.float32) + proj + b_ref[...]
    mean = jnp.mean(z, axis=-1, keepdims=True)
    var = jnp.mean(jnp.square(z - mean), axis=-1, keepdims=True)
    zn = (z - mean) * jax.lax.rsqrt(var + 1e-5)
    o_ref[...] = (zn * g_ref[...] + beta_ref[...]).astype(o_ref.dtype)


def proj_add_layernorm(attn2d, resid2d, w, b, gamma, beta):
    N, D = resid2d.shape
    tn = _row_tile(N)
    return pl.pallas_call(
        _proj_add_ln_kernel,
        out_shape=jax.ShapeDtypeStruct((N, D), resid2d.dtype),
        grid=(pl.cdiv(N, tn),),
        in_specs=[
            pl.BlockSpec((tn, D), lambda i: (i, 0)),
            pl.BlockSpec((tn, D), lambda i: (i, 0)),
            _block((D, D), lambda i: (0, 0), 1),
            _block((1, D), lambda i: (0, 0), 1),
            _block((1, D), lambda i: (0, 0), 1),
            _block((1, D), lambda i: (0, 0), 1),
        ],
        out_specs=pl.BlockSpec((tn, D), lambda i: (i, 0)),
        compiler_params=_cparams(("parallel",)),
    )(attn2d, resid2d, w, b.reshape(1, D), gamma.reshape(1, D), beta.reshape(1, D))


def _ffn_add_ln_kernel(x_ref, w1_ref, b1_ref, w2_ref, b2_ref, g_ref, beta_ref,
                       o_ref, acc_ref, *, activation):
    # conv1x1 -> act -> conv1x1 accumulated over d_ff blocks; residual + LN on the
    # last d_ff step.  The x block is resident across the d_ff ("arbitrary") axis.
    j = pl.program_id(1)

    @pl.when(j == 0)
    def _init():
        acc_ref[...] = jnp.zeros_like(acc_ref)

    x = x_ref[...]
    h = jnp.dot(x, w1_ref[...], preferred_element_type=jnp.float32) + b1_ref[...]
    if activation == "relu":
        h = jnp.maximum(h, 0.0)
    else:                                    # 'gelu' (exact, matches F.gelu default)
        h = jax.nn.gelu(h, approximate=False)
    acc_ref[...] += jnp.dot(h.astype(x.dtype), w2_ref[...],
                            preferred_element_type=jnp.float32)

    @pl.when(j == pl.num_programs(1) - 1)
    def _finalize():
        z = x.astype(jnp.float32) + acc_ref[...] + b2_ref[...]
        mean = jnp.mean(z, axis=-1, keepdims=True)
        var = jnp.mean(jnp.square(z - mean), axis=-1, keepdims=True)
        zn = (z - mean) * jax.lax.rsqrt(var + 1e-5)
        o_ref[...] = (zn * g_ref[...] + beta_ref[...]).astype(o_ref.dtype)


def ffn_add_layernorm(x2d, w1, b1, w2, b2, gamma, beta, *, ff_block=None,
                      activation="relu"):
    N, D = x2d.shape
    Dff = w1.shape[1]
    tn = _row_tile(N)
    if ff_block is not None and Dff % ff_block == 0 and (ff_block % 128 == 0 or ff_block == Dff):
        tff = ff_block
    else:
        tff = _ff_tile(Dff)
    n_ff = Dff // tff
    ff_buffers = 1 if n_ff == 1 else None    # resident only when never re-indexed
    # TODO(synk): on v5e, sweeping pl.Buffered(3) on the row-tiled activation spec
    # can hide more DMA latency behind the two FFN matmuls.

    kernel = functools.partial(_ffn_add_ln_kernel, activation=activation)
    return pl.pallas_call(
        kernel,
        out_shape=jax.ShapeDtypeStruct((N, D), x2d.dtype),
        grid=(pl.cdiv(N, tn), n_ff),
        in_specs=[
            pl.BlockSpec((tn, D), lambda i, j: (i, 0)),
            _block((D, tff), lambda i, j: (0, j), ff_buffers),
            _block((1, tff), lambda i, j: (0, j), ff_buffers),
            _block((tff, D), lambda i, j: (j, 0), ff_buffers),
            _block((1, D), lambda i, j: (0, 0), 1),
            _block((1, D), lambda i, j: (0, 0), 1),
            _block((1, D), lambda i, j: (0, 0), 1),
        ],
        out_specs=pl.BlockSpec((tn, D), lambda i, j: (i, 0)),
        scratch_shapes=[pltpu.VMEM((tn, D), jnp.float32)],
        compiler_params=_cparams(("parallel", "arbitrary")),
    )(x2d, w1, b1.reshape(1, Dff), w2, b2.reshape(1, D),
      gamma.reshape(1, D), beta.reshape(1, D))


# ---------------------------------------------------------------------------
# Module-level wrapper (glue only; compute lives in the Pallas kernels)
# ---------------------------------------------------------------------------

def decoder_layer(x, cross, params, n_heads, *, kv_block=None, ff_block=None,
                  activation="relu"):
    """Pallas implementation of DecoderLayer.forward (eval mode, no masks)."""
    # TODO(synk): x_mask / cross_mask are None in this forward path; no masking path.
    # TODO(synk): dropout layers are identity (eval-mode semantics).
    B, L, D = x.shape
    S = cross.shape[1]
    N = B * L
    x2d = x.reshape(N, D)

    # self-attention -> fused(out-proj + residual + norm1)
    sa = params["self_attn"]
    qkv = linear(x2d, sa["wqkv"], sa["bqkv"]).reshape(B, L, 3 * D)   # one (D,3D) matmul
    o = flash_attention(qkv, qkv, n_heads=n_heads, d_model=D,
                        q_col=0, k_col=1, v_col=2, kv_block=kv_block)
    x2d = proj_add_layernorm(o.reshape(N, D), x2d, sa["wo"], sa["bo"],
                             params["g1"], params["beta1"])

    # cross-attention -> fused(out-proj + residual + norm2)
    ca = params["cross_attn"]
    q = linear(x2d, ca["wq"], ca["bq"]).reshape(B, L, D)
    kv = linear(cross.reshape(B * S, D), ca["wkv"], ca["bkv"]).reshape(B, S, 2 * D)
    o = flash_attention(q, kv, n_heads=n_heads, d_model=D,
                        q_col=0, k_col=0, v_col=1, kv_block=kv_block)
    x2d = proj_add_layernorm(o.reshape(N, D), x2d, ca["wo"], ca["bo"],
                             params["g2"], params["beta2"])

    # fused(conv1x1 -> activation -> conv1x1 + residual + norm3), d_ff-tiled
    x2d = ffn_add_layernorm(x2d, params["w1"], params["b1"],
                            params["w2"], params["b2"],
                            params["g3"], params["beta3"],
                            ff_block=ff_block, activation=activation)
    return x2d.reshape(B, L, D)


# ---------------------------------------------------------------------------
# Pure-JAX reference (for validation), parameter init, smoke test
# ---------------------------------------------------------------------------

_HI = jax.lax.Precision.HIGHEST


def _ref_layernorm(z, g, b):
    z = z.astype(jnp.float32)
    mean = z.mean(-1, keepdims=True)
    var = jnp.square(z - mean).mean(-1, keepdims=True)
    return (z - mean) * jax.lax.rsqrt(var + 1e-5) * g + b


def _ref_mha(q, k, v, n_heads):
    B, L, D = q.shape
    S = k.shape[1]
    H, E = n_heads, D // n_heads
    qh = q.reshape(B, L, H, E)
    kh = k.reshape(B, S, H, E)
    vh = v.reshape(B, S, H, E)
    s = jnp.einsum("blhe,bshe->bhls", qh, kh, precision=_HI) / math.sqrt(E)
    p = jax.nn.softmax(s, axis=-1)
    o = jnp.einsum("bhls,bshe->blhe", p, vh, precision=_HI)
    return o.reshape(B, L, D)


def ref_decoder_layer(x, cross, params, n_heads, activation="relu"):
    B, L, D = x.shape
    S = cross.shape[1]

    def lin(t2d, w, b):
        return jnp.dot(t2d, w, precision=_HI) + b

    sa, ca = params["self_attn"], params["cross_attn"]

    qkv = lin(x.reshape(-1, D), sa["wqkv"], sa["bqkv"]).reshape(B, L, 3, D)
    o = _ref_mha(qkv[:, :, 0], qkv[:, :, 1], qkv[:, :, 2], n_heads)
    x = _ref_layernorm(x + lin(o.reshape(-1, D), sa["wo"], sa["bo"]).reshape(B, L, D),
                       params["g1"], params["beta1"])

    q = lin(x.reshape(-1, D), ca["wq"], ca["bq"]).reshape(B, L, D)
    kv = lin(cross.reshape(-1, D), ca["wkv"], ca["bkv"]).reshape(B, S, 2, D)
    o = _ref_mha(q, kv[:, :, 0], kv[:, :, 1], n_heads)
    x = _ref_layernorm(x + lin(o.reshape(-1, D), ca["wo"], ca["bo"]).reshape(B, L, D),
                       params["g2"], params["beta2"])

    h = jnp.dot(x.reshape(-1, D), params["w1"], precision=_HI) + params["b1"]
    h = jnp.maximum(h, 0.0) if activation == "relu" else jax.nn.gelu(h, approximate=False)
    y = (jnp.dot(h, params["w2"], precision=_HI) + params["b2"]).reshape(B, L, D)
    x = _ref_layernorm(x + y, params["g3"], params["beta3"])
    return x


def init_params(key, d_model, d_ff):
    ks = jax.random.split(key, 20)
    s = 0.05
    d = d_model

    def w(k, din, dout):
        return s * jax.random.normal(k, (din, dout), jnp.float32)

    def b(k, dim):
        return s * jax.random.normal(k, (dim,), jnp.float32)

    self_attn = {
        # fused q|k|v projection weights: (D, 3D)
        "wqkv": jnp.concatenate([w(ks[0], d, d), w(ks[1], d, d), w(ks[2], d, d)], axis=1),
        "bqkv": b(ks[3], 3 * d),
        "wo": w(ks[4], d, d),
        "bo": b(ks[5], d),
    }
    cross_attn = {
        "wq": w(ks[6], d, d),
        "bq": b(ks[7], d),
        # fused k|v projection weights: (D, 2D)
        "wkv": jnp.concatenate([w(ks[8], d, d), w(ks[9], d, d)], axis=1),
        "bkv": b(ks[10], 2 * d),
        "wo": w(ks[11], d, d),
        "bo": b(ks[12], d),
    }
    return {
        "self_attn": self_attn,
        "cross_attn": cross_attn,
        # conv1.weight is (d_ff, d_model, 1) in torch; stored here as (d_model, d_ff) = W.T
        "w1": w(ks[13], d, d_ff), "b1": b(ks[14], d_ff),
        "w2": w(ks[15], d_ff, d), "b2": b(ks[16], d),
        "g1": 1.0 + 0.1 * jax.random.normal(ks[17], (d,), jnp.float32),
        "beta1": 0.1 * jax.random.normal(ks[18], (d,), jnp.float32),
        "g2": jnp.ones((d,), jnp.float32), "beta2": jnp.zeros((d,), jnp.float32),
        "g3": 1.0 + 0.1 * jax.random.normal(ks[19], (d,), jnp.float32),
        "beta3": jnp.zeros((d,), jnp.float32),
    }


if __name__ == "__main__":
    B, L, S = 2, 8, 16
    d_model, n_heads = 256, 2          # E = 128: lane-dense head slices
    d_ff = 4 * d_model

    key = jax.random.PRNGKey(0)
    kx, kc, kp = jax.random.split(key, 3)
    x = jax.random.normal(kx, (B, L, d_model), jnp.float32)
    cross = jax.random.normal(kc, (B, S, d_model), jnp.float32)
    params = init_params(kp, d_model, d_ff)

    # kv_block=8 / ff_block=256 force the multi-step flash-softmax and d_ff
    # accumulation paths to be exercised even at these tiny smoke-test shapes.
    fwd = jax.jit(lambda a, c: decoder_layer(a, c, params, n_heads,
                                             kv_block=8, ff_block=256))
    out = jax.block_until_ready(fwd(x, cross))
    ref = ref_decoder_layer(x, cross, params, n_heads)

    assert out.shape == (B, L, d_model)
    assert bool(jnp.all(jnp.isfinite(out)))
    # Loose tolerance covers pl.reciprocal(approx=True) in the softmax denominator.
    max_err = float(jnp.max(jnp.abs(out - ref)))
    assert max_err < 5e-2, f"max |pallas - ref| = {max_err}"
    print("KERNEL_OK")
</pallas_src>

<mosaic_0001>
module attributes {stable_mosaic.version = 11 : i64} {
  func.func @_proj_add_ln_kernel(%arg0: i32, %arg1: memref<8x256xf32, #tpu.memory_space<vmem>>, %arg2: memref<8x256xf32, #tpu.memory_space<vmem>>, %arg3: memref<256x256xf32, #tpu.memory_space<vmem>>, %arg4: memref<1x256xf32, #tpu.memory_space<vmem>>, %arg5: memref<1x256xf32, #tpu.memory_space<vmem>>, %arg6: memref<1x256xf32, #tpu.memory_space<vmem>>, %arg7: memref<8x256xf32, #tpu.memory_space<vmem>>) attributes {dimension_semantics = [#tpu.dimension_semantics<parallel>], iteration_bounds = array<i64: 2>, scalar_prefetch = 0 : i64, scratch_operands = 0 : i64, tpu.core_type = #tpu.core_type<tc>, window_params = [{transform_indices = @transform_0, window_bounds = array<i64: 8, 256>}, {transform_indices = @transform_1, window_bounds = array<i64: 8, 256>}, {pipeline_mode = #tpu.pipeline_mode<synchronous>, transform_indices = @transform_2, window_bounds = array<i64: 256, 256>}, {pipeline_mode = #tpu.pipeline_mode<synchronous>, transform_indices = @transform_3, window_bounds = array<i64: 1, 256>}, {pipeline_mode = #tpu.pipeline_mode<synchronous>, transform_indices = @transform_4, window_bounds = array<i64: 1, 256>}, {pipeline_mode = #tpu.pipeline_mode<synchronous>, transform_indices = @transform_5, window_bounds = array<i64: 1, 256>}, {transform_indices = @transform_6, window_bounds = array<i64: 8, 256>}]} {
    %c0 = arith.constant 0 : index
    %c0_0 = arith.constant 0 : index
    %0 = vector.load %arg1[%c0, %c0_0] : memref<8x256xf32, #tpu.memory_space<vmem>>, vector<8x256xf32>
    %c0_1 = arith.constant 0 : index
    %c0_2 = arith.constant 0 : index
    %1 = vector.load %arg3[%c0_1, %c0_2] : memref<256x256xf32, #tpu.memory_space<vmem>>, vector<256x256xf32>
    %cst = arith.constant dense<0.000000e+00> : vector<8x256xf32>
    %2 = tpu.matmul %0, %1, %cst {dimension_numbers = #tpu.dot_dimension_numbers<[1], [0], [0], [1], [0, 0, 1, 1], [], []>} : vector<8x256xf32>, vector<256x256xf32>, vector<8x256xf32> -> vector<8x256xf32>
    %c0_3 = arith.constant 0 : index
    %c0_4 = arith.constant 0 : index
    %3 = vector.load %arg2[%c0_3, %c0_4] : memref<8x256xf32, #tpu.memory_space<vmem>>, vector<8x256xf32>
    %4 = arith.addf %3, %2 : vector<8x256xf32>
    %c0_5 = arith.constant 0 : index
    %c0_6 = arith.constant 0 : index
    %5 = vector.load %arg4[%c0_5, %c0_6] : memref<1x256xf32, #tpu.memory_space<vmem>>, vector<1x256xf32>
    %6 = vector.broadcast %5 : vector<1x256xf32> to vector<8x256xf32>
    %7 = arith.addf %4, %6 : vector<8x256xf32>
    %cst_7 = arith.constant dense<0.000000e+00> : vector<8xf32>
    %8 = vector.multi_reduction <add>, %7, %cst_7 [1] : vector<8x256xf32> to vector<8xf32>
    %9 = vector.shape_cast %8 : vector<8xf32> to vector<8x1xf32>
    %cst_8 = arith.constant 2.560000e+02 : f32
    %10 = vector.broadcast %cst_8 : f32 to vector<8x1xf32>
    %11 = arith.divf %9, %10 : vector<8x1xf32>
    %12 = vector.broadcast %11 : vector<8x1xf32> to vector<8x256xf32>
    %13 = arith.subf %7, %12 : vector<8x256xf32>
    %14 = arith.mulf %13, %13 : vector<8x256xf32>
    %cst_9 = arith.constant dense<0.000000e+00> : vector<8xf32>
    %15 = vector.multi_reduction <add>, %14, %cst_9 [1] : vector<8x256xf32> to vector<8xf32>
    %16 = vector.shape_cast %15 : vector<8xf32> to vector<8x1xf32>
    %cst_10 = arith.constant 2.560000e+02 : f32
    %17 = vector.broadcast %cst_10 : f32 to vector<8x1xf32>
    %18 = arith.divf %16, %17 : vector<8x1xf32>
    %19 = vector.broadcast %11 : vector<8x1xf32> to vector<8x256xf32>
    %20 = arith.subf %7, %19 : vector<8x256xf32>
    %cst_11 = arith.constant 9.99999974E-6 : f32
    %21 = vector.broadcast %cst_11 : f32 to vector<8x1xf32>
    %22 = arith.addf %18, %21 : vector<8x1xf32>
    %23 = math.rsqrt %22 : vector<8x1xf32>
    %24 = vector.broadcast %23 : vector<8x1xf32> to vector<8x256xf32>
    %25 = arith.mulf %20, %24 : vector<8x256xf32>
    %c0_12 = arith.constant 0 : index
    %c0_13 = arith.constant 0 : index
    %26 = vector.load %arg5[%c0_12, %c0_13] : memref<1x256xf32, #tpu.memory_space<vmem>>, vector<1x256xf32>
    %27 = vector.broadcast %26 : vector<1x256xf32> to vector<8x256xf32>
    %28 = arith.mulf %25, %27 : vector<8x256xf32>
    %c0_14 = arith.constant 0 : index
    %c0_15 = arith.constant 0 : index
    %29 = vector.load %arg6[%c0_14, %c0_15] : memref<1x256xf32, #tpu.memory_space<vmem>>, vector<1x256xf32>
    %30 = vector.broadcast %29 : vector<1x256xf32> to vector<8x256xf32>
    %31 = arith.addf %28, %30 : vector<8x256xf32>
    %c0_16 = arith.constant 0 : index
    %c0_17 = arith.constant 0 : index
    %32 = vector.load %arg7[%c0_16, %c0_17] : memref<8x256xf32, #tpu.memory_space<vmem>>, vector<8x256xf32>
    tpu.vector_store %arg7[%c0_16, %c0_17], %31 {strides = array<i32>} : memref<8x256xf32, #tpu.memory_space<vmem>>, vector<8x256xf32>,
    return
  }
  func.func @transform_0(%arg0: i32) -> (i32, i32) {
    %c0_i32 = arith.constant 0 : i32
    %c0_i32_0 = arith.constant 0 : i32
    return %arg0, %c0_i32 : i32, i32
  }
  func.func @transform_1(%arg0: i32) -> (i32, i32) {
    %c0_i32 = arith.constant 0 : i32
    %c0_i32_0 = arith.constant 0 : i32
    return %arg0, %c0_i32 : i32, i32
  }
  func.func @transform_2(%arg0: i32) -> (i32, i32) {
    %c0_i32 = arith.constant 0 : i32
    %c0_i32_0 = arith.constant 0 : i32
    %c0_i32_1 = arith.constant 0 : i32
    return %c0_i32, %c0_i32_0 : i32, i32
  }
  func.func @transform_3(%arg0: i32) -> (i32, i32) {
    %c0_i32 = arith.constant 0 : i32
    %c0_i32_0 = arith.constant 0 : i32
    %c0_i32_1 = arith.constant 0 : i32
    return %c0_i32, %c0_i32_0 : i32, i32
  }
  func.func @transform_4(%arg0: i32) -> (i32, i32) {
    %c0_i32 = arith.constant 0 : i32
    %c0_i32_0 = arith.constant 0 : i32
    %c0_i32_1 = arith.constant 0 : i32
    return %c0_i32, %c0_i32_0 : i32, i32
  }
  func.func @transform_5(%arg0: i32) -> (i32, i32) {
    %c0_i32 = arith.constant 0 : i32
    %c0_i32_0 = arith.constant 0 : i32
    %c0_i32_1 = arith.constant 0 : i32
    return %c0_i32, %c0_i32_0 : i32, i32
  }
  func.func @transform_6(%arg0: i32) -> (i32, i32) {
    %c0_i32 = arith.constant 0 : i32
    %c0_i32_0 = arith.constant 0 : i32
    return %arg0, %c0_i32 : i32, i32
  }
}

module attributes {stable_mosaic.version = 11 : i64} {
  func.func @_linear_kernel(%arg0: i32, %arg1: memref<8x256xf32, #tpu.memory_space<vmem>>, %arg2: memref<256x768xf32, #tpu.memory_space<vmem>>, %arg3: memref<1x768xf32, #tpu.memory_space<vmem>>, %arg4: memref<8x768xf32, #tpu.memory_space<vmem>>) attributes {dimension_semantics = [#tpu.dimension_semantics<parallel>], iteration_bounds = array<i64: 2>, scalar_prefetch = 0 : i64, scratch_operands = 0 : i64, tpu.core_type = #tpu.core_type<tc>, window_params = [{transform_indices = @transform_0, window_bounds = array<i64: 8, 256>}, {pipeline_mode = #tpu.pipeline_mode<synchronous>, transform_indices = @transform_1, window_bounds = array<i64: 256, 768>}, {pipeline_mode = #tpu.pipeline_mode<synchronous>, transform_indices = @transform_2, window_bounds = array<i64: 1, 768>}, {transform_indices = @transform_3, window_bounds = array<i64: 8, 768>}]} {
    %c0 = arith.constant 0 : index
    %c0_0 = arith.constant 0 : index
    %0 = vector.load %arg1[%c0, %c0_0] : memref<8x256xf32, #tpu.memory_space<vmem>>, vector<8x256xf32>
    %c0_1 = arith.constant 0 : index
    %c0_2 = arith.constant 0 : index
    %1 = vector.load %arg2[%c0_1, %c0_2] : memref<256x768xf32, #tpu.memory_space<vmem>>, vector<256x768xf32>
    %cst = arith.constant dense<0.000000e+00> : vector<8x768xf32>
    %2 = tpu.matmul %0, %1, %cst {dimension_numbers = #tpu.dot_dimension_numbers<[1], [0], [0], [1], [0, 0, 1, 1], [], []>} : vector<8x256xf32>, vector<256x768xf32>, vector<8x768xf32> -> vector<8x768xf32>
    %c0_3 = arith.constant 0 : index
    %c0_4 = arith.constant 0 : index
    %3 = vector.load %arg3[%c0_3, %c0_4] : memref<1x768xf32, #tpu.memory_space<vmem>>, vector<1x768xf32>
    %4 = vector.broadcast %3 : vector<1x768xf32> to vector<8x768xf32>
    %5 = arith.addf %2, %4 : vector<8x768xf32>
    %c0_5 = arith.constant 0 : index
    %c0_6 = arith.constant 0 : index
    %6 = vector.load %arg4[%c0_5, %c0_6] : memref<8x768xf32, #tpu.memory_space<vmem>>, vector<8x768xf32>
    tpu.vector_store %arg4[%c0_5, %c0_6], %5 {strides = array<i32>} : memref<8x768xf32, #tpu.memory_space<vmem>>, vector<8x768xf32>,
    return
  }
  func.func @transform_0(%arg0: i32) -> (i32, i32) {
    %c0_i32 = arith.constant 0 : i32
    %c0_i32_0 = arith.constant 0 : i32
    return %arg0, %c0_i32 : i32, i32
  }
  func.func @transform_1(%arg0: i32) -> (i32, i32) {
    %c0_i32 = arith.constant 0 : i32
    %c0_i32_0 = arith.constant 0 : i32
    %c0_i32_1 = arith.constant 0 : i32
    return %c0_i32, %c0_i32_0 : i32, i32
  }
  func.func @transform_2(%arg0: i32) -> (i32, i32) {
    %c0_i32 = arith.constant 0 : i32
    %c0_i32_0 = arith.constant 0 : i32
    %c0_i32_1 = arith.constant 0 : i32
    return %c0_i32, %c0_i32_0 : i32, i32
  }
  func.func @transform_3(%arg0: i32) -> (i32, i32) {
    %c0_i32 = arith.constant 0 : i32
    %c0_i32_0 = arith.constant 0 : i32
    return %arg0, %c0_i32 : i32, i32
  }
}

module attributes {stable_mosaic.version = 11 : i64} {
  func.func @_linear_kernel(%arg0: i32, %arg1: memref<8x256xf32, #tpu.memory_space<vmem>>, %arg2: memref<256x256xf32, #tpu.memory_space<vmem>>, %arg3: memref<1x256xf32, #tpu.memory_space<vmem>>, %arg4: memref<8x256xf32, #tpu.memory_space<vmem>>) attributes {dimension_semantics = [#tpu.dimension_semantics<parallel>], iteration_bounds = array<i64: 2>, scalar_prefetch = 0 : i64, scratch_operands = 0 : i64, tpu.core_type = #tpu.core_type<tc>, window_params = [{transform_indices = @transform_0, window_bounds = array<i64: 8, 256>}, {pipeline_mode = #tpu.pipeline_mode<synchronous>, transform_indices = @transform_1, window_bounds = array<i64: 256, 256>}, {pipeline_mode = #tpu.pipeline_mode<synchronous>, transform_indices = @transform_2, window_bounds = array<i64: 1, 256>}, {transform_indices = @transform_3, window_bounds = array<i64: 8, 256>}]} {
    %c0 = arith.constant 0 : index
    %c0_0 = arith.constant 0 : index
    %0 = vector.load %arg1[%c0, %c0_0] : memref<8x256xf32, #tpu.memory_space<vmem>>, vector<8x256xf32>
    %c0_1 = arith.constant 0 : index
    %c0_2 = arith.constant 0 : index
    %1 = vector.load %arg2[%c0_1, %c0_2] : memref<256x256xf32, #tpu.memory_space<vmem>>, vector<256x256xf32>
    %cst = arith.constant dense<0.000000e+00> : vector<8x256xf32>
    %2 = tpu.matmul %0, %1, %cst {dimension_numbers = #tpu.dot_dimension_numbers<[1], [0], [0], [1], [0, 0, 1, 1], [], []>} : vector<8x256xf32>, vector<256x256xf32>, vector<8x256xf32> -> vector<8x256xf32>
    %c0_3 = arith.constant 0 : index
    %c0_4 = arith.constant 0 : index
    %3 = vector.load %arg3[%c0_3, %c0_4] : memref<1x256xf32, #tpu.memory_space<vmem>>, vector<1x256xf32>
    %4 = vector.broadcast %3 : vector<1x256xf32> to vector<8x256xf32>
    %5 = arith.addf %2, %4 : vector<8x256xf32>
    %c0_5 = arith.constant 0 : index
    %c0_6 = arith.constant 0 : index
    %6 = vector.load %arg4[%c0_5, %c0_6] : memref<8x256xf32, #tpu.memory_space<vmem>>, vector<8x256xf32>
    tpu.vector_store %arg4[%c0_5, %c0_6], %5 {strides = array<i32>} : memref<8x256xf32, #tpu.memory_space<vmem>>, vector<8x256xf32>,
    return
  }
  func.func @transform_0(%arg0: i32) -> (i32, i32) {
    %c0_i32 = arith.constant 0 : i32
    %c0_i32_0 = arith.constant 0 : i32
    return %arg0, %c0_i32 : i32, i32
  }
  func.func @transform_1(%arg0: i32) -> (i32, i32) {
    %c0_i32 = arith.constant 0 : i32
    %c0_i32_0 = arith.constant 0 : i32
    %c0_i32_1 = arith.constant 0 : i32
    return %c0_i32, %c0_i32_0 : i32, i32
  }
  func.func @transform_2(%arg0: i32) -> (i32, i32) {
    %c0_i32 = arith.constant 0 : i32
    %c0_i32_0 = arith.constant 0 : i32
    %c0_i32_1 = arith.constant 0 : i32
    return %c0_i32, %c0_i32_0 : i32, i32
  }
  func.func @transform_3(%arg0: i32) -> (i32, i32) {
    %c0_i32 = arith.constant 0 : i32
    %c0_i32_0 = arith.constant 0 : i32
    return %arg0, %c0_i32 : i32, i32
  }
}

module attributes {stable_mosaic.version = 11 : i64} {
  func.func @_flash_mha_kernel(%arg0: i32, %arg1: i32, %arg2: i32, %arg3: memref<1x8x256xf32, #tpu.memory_space<vmem>>, %arg4: memref<1x8x256xf32, #tpu.memory_space<vmem>>, %arg5: memref<1x8x256xf32, #tpu.memory_space<vmem>>, %arg6: memref<1x8x256xf32, #tpu.memory_space<vmem>>, %arg7: memref<2x8x1xf32, #tpu.memory_space<vmem>>, %arg8: memref<2x8x1xf32, #tpu.memory_space<vmem>>, %arg9: memref<8x256xf32, #tpu.memory_space<vmem>>) attributes {dimension_semantics = [#tpu.dimension_semantics<parallel>, #tpu.dimension_semantics<parallel>, #tpu.dimension_semantics<arbitrary>], iteration_bounds = array<i64: 2, 1, 1>, scalar_prefetch = 0 : i64, scratch_operands = 3 : i64, tpu.core_type = #tpu.core_type<tc>, window_params = [{transform_indices = @transform_0, window_bounds = array<i64: 1, 8, 256>}, {transform_indices = @transform_1, window_bounds = array<i64: 1, 8, 256>}, {transform_indices = @transform_2, window_bounds = array<i64: 1, 8, 256>}, {transform_indices = @transform_3, window_bounds = array<i64: 1, 8, 256>}]} {
    %c0_i32 = arith.constant 0 : i32
    %0 = arith.cmpi eq, %arg2, %c0_i32 : i32
    %1 = arith.extui %0 : i1 to i32
    %c0_i32_0 = arith.constant 0 : i32
    %2 = arith.cmpi ne, %1, %c0_i32_0 : i32
    scf.if %2 {
      %cst_59 = arith.constant 0xFF800000 : f32
      %80 = vector.broadcast %cst_59 : f32 to vector<2x8x1xf32>
      %c0_60 = arith.constant 0 : index
      %c0_61 = arith.constant 0 : index
      %c0_62 = arith.constant 0 : index
      %81 = vector.load %arg7[%c0_60, %c0_61, %c0_62] : memref<2x8x1xf32, #tpu.memory_space<vmem>>, vector<2x8x1xf32>
      tpu.vector_store %arg7[%c0_60, %c0_61, %c0_62], %80 {strides = array<i32>} : memref<2x8x1xf32, #tpu.memory_space<vmem>>, vector<2x8x1xf32>,
      %cst_63 = arith.constant 0.000000e+00 : f32
      %82 = vector.broadcast %cst_63 : f32 to vector<2x8x1xf32>
      %c0_64 = arith.constant 0 : index
      %c0_65 = arith.constant 0 : index
      %c0_66 = arith.constant 0 : index
      %83 = vector.load %arg8[%c0_64, %c0_65, %c0_66] : memref<2x8x1xf32, #tpu.memory_space<vmem>>, vector<2x8x1xf32>
      tpu.vector_store %arg8[%c0_64, %c0_65, %c0_66], %82 {strides = array<i32>} : memref<2x8x1xf32, #tpu.memory_space<vmem>>, vector<2x8x1xf32>,
      %cst_67 = arith.constant 0.000000e+00 : f32
      %84 = vector.broadcast %cst_67 : f32 to vector<8x256xf32>
      %c0_68 = arith.constant 0 : index
      %c0_69 = arith.constant 0 : index
      %85 = vector.load %arg9[%c0_68, %c0_69] : memref<8x256xf32, #tpu.memory_space<vmem>>, vector<8x256xf32>
      tpu.vector_store %arg9[%c0_68, %c0_69], %84 {strides = array<i32>} : memref<8x256xf32, #tpu.memory_space<vmem>>, vector<8x256xf32>,
    } else {
    }
    %c0 = arith.constant 0 : index
    %c0_1 = arith.constant 0 : index
    %c0_2 = arith.constant 0 : index
    %3 = vector.load %arg3[%c0, %c0_1, %c0_2] : memref<1x8x256xf32, #tpu.memory_space<vmem>>, vector<1x8x128xf32>
    %4 = vector.shape_cast %3 : vector<1x8x128xf32> to vector<8x128xf32>
    %cst = arith.constant 0.0883883461 : f32
    %5 = vector.broadcast %cst : f32 to vector<8x128xf32>
    %6 = arith.mulf %4, %5 : vector<8x128xf32>
    %c0_3 = arith.constant 0 : index
    %c0_4 = arith.constant 0 : index
    %c0_5 = arith.constant 0 : index
    %7 = vector.load %arg4[%c0_3, %c0_4, %c0_5] : memref<1x8x256xf32, #tpu.memory_space<vmem>>, vector<1x8x128xf32>
    %8 = vector.shape_cast %7 : vector<1x8x128xf32> to vector<8x128xf32>
    %c0_6 = arith.constant 0 : index
    %c0_7 = arith.constant 0 : index
    %c0_8 = arith.constant 0 : index
    %9 = vector.load %arg5[%c0_6, %c0_7, %c0_8] : memref<1x8x256xf32, #tpu.memory_space<vmem>>, vector<1x8x128xf32>
    %10 = vector.shape_cast %9 : vector<1x8x128xf32> to vector<8x128xf32>
    %cst_9 = arith.constant dense<0.000000e+00> : vector<8x8xf32>
    %11 = tpu.matmul %6, %8, %cst_9 {dimension_numbers = #tpu.dot_dimension_numbers<[1], [1], [0], [0], [0, 0, 1, 0], [], []>} : vector<8x128xf32>, vector<8x128xf32>, vector<8x8xf32> -> vector<8x8xf32>
    %c0_10 = arith.constant 0 : index
    %c0_11 = arith.constant 0 : index
    %c0_12 = arith.constant 0 : index
    %12 = vector.load %arg7[%c0_10, %c0_11, %c0_12] : memref<2x8x1xf32, #tpu.memory_space<vmem>>, vector<1x8x1xf32>
    %13 = vector.shape_cast %12 : vector<1x8x1xf32> to vector<8x1xf32>
    %cst_13 = arith.constant dense<0xFF800000> : vector<8xf32>
    %14 = vector.multi_reduction <maximumf>, %11, %cst_13 [1] : vector<8x8xf32> to vector<8xf32>
    %15 = vector.shape_cast %14 : vector<8xf32> to vector<8x1xf32>
    %16 = arith.maximumf %13, %15 : vector<8x1xf32>
    %17 = arith.subf %13, %16 : vector<8x1xf32>
    %18 = math.exp %17 : vector<8x1xf32>
    %19 = vector.broadcast %16 : vector<8x1xf32> to vector<8x8xf32>
    %20 = arith.subf %11, %19 : vector<8x8xf32>
    %21 = math.exp %20 : vector<8x8xf32>
    %c0_14 = arith.constant 0 : index
    %c0_15 = arith.constant 0 : index
    %c0_16 = arith.constant 0 : index
    %22 = vector.load %arg8[%c0_14, %c0_15, %c0_16] : memref<2x8x1xf32, #tpu.memory_space<vmem>>, vector<1x8x1xf32>
    %23 = vector.shape_cast %22 : vector<1x8x1xf32> to vector<8x1xf32>
    %24 = arith.mulf %18, %23 : vector<8x1xf32>
    %cst_17 = arith.constant dense<0.000000e+00> : vector<8xf32>
    %25 = vector.multi_reduction <add>, %21, %cst_17 [1] : vector<8x8xf32> to vector<8xf32>
    %26 = vector.shape_cast %25 : vector<8xf32> to vector<8x1xf32>
    %27 = arith.addf %24, %26 : vector<8x1xf32>
    %c0_18 = arith.constant 0 : index
    %c0_19 = arith.constant 0 : index
    %c0_20 = arith.constant 0 : index
    %28 = vector.load %arg8[%c0_18, %c0_19, %c0_20] : memref<2x8x1xf32, #tpu.memory_space<vmem>>, vector<1x8x1xf32>
    %29 = vector.shape_cast %28 : vector<1x8x1xf32> to vector<8x1xf32>
    %30 = vector.shape_cast %27 : vector<8x1xf32> to vector<1x8x1xf32>
    tpu.vector_store %arg8[%c0_18, %c0_19, %c0_20], %30 {strides = array<i32>} : memref<2x8x1xf32, #tpu.memory_space<vmem>>, vector<1x8x1xf32>,
    %cst_21 = arith.constant dense<0.000000e+00> : vector<8x128xf32>
    %31 = tpu.matmul %21, %10, %cst_21 {dimension_numbers = #tpu.dot_dimension_numbers<[1], [0], [0], [1], [0, 0, 1, 1], [], []>} : vector<8x8xf32>, vector<8x128xf32>, vector<8x128xf32> -> vector<8x128xf32>
    %c0_22 = arith.constant 0 : index
    %c0_23 = arith.constant 0 : index
    %32 = vector.load %arg9[%c0_22, %c0_23] : memref<8x256xf32, #tpu.memory_space<vmem>>, vector<8x128xf32>
    %33 = vector.broadcast %18 : vector<8x1xf32> to vector<8x128xf32>
    %34 = arith.mulf %33, %32 : vector<8x128xf32>
    %35 = arith.addf %34, %31 : vector<8x128xf32>
    %c0_24 = arith.constant 0 : index
    %c0_25 = arith.constant 0 : index
    %36 = vector.load %arg9[%c0_24, %c0_25] : memref<8x256xf32, #tpu.memory_space<vmem>>, vector<8x128xf32>
    tpu.vector_store %arg9[%c0_24, %c0_25], %35 {strides = array<i32>} : memref<8x256xf32, #tpu.memory_space<vmem>>, vector<8x128xf32>,
    %c0_26 = arith.constant 0 : index
    %c0_27 = arith.constant 0 : index
    %c0_28 = arith.constant 0 : index
    %37 = vector.load %arg7[%c0_26, %c0_27, %c0_28] : memref<2x8x1xf32, #tpu.memory_space<vmem>>, vector<1x8x1xf32>
    %38 = vector.shape_cast %37 : vector<1x8x1xf32> to vector<8x1xf32>
    %39 = vector.shape_cast %16 : vector<8x1xf32> to vector<1x8x1xf32>
    tpu.vector_store %arg7[%c0_26, %c0_27, %c0_28], %39 {strides = array<i32>} : memref<2x8x1xf32, #tpu.memory_space<vmem>>, vector<1x8x1xf32>,
    %c0_29 = arith.constant 0 : index
    %c0_30 = arith.constant 0 : index
    %c128 = arith.constant 128 : index
    %40 = vector.load %arg3[%c0_29, %c0_30, %c128] : memref<1x8x256xf32, #tpu.memory_space<vmem>>, vector<1x8x128xf32>
    %41 = vector.shape_cast %40 : vector<1x8x128xf32> to vector<8x128xf32>
    %cst_31 = arith.constant 0.0883883461 : f32
    %42 = vector.broadcast %cst_31 : f32 to vector<8x128xf32>
    %43 = arith.mulf %41, %42 : vector<8x128xf32>
    %c0_32 = arith.constant 0 : index
    %c0_33 = arith.constant 0 : index
    %c128_34 = arith.constant 128 : index
    %44 = vector.load %arg4[%c0_32, %c0_33, %c128_34] : memref<1x8x256xf32, #tpu.memory_space<vmem>>, vector<1x8x128xf32>
    %45 = vector.shape_cast %44 : vector<1x8x128xf32> to vector<8x128xf32>
    %c0_35 = arith.constant 0 : index
    %c0_36 = arith.constant 0 : index
    %c128_37 = arith.constant 128 : index
    %46 = vector.load %arg5[%c0_35, %c0_36, %c128_37] : memref<1x8x256xf32, #tpu.memory_space<vmem>>, vector<1x8x128xf32>
    %47 = vector.shape_cast %46 : vector<1x8x128xf32> to vector<8x128xf32>
    %cst_38 = arith.constant dense<0.000000e+00> : vector<8x8xf32>
    %48 = tpu.matmul %43, %45, %cst_38 {dimension_numbers = #tpu.dot_dimension_numbers<[1], [1], [0], [0], [0, 0, 1, 0], [], []>} : vector<8x128xf32>, vector<8x128xf32>, vector<8x8xf32> -> vector<8x8xf32>
    %c1 = arith.constant 1 : index
    %c0_39 = arith.constant 0 : index
    %c0_40 = arith.constant 0 : index
    %49 = vector.load %arg7[%c1, %c0_39, %c0_40] : memref<2x8x1xf32, #tpu.memory_space<vmem>>, vector<1x8x1xf32>
    %50 = vector.shape_cast %49 : vector<1x8x1xf32> to vector<8x1xf32>
    %cst_41 = arith.constant dense<0xFF800000> : vector<8xf32>
    %51 = vector.multi_reduction <maximumf>, %48, %cst_41 [1] : vector<8x8xf32> to vector<8xf32>
    %52 = vector.shape_cast %51 : vector<8xf32> to vector<8x1xf32>
    %53 = arith.maximumf %50, %52 : vector<8x1xf32>
    %54 = arith.subf %50, %53 : vector<8x1xf32>
    %55 = math.exp %54 : vector<8x1xf32>
    %56 = vector.broadcast %53 : vector<8x1xf32> to vector<8x8xf32>
    %57 = arith.subf %48, %56 : vector<8x8xf32>
    %58 = math.exp %57 : vector<8x8xf32>
    %c1_42 = arith.constant 1 : index
    %c0_43 = arith.constant 0 : index
    %c0_44 = arith.constant 0 : index
    %59 = vector.load %arg8[%c1_42, %c0_43, %c0_44] : memref<2x8x1xf32, #tpu.memory_space<vmem>>, vector<1x8x1xf32>
    %60 = vector.shape_cast %59 : vector<1x8x1xf32> to vector<8x1xf32>
    %61 = arith.mulf %55, %60 : vector<8x1xf32>
    %cst_45 = arith.constant dense<0.000000e+00> : vector<8xf32>
    %62 = vector.multi_reduction <add>, %58, %cst_45 [1] : vector<8x8xf32> to vector<8xf32>
    %63 = vector.shape_cast %62 : vector<8xf32> to vector<8x1xf32>
    %64 = arith.addf %61, %63 : vector<8x1xf32>
    %c1_46 = arith.constant 1 : index
    %c0_47 = arith.constant 0 : index
    %c0_48 = arith.constant 0 : index
    %65 = vector.load %arg8[%c1_46, %c0_47, %c0_48] : memref<2x8x1xf32, #tpu.memory_space<vmem>>, vector<1x8x1xf32>
    %66 = vector.shape_cast %65 : vector<1x8x1xf32> to vector<8x1xf32>
    %67 = vector.shape_cast %64 : vector<8x1xf32> to vector<1x8x1xf32>
    tpu.vector_store %arg8[%c1_46, %c0_47, %c0_48], %67 {strides = array<i32>} : memref<2x8x1xf32, #tpu.memory_space<vmem>>, vector<1x8x1xf32>,
    %cst_49 = arith.constant dense<0.000000e+00> : vector<8x128xf32>
    %68 = tpu.matmul %58, %47, %cst_49 {dimension_numbers = #tpu.dot_dimension_numbers<[1], [0], [0], [1], [0, 0, 1, 1], [], []>} : vector<8x8xf32>, vector<8x128xf32>, vector<8x128xf32> -> vector<8x128xf32>
    %c0_50 = arith.constant 0 : index
    %c128_51 = arith.constant 128 : index
    %69 = vector.load %arg9[%c0_50, %c128_51] : memref<8x256xf32, #tpu.memory_space<vmem>>, vector<8x128xf32>
    %70 = vector.broadcast %55 : vector<8x1xf32> to vector<8x128xf32>
    %71 = arith.mulf %70, %69 : vector<8x128xf32>
    %72 = arith.addf %71, %68 : vector<8x128xf32>
    %c0_52 = arith.constant 0 : index
    %c128_53 = arith.constant 128 : index
    %73 = vector.load %arg9[%c0_52, %c128_53] : memref<8x256xf32, #tpu.memory_space<vmem>>, vector<8x128xf32>
    tpu.vector_store %arg9[%c0_52, %c128_53], %72 {strides = array<i32>} : memref<8x256xf32, #tpu.memory_space<vmem>>, vector<8x128xf32>,
    %c1_54 = arith.constant 1 : index
    %c0_55 = arith.constant 0 : index
    %c0_56 = arith.constant 0 : index
    %74 = vector.load %arg7[%c1_54, %c0_55, %c0_56] : memref<2x8x1xf32, #tpu.memory_space<vmem>>, vector<1x8x1xf32>
    %75 = vector.shape_cast %74 : vector<1x8x1xf32> to vector<8x1xf32>
    %76 = vector.shape_cast %53 : vector<8x1xf32> to vector<1x8x1xf32>
    tpu.vector_store %arg7[%c1_54, %c0_55, %c0_56], %76 {strides = array<i32>} : memref<2x8x1xf32, #tpu.memory_space<vmem>>, vector<1x8x1xf32>,
    %c0_i32_57 = arith.constant 0 : i32
    %77 = arith.cmpi eq, %arg2, %c0_i32_57 : i32
    %78 = arith.extui %77 : i1 to i32
    %c0_i32_58 = arith.constant 0 : i32
    %79 = arith.cmpi ne, %78, %c0_i32_58 : i32
    scf.if %79 {
      %c0_59 = arith.constant 0 : index
      %c0_60 = arith.constant 0 : index
      %c0_61 = arith.constant 0 : index
      %80 = vector.load %arg8[%c0_59, %c0_60, %c0_61] : memref<2x8x1xf32, #tpu.memory_space<vmem>>, vector<1x8x1xf32>
      %81 = vector.shape_cast %80 : vector<1x8x1xf32> to vector<8x1xf32>
      %82 = tpu.reciprocal %81 {approx = true} : vector<8x1xf32> -> vector<8x1xf32>
      %c0_62 = arith.constant 0 : index
      %c0_63 = arith.constant 0 : index
      %83 = vector.load %arg9[%c0_62, %c0_63] : memref<8x256xf32, #tpu.memory_space<vmem>>, vector<8x128xf32>
      %84 = vector.broadcast %82 : vector<8x1xf32> to vector<8x128xf32>
      %85 = arith.mulf %83, %84 : vector<8x128xf32>
      %c0_64 = arith.constant 0 : index
      %c0_65 = arith.constant 0 : index
      %c0_66 = arith.constant 0 : index
      %86 = vector.load %arg6[%c0_64, %c0_65, %c0_66] : memref<1x8x256xf32, #tpu.memory_space<vmem>>, vector<1x8x128xf32>
      %87 = vector.shape_cast %86 : vector<1x8x128xf32> to vector<8x128xf32>
      %88 = vector.shape_cast %85 : vector<8x128xf32> to vector<1x8x128xf32>
      tpu.vector_store %arg6[%c0_64, %c0_65, %c0_66], %88 {strides = array<i32>} : memref<1x8x256xf32, #tpu.memory_space<vmem>>, vector<1x8x128xf32>,
      %c1_67 = arith.constant 1 : index
      %c0_68 = arith.constant 0 : index
      %c0_69 = arith.constant 0 : index
      %89 = vector.load %arg8[%c1_67, %c0_68, %c0_69] : memref<2x8x1xf32, #tpu.memory_space<vmem>>, vector<1x8x1xf32>
      %90 = vector.shape_cast %89 : vector<1x8x1xf32> to vector<8x1xf32>
      %91 = tpu.reciprocal %90 {approx = true} : vector<8x1xf32> -> vector<8x1xf32>
      %c0_70 = arith.constant 0 : index
      %c128_71 = arith.constant 128 : index
      %92 = vector.load %arg9[%c0_70, %c128_71] : memref<8x256xf32, #tpu.memory_space<vmem>>, vector<8x128xf32>
      %93 = vector.broadcast %91 : vector<8x1xf32> to vector<8x128xf32>
      %94 = arith.mulf %92, %93 : vector<8x128xf32>
      %c0_72 = arith.constant 0 : index
      %c0_73 = arith.constant 0 : index
      %c128_74 = arith.constant 128 : index
      %95 = vector.load %arg6[%c0_72, %c0_73, %c128_74] : memref<1x8x256xf32, #tpu.memory_space<vmem>>, vector<1x8x128xf32>
      %96 = vector.shape_cast %95 : vector<1x8x128xf32> to vector<8x128xf32>
      %97 = vector.shape_cast %94 : vector<8x128xf32> to vector<1x8x128xf32>
      tpu.vector_store %arg6[%c0_72, %c0_73, %c128_74], %97 {strides = array<i32>} : memref<1x8x256xf32, #tpu.memory_space<vmem>>, vector<1x8x128xf32>,
    } else {
    }
    return
  }
  func.func @transform_0(%arg0: i32, %arg1: i32, %arg2: i32) -> (i32, i32, i32) {
    %c0_i32 = arith.constant 0 : i32
    %c0_i32_0 = arith.constant 0 : i32
    return %arg0, %arg1, %c0_i32 : i32, i32, i32
  }
  func.func @transform_1(%arg0: i32, %arg1: i32, %arg2: i32) -> (i32, i32, i32) {
    %c1_i32 = arith.constant 1 : i32
    %c0_i32 = arith.constant 0 : i32
    return %arg0, %arg2, %c1_i32 : i32, i32, i32
  }
  func.func @transform_2(%arg0: i32, %arg1: i32, %arg2: i32) -> (i32, i32, i32) {
    %c2_i32 = arith.constant 2 : i32
    %c0_i32 = arith.constant 0 : i32
    return %arg0, %arg2, %c2_i32 : i32, i32, i32
  }
  func.func @transform_3(%arg0: i32, %arg1: i32, %arg2: i32) -> (i32, i32, i32) {
    %c0_i32 = arith.constant 0 : i32
    %c0_i32_0 = arith.constant 0 : i32
    return %arg0, %arg1, %c0_i32 : i32, i32, i32
  }
}

module attributes {stable_mosaic.version = 11 : i64} {
  func.func @_linear_kernel(%arg0: i32, %arg1: memref<16x256xf32, #tpu.memory_space<vmem>>, %arg2: memref<256x512xf32, #tpu.memory_space<vmem>>, %arg3: memref<1x512xf32, #tpu.memory_space<vmem>>, %arg4: memref<16x512xf32, #tpu.memory_space<vmem>>) attributes {dimension_semantics = [#tpu.dimension_semantics<parallel>], iteration_bounds = array<i64: 2>, scalar_prefetch = 0 : i64, scratch_operands = 0 : i64, tpu.core_type = #tpu.core_type<tc>, window_params = [{transform_indices = @transform_0, window_bounds = array<i64: 16, 256>}, {pipeline_mode = #tpu.pipeline_mode<synchronous>, transform_indices = @transform_1, window_bounds = array<i64: 256, 512>}, {pipeline_mode = #tpu.pipeline_mode<synchronous>, transform_indices = @transform_2, window_bounds = array<i64: 1, 512>}, {transform_indices = @transform_3, window_bounds = array<i64: 16, 512>}]} {
    %c0 = arith.constant 0 : index
    %c0_0 = arith.constant 0 : index
    %0 = vector.load %arg1[%c0, %c0_0] : memref<16x256xf32, #tpu.memory_space<vmem>>, vector<16x256xf32>
    %c0_1 = arith.constant 0 : index
    %c0_2 = arith.constant 0 : index
    %1 = vector.load %arg2[%c0_1, %c0_2] : memref<256x512xf32, #tpu.memory_space<vmem>>, vector<256x512xf32>
    %cst = arith.constant dense<0.000000e+00> : vector<16x512xf32>
    %2 = tpu.matmul %0, %1, %cst {dimension_numbers = #tpu.dot_dimension_numbers<[1], [0], [0], [1], [0, 0, 1, 1], [], []>} : vector<16x256xf32>, vector<256x512xf32>, vector<16x512xf32> -> vector<16x512xf32>
    %c0_3 = arith.constant 0 : index
    %c0_4 = arith.constant 0 : index
    %3 = vector.load %arg3[%c0_3, %c0_4] : memref<1x512xf32, #tpu.memory_space<vmem>>, vector<1x512xf32>
    %4 = vector.broadcast %3 : vector<1x512xf32> to vector<16x512xf32>
    %5 = arith.addf %2, %4 : vector<16x512xf32>
    %c0_5 = arith.constant 0 : index
    %c0_6 = arith.constant 0 : index
    %6 = vector.load %arg4[%c0_5, %c0_6] : memref<16x512xf32, #tpu.memory_space<vmem>>, vector<16x512xf32>
    tpu.vector_store %arg4[%c0_5, %c0_6], %5 {strides = array<i32>} : memref<16x512xf32, #tpu.memory_space<vmem>>, vector<16x512xf32>,
    return
  }
  func.func @transform_0(%arg0: i32) -> (i32, i32) {
    %c0_i32 = arith.constant 0 : i32
    %c0_i32_0 = arith.constant 0 : i32
    return %arg0, %c0_i32 : i32, i32
  }
  func.func @transform_1(%arg0: i32) -> (i32, i32) {
    %c0_i32 = arith.constant 0 : i32
    %c0_i32_0 = arith.constant 0 : i32
    %c0_i32_1 = arith.constant 0 : i32
    return %c0_i32, %c0_i32_0 : i32, i32
  }
  func.func @transform_2(%arg0: i32) -> (i32, i32) {
    %c0_i32 = arith.constant 0 : i32
    %c0_i32_0 = arith.constant 0 : i32
    %c0_i32_1 = arith.constant 0 : i32
    return %c0_i32, %c0_i32_0 : i32, i32
  }
  func.func @transform_3(%arg0: i32) -> (i32, i32) {
    %c0_i32 = arith.constant 0 : i32
    %c0_i32_0 = arith.constant 0 : i32
    return %arg0, %c0_i32 : i32, i32
  }
}

module attributes {stable_mosaic.version = 11 : i64} {
  func.func @_flash_mha_kernel(%arg0: i32, %arg1: i32, %arg2: i32, %arg3: memref<1x8x256xf32, #tpu.memory_space<vmem>>, %arg4: memref<1x8x256xf32, #tpu.memory_space<vmem>>, %arg5: memref<1x8x256xf32, #tpu.memory_space<vmem>>, %arg6: memref<1x8x256xf32, #tpu.memory_space<vmem>>, %arg7: memref<2x8x1xf32, #tpu.memory_space<vmem>>, %arg8: memref<2x8x1xf32, #tpu.memory_space<vmem>>, %arg9: memref<8x256xf32, #tpu.memory_space<vmem>>) attributes {dimension_semantics = [#tpu.dimension_semantics<parallel>, #tpu.dimension_semantics<parallel>, #tpu.dimension_semantics<arbitrary>], iteration_bounds = array<i64: 2, 1, 2>, scalar_prefetch = 0 : i64, scratch_operands = 3 : i64, tpu.core_type = #tpu.core_type<tc>, window_params = [{transform_indices = @transform_0, window_bounds = array<i64: 1, 8, 256>}, {transform_indices = @transform_1, window_bounds = array<i64: 1, 8, 256>}, {transform_indices = @transform_2, window_bounds = array<i64: 1, 8, 256>}, {transform_indices = @transform_3, window_bounds = array<i64: 1, 8, 256>}]} {
    %c0_i32 = arith.constant 0 : i32
    %0 = arith.cmpi eq, %arg2, %c0_i32 : i32
    %1 = arith.extui %0 : i1 to i32
    %c0_i32_0 = arith.constant 0 : i32
    %2 = arith.cmpi ne, %1, %c0_i32_0 : i32
    scf.if %2 {
      %cst_58 = arith.constant 0xFF800000 : f32
      %80 = vector.broadcast %cst_58 : f32 to vector<2x8x1xf32>
      %c0_59 = arith.constant 0 : index
      %c0_60 = arith.constant 0 : index
      %c0_61 = arith.constant 0 : index
      %81 = vector.load %arg7[%c0_59, %c0_60, %c0_61] : memref<2x8x1xf32, #tpu.memory_space<vmem>>, vector<2x8x1xf32>
      tpu.vector_store %arg7[%c0_59, %c0_60, %c0_61], %80 {strides = array<i32>} : memref<2x8x1xf32, #tpu.memory_space<vmem>>, vector<2x8x1xf32>,
      %cst_62 = arith.constant 0.000000e+00 : f32
      %82 = vector.broadcast %cst_62 : f32 to vector<2x8x1xf32>
      %c0_63 = arith.constant 0 : index
      %c0_64 = arith.constant 0 : index
      %c0_65 = arith.constant 0 : index
      %83 = vector.load %arg8[%c0_63, %c0_64, %c0_65] : memref<2x8x1xf32, #tpu.memory_space<vmem>>, vector<2x8x1xf32>
      tpu.vector_store %arg8[%c0_63, %c0_64, %c0_65], %82 {strides = array<i32>} : memref<2x8x1xf32, #tpu.memory_space<vmem>>, vector<2x8x1xf32>,
      %cst_66 = arith.constant 0.000000e+00 : f32
      %84 = vector.broadcast %cst_66 : f32 to vector<8x256xf32>
      %c0_67 = arith.constant 0 : index
      %c0_68 = arith.constant 0 : index
      %85 = vector.load %arg9[%c0_67, %c0_68] : memref<8x256xf32, #tpu.memory_space<vmem>>, vector<8x256xf32>
      tpu.vector_store %arg9[%c0_67, %c0_68], %84 {strides = array<i32>} : memref<8x256xf32, #tpu.memory_space<vmem>>, vector<8x256xf32>,
    } else {
    }
    %c0 = arith.constant 0 : index
    %c0_1 = arith.constant 0 : index
    %c0_2 = arith.constant 0 : index
    %3 = vector.load %arg3[%c0, %c0_1, %c0_2] : memref<1x8x256xf32, #tpu.memory_space<vmem>>, vector<1x8x128xf32>
    %4 = vector.shape_cast %3 : vector<1x8x128xf32> to vector<8x128xf32>
    %cst = arith.constant 0.0883883461 : f32
    %5 = vector.broadcast %cst : f32 to vector<8x128xf32>
    %6 = arith.mulf %4, %5 : vector<8x128xf32>
    %c0_3 = arith.constant 0 : index
    %c0_4 = arith.constant 0 : index
    %c0_5 = arith.constant 0 : index
    %7 = vector.load %arg4[%c0_3, %c0_4, %c0_5] : memref<1x8x256xf32, #tpu.memory_space<vmem>>, vector<1x8x128xf32>
    %8 = vector.shape_cast %7 : vector<1x8x128xf32> to vector<8x128xf32>
    %c0_6 = arith.constant 0 : index
    %c0_7 = arith.constant 0 : index
    %c0_8 = arith.constant 0 : index
    %9 = vector.load %arg5[%c0_6, %c0_7, %c0_8] : memref<1x8x256xf32, #tpu.memory_space<vmem>>, vector<1x8x128xf32>
    %10 = vector.shape_cast %9 : vector<1x8x128xf32> to vector<8x128xf32>
    %cst_9 = arith.constant dense<0.000000e+00> : vector<8x8xf32>
    %11 = tpu.matmul %6, %8, %cst_9 {dimension_numbers = #tpu.dot_dimension_numbers<[1], [1], [0], [0], [0, 0, 1, 0], [], []>} : vector<8x128xf32>, vector<8x128xf32>, vector<8x8xf32> -> vector<8x8xf32>
    %c0_10 = arith.constant 0 : index
    %c0_11 = arith.constant 0 : index
    %c0_12 = arith.constant 0 : index
    %12 = vector.load %arg7[%c0_10, %c0_11, %c0_12] : memref<2x8x1xf32, #tpu.memory_space<vmem>>, vector<1x8x1xf32>
    %13 = vector.shape_cast %12 : vector<1x8x1xf32> to vector<8x1xf32>
    %cst_13 = arith.constant dense<0xFF800000> : vector<8xf32>
    %14 = vector.multi_reduction <maximumf>, %11, %cst_13 [1] : vector<8x8xf32> to vector<8xf32>
    %15 = vector.shape_cast %14 : vector<8xf32> to vector<8x1xf32>
    %16 = arith.maximumf %13, %15 : vector<8x1xf32>
    %17 = arith.subf %13, %16 : vector<8x1xf32>
    %18 = math.exp %17 : vector<8x1xf32>
    %19 = vector.broadcast %16 : vector<8x1xf32> to vector<8x8xf32>
    %20 = arith.subf %11, %19 : vector<8x8xf32>
    %21 = math.exp %20 : vector<8x8xf32>
    %c0_14 = arith.constant 0 : index
    %c0_15 = arith.constant 0 : index
    %c0_16 = arith.constant 0 : index
    %22 = vector.load %arg8[%c0_14, %c0_15, %c0_16] : memref<2x8x1xf32, #tpu.memory_space<vmem>>, vector<1x8x1xf32>
    %23 = vector.shape_cast %22 : vector<1x8x1xf32> to vector<8x1xf32>
    %24 = arith.mulf %18, %23 : vector<8x1xf32>
    %cst_17 = arith.constant dense<0.000000e+00> : vector<8xf32>
    %25 = vector.multi_reduction <add>, %21, %cst_17 [1] : vector<8x8xf32> to vector<8xf32>
    %26 = vector.shape_cast %25 : vector<8xf32> to vector<8x1xf32>
    %27 = arith.addf %24, %26 : vector<8x1xf32>
    %c0_18 = arith.constant 0 : index
    %c0_19 = arith.constant 0 : index
    %c0_20 = arith.constant 0 : index
    %28 = vector.load %arg8[%c0_18, %c0_19, %c0_20] : memref<2x8x1xf32, #tpu.memory_space<vmem>>, vector<1x8x1xf32>
    %29 = vector.shape_cast %28 : vector<1x8x1xf32> to vector<8x1xf32>
    %30 = vector.shape_cast %27 : vector<8x1xf32> to vector<1x8x1xf32>
    tpu.vector_store %arg8[%c0_18, %c0_19, %c0_20], %30 {strides = array<i32>} : memref<2x8x1xf32, #tpu.memory_space<vmem>>, vector<1x8x1xf32>,
    %cst_21 = arith.constant dense<0.000000e+00> : vector<8x128xf32>
    %31 = tpu.matmul %21, %10, %cst_21 {dimension_numbers = #tpu.dot_dimension_numbers<[1], [0], [0], [1], [0, 0, 1, 1], [], []>} : vector<8x8xf32>, vector<8x128xf32>, vector<8x128xf32> -> vector<8x128xf32>
    %c0_22 = arith.constant 0 : index
    %c0_23 = arith.constant 0 : index
    %32 = vector.load %arg9[%c0_22, %c0_23] : memref<8x256xf32, #tpu.memory_space<vmem>>, vector<8x128xf32>
    %33 = vector.broadcast %18 : vector<8x1xf32> to vector<8x128xf32>
    %34 = arith.mulf %33, %32 : vector<8x128xf32>
    %35 = arith.addf %34, %31 : vector<8x128xf32>
    %c0_24 = arith.constant 0 : index
    %c0_25 = arith.constant 0 : index
    %36 = vector.load %arg9[%c0_24, %c0_25] : memref<8x256xf32, #tpu.memory_space<vmem>>, vector<8x128xf32>
    tpu.vector_store %arg9[%c0_24, %c0_25], %35 {strides = array<i32>} : memref<8x256xf32, #tpu.memory_space<vmem>>, vector<8x128xf32>,
    %c0_26 = arith.constant 0 : index
    %c0_27 = arith.constant 0 : index
    %c0_28 = arith.constant 0 : index
    %37 = vector.load %arg7[%c0_26, %c0_27, %c0_28] : memref<2x8x1xf32, #tpu.memory_space<vmem>>, vector<1x8x1xf32>
    %38 = vector.shape_cast %37 : vector<1x8x1xf32> to vector<8x1xf32>
    %39 = vector.shape_cast %16 : vector<8x1xf32> to vector<1x8x1xf32>
    tpu.vector_store %arg7[%c0_26, %c0_27, %c0_28], %39 {strides = array<i32>} : memref<2x8x1xf32, #tpu.memory_space<vmem>>, vector<1x8x1xf32>,
    %c0_29 = arith.constant 0 : index
    %c0_30 = arith.constant 0 : index
    %c128 = arith.constant 128 : index
    %40 = vector.load %arg3[%c0_29, %c0_30, %c128] : memref<1x8x256xf32, #tpu.memory_space<vmem>>, vector<1x8x128xf32>
    %41 = vector.shape_cast %40 : vector<1x8x128xf32> to vector<8x128xf32>
    %cst_31 = arith.constant 0.0883883461 : f32
    %42 = vector.broadcast %cst_31 : f32 to vector<8x128xf32>
    %43 = arith.mulf %41, %42 : vector<8x128xf32>
    %c0_32 = arith.constant 0 : index
    %c0_33 = arith.constant 0 : index
    %c128_34 = arith.constant 128 : index
    %44 = vector.load %arg4[%c0_32, %c0_33, %c128_34] : memref<1x8x256xf32, #tpu.memory_space<vmem>>, vector<1x8x128xf32>
    %45 = vector.shape_cast %44 : vector<1x8x128xf32> to vector<8x128xf32>
    %c0_35 = arith.constant 0 : index
    %c0_36 = arith.constant 0 : index
    %c128_37 = arith.constant 128 : index
    %46 = vector.load %arg5[%c0_35, %c0_36, %c128_37] : memref<1x8x256xf32, #tpu.memory_space<vmem>>, vector<1x8x128xf32>
    %47 = vector.shape_cast %46 : vector<1x8x128xf32> to vector<8x128xf32>
    %cst_38 = arith.constant dense<0.000000e+00> : vector<8x8xf32>
    %48 = tpu.matmul %43, %45, %cst_38 {dimension_numbers = #tpu.dot_dimension_numbers<[1], [1], [0], [0], [0, 0, 1, 0], [], []>} : vector<8x128xf32>, vector<8x128xf32>, vector<8x8xf32> -> vector<8x8xf32>
    %c1 = arith.constant 1 : index
    %c0_39 = arith.constant 0 : index
    %c0_40 = arith.constant 0 : index
    %49 = vector.load %arg7[%c1, %c0_39, %c0_40] : memref<2x8x1xf32, #tpu.memory_space<vmem>>, vector<1x8x1xf32>
    %50 = vector.shape_cast %49 : vector<1x8x1xf32> to vector<8x1xf32>
    %cst_41 = arith.constant dense<0xFF800000> : vector<8xf32>
    %51 = vector.multi_reduction <maximumf>, %48, %cst_41 [1] : vector<8x8xf32> to vector<8xf32>
    %52 = vector.shape_cast %51 : vector<8xf32> to vector<8x1xf32>
    %53 = arith.maximumf %50, %52 : vector<8x1xf32>
    %54 = arith.subf %50, %53 : vector<8x1xf32>
    %55 = math.exp %54 : vector<8x1xf32>
    %56 = vector.broadcast %53 : vector<8x1xf32> to vector<8x8xf32>
    %57 = arith.subf %48, %56 : vector<8x8xf32>
    %58 = math.exp %57 : vector<8x8xf32>
    %c1_42 = arith.constant 1 : index
    %c0_43 = arith.constant 0 : index
    %c0_44 = arith.constant 0 : index
    %59 = vector.load %arg8[%c1_42, %c0_43, %c0_44] : memref<2x8x1xf32, #tpu.memory_space<vmem>>, vector<1x8x1xf32>
    %60 = vector.shape_cast %59 : vector<1x8x1xf32> to vector<8x1xf32>
    %61 = arith.mulf %55, %60 : vector<8x1xf32>
    %cst_45 = arith.constant dense<0.000000e+00> : vector<8xf32>
    %62 = vector.multi_reduction <add>, %58, %cst_45 [1] : vector<8x8xf32> to vector<8xf32>
    %63 = vector.shape_cast %62 : vector<8xf32> to vector<8x1xf32>
    %64 = arith.addf %61, %63 : vector<8x1xf32>
    %c1_46 = arith.constant 1 : index
    %c0_47 = arith.constant 0 : index
    %c0_48 = arith.constant 0 : index
    %65 = vector.load %arg8[%c1_46, %c0_47, %c0_48] : memref<2x8x1xf32, #tpu.memory_space<vmem>>, vector<1x8x1xf32>
    %66 = vector.shape_cast %65 : vector<1x8x1xf32> to vector<8x1xf32>
    %67 = vector.shape_cast %64 : vector<8x1xf32> to vector<1x8x1xf32>
    tpu.vector_store %arg8[%c1_46, %c0_47, %c0_48], %67 {strides = array<i32>} : memref<2x8x1xf32, #tpu.memory_space<vmem>>, vector<1x8x1xf32>,
    %cst_49 = arith.constant dense<0.000000e+00> : vector<8x128xf32>
    %68 = tpu.matmul %58, %47, %cst_49 {dimension_numbers = #tpu.dot_dimension_numbers<[1], [0], [0], [1], [0, 0, 1, 1], [], []>} : vector<8x8xf32>, vector<8x128xf32>, vector<8x128xf32> -> vector<8x128xf32>
    %c0_50 = arith.constant 0 : index
    %c128_51 = arith.constant 128 : index
    %69 = vector.load %arg9[%c0_50, %c128_51] : memref<8x256xf32, #tpu.memory_space<vmem>>, vector<8x128xf32>
    %70 = vector.broadcast %55 : vector<8x1xf32> to vector<8x128xf32>
    %71 = arith.mulf %70, %69 : vector<8x128xf32>
    %72 = arith.addf %71, %68 : vector<8x128xf32>
    %c0_52 = arith.constant 0 : index
    %c128_53 = arith.constant 128 : index
    %73 = vector.load %arg9[%c0_52, %c128_53] : memref<8x256xf32, #tpu.memory_space<vmem>>, vector<8x128xf32>
    tpu.vector_store %arg9[%c0_52, %c128_53], %72 {strides = array<i32>} : memref<8x256xf32, #tpu.memory_space<vmem>>, vector<8x128xf32>,
    %c1_54 = arith.constant 1 : index
    %c0_55 = arith.constant 0 : index
    %c0_56 = arith.constant 0 : index
    %74 = vector.load %arg7[%c1_54, %c0_55, %c0_56] : memref<2x8x1xf32, #tpu.memory_space<vmem>>, vector<1x8x1xf32>
    %75 = vector.shape_cast %74 : vector<1x8x1xf32> to vector<8x1xf32>
    %76 = vector.shape_cast %53 : vector<8x1xf32> to vector<1x8x1xf32>
    tpu.vector_store %arg7[%c1_54, %c0_55, %c0_56], %76 {strides = array<i32>} : memref<2x8x1xf32, #tpu.memory_space<vmem>>, vector<1x8x1xf32>,
    %c1_i32 = arith.constant 1 : i32
    %77 = arith.cmpi eq, %arg2, %c1_i32 : i32
    %78 = arith.extui %77 : i1 to i32
    %c0_i32_57 = arith.constant 0 : i32
    %79 = arith.cmpi ne, %78, %c0_i32_57 : i32
    scf.if %79 {
      %c0_58 = arith.constant 0 : index
      %c0_59 = arith.constant 0 : index
      %c0_60 = arith.constant 0 : index
      %80 = vector.load %arg8[%c0_58, %c0_59, %c0_60] : memref<2x8x1xf32, #tpu.memory_space<vmem>>, vector<1x8x1xf32>
      %81 = vector.shape_cast %80 : vector<1x8x1xf32> to vector<8x1xf32>
      %82 = tpu.reciprocal %81 {approx = true} : vector<8x1xf32> -> vector<8x1xf32>
      %c0_61 = arith.constant 0 : index
      %c0_62 = arith.constant 0 : index
      %83 = vector.load %arg9[%c0_61, %c0_62] : memref<8x256xf32, #tpu.memory_space<vmem>>, vector<8x128xf32>
      %84 = vector.broadcast %82 : vector<8x1xf32> to vector<8x128xf32>
      %85 = arith.mulf %83, %84 : vector<8x128xf32>
      %c0_63 = arith.constant 0 : index
      %c0_64 = arith.constant 0 : index
      %c0_65 = arith.constant 0 : index
      %86 = vector.load %arg6[%c0_63, %c0_64, %c0_65] : memref<1x8x256xf32, #tpu.memory_space<vmem>>, vector<1x8x128xf32>
      %87 = vector.shape_cast %86 : vector<1x8x128xf32> to vector<8x128xf32>
      %88 = vector.shape_cast %85 : vector<8x128xf32> to vector<1x8x128xf32>
      tpu.vector_store %arg6[%c0_63, %c0_64, %c0_65], %88 {strides = array<i32>} : memref<1x8x256xf32, #tpu.memory_space<vmem>>, vector<1x8x128xf32>,
      %c1_66 = arith.constant 1 : index
      %c0_67 = arith.constant 0 : index
      %c0_68 = arith.constant 0 : index
      %89 = vector.load %arg8[%c1_66, %c0_67, %c0_68] : memref<2x8x1xf32, #tpu.memory_space<vmem>>, vector<1x8x1xf32>
      %90 = vector.shape_cast %89 : vector<1x8x1xf32> to vector<8x1xf32>
      %91 = tpu.reciprocal %90 {approx = true} : vector<8x1xf32> -> vector<8x1xf32>
      %c0_69 = arith.constant 0 : index
      %c128_70 = arith.constant 128 : index
      %92 = vector.load %arg9[%c0_69, %c128_70] : memref<8x256xf32, #tpu.memory_space<vmem>>, vector<8x128xf32>
      %93 = vector.broadcast %91 : vector<8x1xf32> to vector<8x128xf32>
      %94 = arith.mulf %92, %93 : vector<8x128xf32>
      %c0_71 = arith.constant 0 : index
      %c0_72 = arith.constant 0 : index
      %c128_73 = arith.constant 128 : index
      %95 = vector.load %arg6[%c0_71, %c0_72, %c128_73] : memref<1x8x256xf32, #tpu.memory_space<vmem>>, vector<1x8x128xf32>
      %96 = vector.shape_cast %95 : vector<1x8x128xf32> to vector<8x128xf32>
      %97 = vector.shape_cast %94 : vector<8x128xf32> to vector<1x8x128xf32>
      tpu.vector_store %arg6[%c0_71, %c0_72, %c128_73], %97 {strides = array<i32>} : memref<1x8x256xf32, #tpu.memory_space<vmem>>, vector<1x8x128xf32>,
    } else {
    }
    return
  }
  func.func @transform_0(%arg0: i32, %arg1: i32, %arg2: i32) -> (i32, i32, i32) {
    %c0_i32 = arith.constant 0 : i32
    %c0_i32_0 = arith.constant 0 : i32
    return %arg0, %arg1, %c0_i32 : i32, i32, i32
  }
  func.func @transform_1(%arg0: i32, %arg1: i32, %arg2: i32) -> (i32, i32, i32) {
    %c0_i32 = arith.constant 0 : i32
    %c0_i32_0 = arith.constant 0 : i32
    return %arg0, %arg2, %c0_i32 : i32, i32, i32
  }
  func.func @transform_2(%arg0: i32, %arg1: i32, %arg2: i32) -> (i32, i32, i32) {
    %c1_i32 = arith.constant 1 : i32
    %c0_i32 = arith.constant 0 : i32
    return %arg0, %arg2, %c1_i32 : i32, i32, i32
  }
  func.func @transform_3(%arg0: i32, %arg1: i32, %arg2: i32) -> (i32, i32, i32) {
    %c0_i32 = arith.constant 0 : i32
    %c0_i32_0 = arith.constant 0 : i32
    return %arg0, %arg1, %c0_i32 : i32, i32, i32
  }
}

module attributes {stable_mosaic.version = 11 : i64} {
  func.func @_proj_add_ln_kernel(%arg0: i32, %arg1: memref<8x256xf32, #tpu.memory_space<vmem>>, %arg2: memref<8x256xf32, #tpu.memory_space<vmem>>, %arg3: memref<256x256xf32, #tpu.memory_space<vmem>>, %arg4: memref<1x256xf32, #tpu.memory_space<vmem>>, %arg5: memref<1x256xf32, #tpu.memory_space<vmem>>, %arg6: memref<1x256xf32, #tpu.memory_space<vmem>>, %arg7: memref<8x256xf32, #tpu.memory_space<vmem>>) attributes {dimension_semantics = [#tpu.dimension_semantics<parallel>], iteration_bounds = array<i64: 2>, scalar_prefetch = 0 : i64, scratch_operands = 0 : i64, tpu.core_type = #tpu.core_type<tc>, window_params = [{transform_indices = @transform_0, window_bounds = array<i64: 8, 256>}, {transform_indices = @transform_1, window_bounds = array<i64: 8, 256>}, {pipeline_mode = #tpu.pipeline_mode<synchronous>, transform_indices = @transform_2, window_bounds = array<i64: 256, 256>}, {pipeline_mode = #tpu.pipeline_mode<synchronous>, transform_indices = @transform_3, window_bounds = array<i64: 1, 256>}, {pipeline_mode = #tpu.pipeline_mode<synchronous>, transform_indices = @transform_4, window_bounds = array<i64: 1, 256>}, {pipeline_mode = #tpu.pipeline_mode<synchronous>, transform_indices = @transform_5, window_bounds = array<i64: 1, 256>}, {transform_indices = @transform_6, window_bounds = array<i64: 8, 256>}]} {
    %c0 = arith.constant 0 : index
    %c0_0 = arith.constant 0 : index
    %0 = vector.load %arg1[%c0, %c0_0] : memref<8x256xf32, #tpu.memory_space<vmem>>, vector<8x256xf32>
    %c0_1 = arith.constant 0 : index
    %c0_2 = arith.constant 0 : index
    %1 = vector.load %arg3[%c0_1, %c0_2] : memref<256x256xf32, #tpu.memory_space<vmem>>, vector<256x256xf32>
    %cst = arith.constant dense<0.000000e+00> : vector<8x256xf32>
    %2 = tpu.matmul %0, %1, %cst {dimension_numbers = #tpu.dot_dimension_numbers<[1], [0], [0], [1], [0, 0, 1, 1], [], []>} : vector<8x256xf32>, vector<256x256xf32>, vector<8x256xf32> -> vector<8x256xf32>
    %c0_3 = arith.constant 0 : index
    %c0_4 = arith.constant 0 : index
    %3 = vector.load %arg2[%c0_3, %c0_4] : memref<8x256xf32, #tpu.memory_space<vmem>>, vector<8x256xf32>
    %4 = arith.addf %3, %2 : vector<8x256xf32>
    %c0_5 = arith.constant 0 : index
    %c0_6 = arith.constant 0 : index
    %5 = vector.load %arg4[%c0_5, %c0_6] : memref<1x256xf32, #tpu.memory_space<vmem>>, vector<1x256xf32>
    %6 = vector.broadcast %5 : vector<1x256xf32> to vector<8x256xf32>
    %7 = arith.addf %4, %6 : vector<8x256xf32>
    %cst_7 = arith.constant dense<0.000000e+00> : vector<8xf32>
    %8 = vector.multi_reduction <add>, %7, %cst_7 [1] : vector<8x256xf32> to vector<8xf32>
    %9 = vector.shape_cast %8 : vector<8xf32> to vector<8x1xf32>
    %cst_8 = arith.constant 2.560000e+02 : f32
    %10 = vector.broadcast %cst_8 : f32 to vector<8x1xf32>
    %11 = arith.divf %9, %10 : vector<8x1xf32>
    %12 = vector.broadcast %11 : vector<8x1xf32> to vector<8x256xf32>
    %13 = arith.subf %7, %12 : vector<8x256xf32>
    %14 = arith.mulf %13, %13 : vector<8x256xf32>
    %cst_9 = arith.constant dense<0.000000e+00> : vector<8xf32>
    %15 = vector.multi_reduction <add>, %14, %cst_9 [1] : vector<8x256xf32> to vector<8xf32>
    %16 = vector.shape_cast %15 : vector<8xf32> to vector<8x1xf32>
    %cst_10 = arith.constant 2.560000e+02 : f32
    %17 = vector.broadcast %cst_10 : f32 to vector<8x1xf32>
    %18 = arith.divf %16, %17 : vector<8x1xf32>
    %19 = vector.broadcast %11 : vector<8x1xf32> to vector<8x256xf32>
    %20 = arith.subf %7, %19 : vector<8x256xf32>
    %cst_11 = arith.constant 9.99999974E-6 : f32
    %21 = vector.broadcast %cst_11 : f32 to vector<8x1xf32>
    %22 = arith.addf %18, %21 : vector<8x1xf32>
    %23 = math.rsqrt %22 : vector<8x1xf32>
    %24 = vector.broadcast %23 : vector<8x1xf32> to vector<8x256xf32>
    %25 = arith.mulf %20, %24 : vector<8x256xf32>
    %c0_12 = arith.constant 0 : index
    %c0_13 = arith.constant 0 : index
    %26 = vector.load %arg5[%c0_12, %c0_13] : memref<1x256xf32, #tpu.memory_space<vmem>>, vector<1x256xf32>
    %27 = vector.broadcast %26 : vector<1x256xf32> to vector<8x256xf32>
    %28 = arith.mulf %25, %27 : vector<8x256xf32>
    %c0_14 = arith.constant 0 : index
    %c0_15 = arith.constant 0 : index
    %29 = vector.load %arg6[%c0_14, %c0_15] : memref<1x256xf32, #tpu.memory_space<vmem>>, vector<1x256xf32>
    %30 = vector.broadcast %29 : vector<1x256xf32> to vector<8x256xf32>
    %31 = arith.addf %28, %30 : vector<8x256xf32>
    %c0_16 = arith.constant 0 : index
    %c0_17 = arith.constant 0 : index
    %32 = vector.load %arg7[%c0_16, %c0_17] : memref<8x256xf32, #tpu.memory_space<vmem>>, vector<8x256xf32>
    tpu.vector_store %arg7[%c0_16, %c0_17], %31 {strides = array<i32>} : memref<8x256xf32, #tpu.memory_space<vmem>>, vector<8x256xf32>,
    return
  }
  func.func @transform_0(%arg0: i32) -> (i32, i32) {
    %c0_i32 = arith.constant 0 : i32
    %c0_i32_0 = arith.constant 0 : i32
    return %arg0, %c0_i32 : i32, i32
  }
  func.func @transform_1(%arg0: i32) -> (i32, i32) {
    %c0_i32 = arith.constant 0 : i32
    %c0_i32_0 = arith.constant 0 : i32
    return %arg0, %c0_i32 : i32, i32
  }
  func.func @transform_2(%arg0: i32) -> (i32, i32) {
    %c0_i32 = arith.constant 0 : i32
    %c0_i32_0 = arith.constant 0 : i32
    %c0_i32_1 = arith.constant 0 : i32
    return %c0_i32, %c0_i32_0 : i32, i32
  }
  func.func @transform_3(%arg0: i32) -> (i32, i32) {
    %c0_i32 = arith.constant 0 : i32
    %c0_i32_0 = arith.constant 0 : i32
    %c0_i32_1 = arith.constant 0 : i32
    return %c0_i32, %c0_i32_0 : i32, i32
  }
  func.func @transform_4(%arg0: i32) -> (i32, i32) {
    %c0_i32 = arith.constant 0 : i32
    %c0_i32_0 = arith.constant 0 : i32
    %c0_i32_1 = arith.constant 0 : i32
    return %c0_i32, %c0_i32_0 : i32, i32
  }
  func.func @transform_5(%arg0: i32) -> (i32, i32) {
    %c0_i32 = arith.constant 0 : i32
    %c0_i32_0 = arith.constant 0 : i32
    %c0_i32_1 = arith.constant 0 : i32
    return %c0_i32, %c0_i32_0 : i32, i32
  }
  func.func @transform_6(%arg0: i32) -> (i32, i32) {
    %c0_i32 = arith.constant 0 : i32
    %c0_i32_0 = arith.constant 0 : i32
    return %arg0, %c0_i32 : i32, i32
  }
}

module attributes {stable_mosaic.version = 11 : i64} {
  func.func @_ffn_add_ln_kernel(%arg0: i32, %arg1: i32, %arg2: memref<8x256xf32, #tpu.memory_space<vmem>>, %arg3: memref<256x256xf32, #tpu.memory_space<vmem>>, %arg4: memref<1x256xf32, #tpu.memory_space<vmem>>, %arg5: memref<256x256xf32, #tpu.memory_space<vmem>>, %arg6: memref<1x256xf32, #tpu.memory_space<vmem>>, %arg7: memref<1x256xf32, #tpu.memory_space<vmem>>, %arg8: memref<1x256xf32, #tpu.memory_space<vmem>>, %arg9: memref<8x256xf32, #tpu.memory_space<vmem>>, %arg10: memref<8x256xf32, #tpu.memory_space<vmem>>) attributes {dimension_semantics = [#tpu.dimension_semantics<parallel>, #tpu.dimension_semantics<arbitrary>], iteration_bounds = array<i64: 2, 4>, scalar_prefetch = 0 : i64, scratch_operands = 1 : i64, tpu.core_type = #tpu.core_type<tc>, window_params = [{transform_indices = @transform_0, window_bounds = array<i64: 8, 256>}, {transform_indices = @transform_1, window_bounds = array<i64: 256, 256>}, {transform_indices = @transform_2, window_bounds = array<i64: 1, 256>}, {transform_indices = @transform_3, window_bounds = array<i64: 256, 256>}, {pipeline_mode = #tpu.pipeline_mode<synchronous>, transform_indices = @transform_4, window_bounds = array<i64: 1, 256>}, {pipeline_mode = #tpu.pipeline_mode<synchronous>, transform_indices = @transform_5, window_bounds = array<i64: 1, 256>}, {pipeline_mode = #tpu.pipeline_mode<synchronous>, transform_indices = @transform_6, window_bounds = array<i64: 1, 256>}, {transform_indices = @transform_7, window_bounds = array<i64: 8, 256>}]} {
    %c0_i32 = arith.constant 0 : i32
    %0 = arith.cmpi eq, %arg1, %c0_i32 : i32
    %1 = arith.extui %0 : i1 to i32
    %c0_i32_0 = arith.constant 0 : i32
    %2 = arith.cmpi ne, %1, %c0_i32_0 : i32
    scf.if %2 {
      %cst_15 = arith.constant 0.000000e+00 : f32
      %19 = vector.broadcast %cst_15 : f32 to vector<8x256xf32>
      %c0_16 = arith.constant 0 : index
      %c0_17 = arith.constant 0 : index
      %20 = vector.load %arg10[%c0_16, %c0_17] : memref<8x256xf32, #tpu.memory_space<vmem>>, vector<8x256xf32>
      tpu.vector_store %arg10[%c0_16, %c0_17], %19 {strides = array<i32>} : memref<8x256xf32, #tpu.memory_space<vmem>>, vector<8x256xf32>,
    } else {
    }
    %c0 = arith.constant 0 : index
    %c0_1 = arith.constant 0 : index
    %3 = vector.load %arg2[%c0, %c0_1] : memref<8x256xf32, #tpu.memory_space<vmem>>, vector<8x256xf32>
    %c0_2 = arith.constant 0 : index
    %c0_3 = arith.constant 0 : index
    %4 = vector.load %arg3[%c0_2, %c0_3] : memref<256x256xf32, #tpu.memory_space<vmem>>, vector<256x256xf32>
    %cst = arith.constant dense<0.000000e+00> : vector<8x256xf32>
    %5 = tpu.matmul %3, %4, %cst {dimension_numbers = #tpu.dot_dimension_numbers<[1], [0], [0], [1], [0, 0, 1, 1], [], []>} : vector<8x256xf32>, vector<256x256xf32>, vector<8x256xf32> -> vector<8x256xf32>
    %c0_4 = arith.constant 0 : index
    %c0_5 = arith.constant 0 : index
    %6 = vector.load %arg4[%c0_4, %c0_5] : memref<1x256xf32, #tpu.memory_space<vmem>>, vector<1x256xf32>
    %7 = vector.broadcast %6 : vector<1x256xf32> to vector<8x256xf32>
    %8 = arith.addf %5, %7 : vector<8x256xf32>
    %cst_6 = arith.constant 0.000000e+00 : f32
    %9 = vector.broadcast %cst_6 : f32 to vector<8x256xf32>
    %10 = arith.maximumf %8, %9 : vector<8x256xf32>
    %c0_7 = arith.constant 0 : index
    %c0_8 = arith.constant 0 : index
    %11 = vector.load %arg10[%c0_7, %c0_8] : memref<8x256xf32, #tpu.memory_space<vmem>>, vector<8x256xf32>
    %c0_9 = arith.constant 0 : index
    %c0_10 = arith.constant 0 : index
    %12 = vector.load %arg5[%c0_9, %c0_10] : memref<256x256xf32, #tpu.memory_space<vmem>>, vector<256x256xf32>
    %cst_11 = arith.constant dense<0.000000e+00> : vector<8x256xf32>
    %13 = tpu.matmul %10, %12, %cst_11 {dimension_numbers = #tpu.dot_dimension_numbers<[1], [0], [0], [1], [0, 0, 1, 1], [], []>} : vector<8x256xf32>, vector<256x256xf32>, vector<8x256xf32> -> vector<8x256xf32>
    %14 = arith.addf %11, %13 : vector<8x256xf32>
    %c0_12 = arith.constant 0 : index
    %c0_13 = arith.constant 0 : index
    %15 = vector.load %arg10[%c0_12, %c0_13] : memref<8x256xf32, #tpu.memory_space<vmem>>, vector<8x256xf32>
    tpu.vector_store %arg10[%c0_12, %c0_13], %14 {strides = array<i32>} : memref<8x256xf32, #tpu.memory_space<vmem>>, vector<8x256xf32>,
    %c3_i32 = arith.constant 3 : i32
    %16 = arith.cmpi eq, %arg1, %c3_i32 : i32
    %17 = arith.extui %16 : i1 to i32
    %c0_i32_14 = arith.constant 0 : i32
    %18 = arith.cmpi ne, %17, %c0_i32_14 : i32
    scf.if %18 {
      %c0_15 = arith.constant 0 : index
      %c0_16 = arith.constant 0 : index
      %19 = vector.load %arg10[%c0_15, %c0_16] : memref<8x256xf32, #tpu.memory_space<vmem>>, vector<8x256xf32>
      %20 = arith.addf %3, %19 : vector<8x256xf32>
      %c0_17 = arith.constant 0 : index
      %c0_18 = arith.constant 0 : index
      %21 = vector.load %arg6[%c0_17, %c0_18] : memref<1x256xf32, #tpu.memory_space<vmem>>, vector<1x256xf32>
      %22 = vector.broadcast %21 : vector<1x256xf32> to vector<8x256xf32>
      %23 = arith.addf %20, %22 : vector<8x256xf32>
      %cst_19 = arith.constant dense<0.000000e+00> : vector<8xf32>
      %24 = vector.multi_reduction <add>, %23, %cst_19 [1] : vector<8x256xf32> to vector<8xf32>
      %25 = vector.shape_cast %24 : vector<8xf32> to vector<8x1xf32>
      %cst_20 = arith.constant 2.560000e+02 : f32
      %26 = vector.broadcast %cst_20 : f32 to vector<8x1xf32>
      %27 = arith.divf %25, %26 : vector<8x1xf32>
      %28 = vector.broadcast %27 : vector<8x1xf32> to vector<8x256xf32>
      %29 = arith.subf %23, %28 : vector<8x256xf32>
      %30 = arith.mulf %29, %29 : vector<8x256xf32>
      %cst_21 = arith.constant dense<0.000000e+00> : vector<8xf32>
      %31 = vector.multi_reduction <add>, %30, %cst_21 [1] : vector<8x256xf32> to vector<8xf32>
      %32 = vector.shape_cast %31 : vector<8xf32> to vector<8x1xf32>
      %cst_22 = arith.constant 2.560000e+02 : f32
      %33 = vector.broadcast %cst_22 : f32 to vector<8x1xf32>
      %34 = arith.divf %32, %33 : vector<8x1xf32>
      %35 = vector.broadcast %27 : vector<8x1xf32> to vector<8x256xf32>
      %36 = arith.subf %23, %35 : vector<8x256xf32>
      %cst_23 = arith.constant 9.99999974E-6 : f32
      %37 = vector.broadcast %cst_23 : f32 to vector<8x1xf32>
      %38 = arith.addf %34, %37 : vector<8x1xf32>
      %39 = math.rsqrt %38 : vector<8x1xf32>
      %40 = vector.broadcast %39 : vector<8x1xf32> to vector<8x256xf32>
      %41 = arith.mulf %36, %40 : vector<8x256xf32>
      %c0_24 = arith.constant 0 : index
      %c0_25 = arith.constant 0 : index
      %42 = vector.load %arg7[%c0_24, %c0_25] : memref<1x256xf32, #tpu.memory_space<vmem>>, vector<1x256xf32>
      %43 = vector.broadcast %42 : vector<1x256xf32> to vector<8x256xf32>
      %44 = arith.mulf %41, %43 : vector<8x256xf32>
      %c0_26 = arith.constant 0 : index
      %c0_27 = arith.constant 0 : index
      %45 = vector.load %arg8[%c0_26, %c0_27] : memref<1x256xf32, #tpu.memory_space<vmem>>, vector<1x256xf32>
      %46 = vector.broadcast %45 : vector<1x256xf32> to vector<8x256xf32>
      %47 = arith.addf %44, %46 : vector<8x256xf32>
      %c0_28 = arith.constant 0 : index
      %c0_29 = arith.constant 0 : index
      %48 = vector.load %arg9[%c0_28, %c0_29] : memref<8x256xf32, #tpu.memory_space<vmem>>, vector<8x256xf32>
      tpu.vector_store %arg9[%c0_28, %c0_29], %47 {strides = array<i32>} : memref<8x256xf32, #tpu.memory_space<vmem>>, vector<8x256xf32>,
    } else {
    }
    return
  }
  func.func @transform_0(%arg0: i32, %arg1: i32) -> (i32, i32) {
    %c0_i32 = arith.constant 0 : i32
    %c0_i32_0 = arith.constant 0 : i32
    return %arg0, %c0_i32 : i32, i32
  }
  func.func @transform_1(%arg0: i32, %arg1: i32) -> (i32, i32) {
    %c0_i32 = arith.constant 0 : i32
    %c0_i32_0 = arith.constant 0 : i32
    return %c0_i32, %arg1 : i32, i32
  }
  func.func @transform_2(%arg0: i32, %arg1: i32) -> (i32, i32) {
    %c0_i32 = arith.constant 0 : i32
    %c0_i32_0 = arith.constant 0 : i32
    return %c0_i32, %arg1 : i32, i32
  }
  func.func @transform_3(%arg0: i32, %arg1: i32) -> (i32, i32) {
    %c0_i32 = arith.constant 0 : i32
    %c0_i32_0 = arith.constant 0 : i32
    return %arg1, %c0_i32 : i32, i32
  }
  func.func @transform_4(%arg0: i32, %arg1: i32) -> (i32, i32) {
    %c0_i32 = arith.constant 0 : i32
    %c0_i32_0 = arith.constant 0 : i32
    %c0_i32_1 = arith.constant 0 : i32
    return %c0_i32, %c0_i32_0 : i32, i32
  }
  func.func @transform_5(%arg0: i32, %arg1: i32) -> (i32, i32) {
    %c0_i32 = arith.constant 0 : i32
    %c0_i32_0 = arith.constant 0 : i32
    %c0_i32_1 = arith.constant 0 : i32
    return %c0_i32, %c0_i32_0 : i32, i32
  }
  func.func @transform_6(%arg0: i32, %arg1: i32) -> (i32, i32) {
    %c0_i32 = arith.constant 0 : i32
    %c0_i32_0 = arith.constant 0 : i32
    %c0_i32_1 = arith.constant 0 : i32
    return %c0_i32, %c0_i32_0 : i32, i32
  }
  func.func @transform_7(%arg0: i32, %arg1: i32) -> (i32, i32) {
    %c0_i32 = arith.constant 0 : i32
    %c0_i32_0 = arith.constant 0 : i32
    return %arg0, %c0_i32 : i32, i32
  }
}

</mosaic_0001>

<bundles_post_ra>
// kernel: _lambda_.10
= control target key start
LH: loop header
LB: loop body
LE: loop exit
PB: predicated region body
PF: predicated region fallthrough
CT: control target
= control target key end

     0   :  { %11 = vsyncpa [#allocation3], 0  ;;  %s949_s0 = inlined_call_operand.vmem [shape: f32[16,256], index: 0, kind: input, shape index: {}]   ;;  %s950_s1 = inlined_call_operand.hbm [shape: f32[16,256], index: 1, kind: input, shape index: {}]   ;;  %s951_s2 = inlined_call_operand.hbm [shape: f32[256,256], index: 2, kind: input, shape index: {}]   ;;  %s952_s3 = inlined_call_operand.vmem [shape: f32[1,256], index: 3, kind: input, shape index: {}]   ;;  %s953_s4 = inlined_call_operand.vmem [shape: f32[1,256], index: 4, kind: input, shape index: {}]   ;;  %s954_s5 = inlined_call_operand.vmem [shape: f32[1,256], index: 5, kind: input, shape index: {}]   ;;  %s955_s6 = inlined_call_operand.vmem [shape: f32[16,256], index: 6, kind: output, shape index: {}]  }
   0x1   :  { %13 = vsyncpa [#allocation3 + $0x1], 0 }
   0x2   :  { %14 = vsyncpa [#allocation5], 0  ;;  %s802_s21 = smov 0   ;;  %s804_s22 = smov 0  }
   0x3   :  { %s806_s23 = smov 0   ;;  %s808_s24 = smov 0  }
   0x4 LB: > { %s821_s25 = sadd.s32 4294967295, %s761_s24   ;;  %p66_p0 = scmp.ne.s32.totalorder %s753_s22, %s749_s21  ;;  %s761_s24 = sphi %s808_s24, %s970_s24   ;;  %s757_s23 = sphi %s806_s23, %s969_s23   ;;  %s753_s22 = sphi %s804_s22, %s968_s22   ;;  %s749_s21 = sphi %s802_s21, %s967_s21  }
   0x5   : > { %p956_p1 = scmp.eq.s32.totalorder %s821_s25, 0  ;;  %p597_p2 = scmp.ge.s32.totalorder %s761_s24, 1 }
   0x6   : > { %p187_p3 = scmp.lt.s32.totalorder %s761_s24, 3  ;;  %s763_s28 = smov [#allocation4]  }
   0x7   : > { %p829_p4 = por %p956_p1, %p66_p0  ;;  %s199_s29 = sshll.u32 %s763_s28, 4  ;;  %s200_s29 = int_to_ptr.vmem [resolvable:$true] %s199_s29 }
   0x8   : > { %p833_p5 = pnand %p597_p2, %p187_p3  ;;  %s846_s7 = sadd.s32 1, %s761_s24  }
   0x9   : > { %s959_s26 = scalar_select %p829_p4, 1, 0 }
   0xa   : > { %s960_s27 = scalar_select %p833_p5, 1, 0 }
   0xb   : > { %p621_p6 = pneg %p833_p5  ;;  %s53_s8 = sadd.s32 1, %s757_s23 }
   0xc   : > { %s50_s9 = ssub.s32 %s761_s24, %s846_s7  ;;  %s680_s10 = scalar_lea.vmem %s200_s29, 8192 }
   0xd   : > { %p841_p7 = pnand %p621_p6, %p956_p1  ;;  %p681_p9 = scmp.ne.s32.totalorder %s200_s29, %s680_s10 }
   0xe   : > { %p688_p12 = scmp.lt.s32.totalorder %s200_s29, %s200_s29  ;;  %p689_p13 = scmp.lt.s32.totalorder %s680_s10, %s680_s10 }
   0xf   : > { %p671_p8 = pneg %p841_p7 }
  0x10   : > { %p690_p0 = por %p689_p13, %p688_p12 }
  0x11   : > { %p683_p10 = pnand %p681_p9, %p671_p8 }
  0x13   : > { %p684_p11 = pneg %p683_p10 }
  0x15   : > { %p691_p2 = pnand %p690_p0, %p684_p11 }
  0x17   : > { %694 = shalt.err (!%p691_p2)
}
  0x18   : > { %s764_s11 = smov 256   ;;  %s765_s12 = smov 16  }
  0x19   : > { %624 = dma.hbm_to_vmem [thread:$0]  (!%p841_p7), %s951_s2, 8192, %s200_s29, [#allocation5], %s764_s11, %s764_s11, %s765_s12  }
  0x1a   : > { %p51_p3 = scmp.eq.s32.totalorder %s50_s9, 0  ;;  %p60_p6 = scmp.ne.s32.totalorder %s757_s23, %s753_s22 }
  0x1b   : > { %p61_p8 = scmp.eq.s32.totalorder %s761_s24, 0  ;;  %p630_p9 = scmp.lt.s32.totalorder %s761_s24, 2 }
  0x1c   : > { %s863_s15 = scalar_select %p51_p3, %s757_s23, %s53_s8  }
  0x1d   : > { %p62_p10 = por %p61_p8, %p60_p6  ;;  %s230_s16 = sand.u32 1, %s757_s23  }
  0x1e   : > { %s600_s17 = sshll.u32 %s230_s16, 4  ;;  %s612_s18 = sshll.u32 %s761_s24, 8 }
  0x1f   : > { %s870_s21 = scalar_lea.hbm %s950_s1, %s612_s18  ;;  %s234_s28 = scalar_lea.vmem [#allocation2], %s600_s17 }
  0x20   : > { %s242_s29 = sshll.u32 %s234_s28, 4  ;;  %p872_p7 = pnand %p630_p9, %p62_p10  ;;  %s243_s29 = int_to_ptr.vmem [resolvable:$true] %s242_s29 }
  0x21   : > { %s231_s8 = scalar_lea.sflag [#allocation3], %s230_s16  ;;  %s695_s9 = scalar_lea.hbm %s870_s21, 256 }
  0x22   : > { %p696_p11 = scmp.ne.s32.totalorder %s870_s21, %s695_s9  ;;  %p697_p12 = pneg %p872_p7 }
  0x23   : > { %s700_s11 = scalar_lea.hbm %s950_s1, 512  ;;  %p701_p2 = scmp.lt.s32.totalorder %s870_s21, %s950_s1 }
  0x24   : > { %p698_p13 = pnand %p697_p12, %p696_p11  ;;  %p702_p3 = scmp.lt.s32.totalorder %s700_s11, %s695_s9 }
  0x26   : > { %p699_p0 = pneg %p698_p13  ;;  %p703_p6 = por %p702_p3, %p701_p2 }
  0x28   : > { %p704_p8 = pnand %p703_p6, %p699_p0 }
  0x2a   : > { %707 = shalt.err (!%p704_p8)
}
  0x2b   : > { %s708_s14 = scalar_lea.vmem %s243_s29, 256  ;;  %s766_s16 = smov [#allocation2]  }
  0x2c   : > { %p709_p9 = scmp.ne.s32.totalorder %s243_s29, %s708_s14  ;;  %s713_s17 = sshll.u32 %s766_s16, 4  ;;  %s714_s17 = int_to_ptr.vmem [resolvable:$false] %s713_s17 }
  0x2d   : > { %s715_s18 = scalar_lea.vmem %s714_s17, 512  ;;  %p716_p11 = scmp.lt.s32.totalorder %s243_s29, %s714_s17 }
  0x2e   : > { %p711_p10 = pnand %p709_p9, %p697_p12  ;;  %p717_p13 = scmp.lt.s32.totalorder %s715_s18, %s708_s14 }
  0x30   : > { %p712_p1 = pneg %p711_p10  ;;  %p718_p4 = por %p717_p13, %p716_p11 }
  0x32   : > { %p719_p5 = pnand %p718_p4, %p712_p1 }
  0x34   : > { %722 = shalt.err (!%p719_p5)
}
  0x35   : > { %628 = dma.hbm_to_vmem [thread:$0]  (!%p872_p7), %s870_s21, 256, %s243_s29, %s231_s8  }
  0x36   : > { %p963_p0 = scmp.ne.s32.totalorder %s960_s27, 0 }
  0x37   : > { %s253_s19 = sand.u32 (!%p963_p0), 1, %s753_s22   ;;  %p964_p12 = scmp.ne.s32.totalorder (!%p963_p0), %s959_s26, 0 }
  0x38   : > { %251 = sbr.rel (%p963_p0) target bundleno = 640 (0x280), region = 44  ;;  %s893_s20 = sshll.u32 (!%p963_p0), %s253_s19, 4 }
  0x39   : > { %s254_s28 = scalar_lea.sflag (!%p963_p0), [#allocation3], %s253_s19  ;;  %s257_s9 = scalar_lea.vmem (!%p963_p0), [#allocation2], %s893_s20 }
  0x3d   : > { %740 = dma.done.wait (%p964_p12), %s254_s28, 256  }
  0x3e   : > { %742 = vsyncadd (%p964_p12), %s254_s28, 4294967040  ;;  %p965_p1 = scmp.eq.s32.totalorder %s821_s25, 0 }
  0x40   : > { %744 = dma.done.wait (%p965_p1), [#allocation5], 8192   ;;  %p966_p4 = pmov %p965_p1 }
  0x41   : > { %v338_v0 = vld [vmem:[#allocation4 + $0xf8] sm:$0xff]  ;;  %v337_v1 = vld [vmem:[#allocation4 + $0xf0] sm:$0xff]  ;;  %v336_v2 = vld [vmem:[#allocation4 + $0xe8] sm:$0xff]  ;;  %p295_p5 = scmp.lt.s32.totalorder %s821_s25, 1 }
  0x42   : > { %746 = vsyncadd (%p966_p4), [#allocation5], 4294959104  ;;  %371 = vmatprep.subr.mxu0 %v338_v0  ;;  %v335_v3 = vld [vmem:[#allocation4 + $0xe0] sm:$0xff]  ;;  %v334_v4 = vld [vmem:[#allocation4 + $0xd8] sm:$0xff] }
  0x43   : > { %372 = vmatpush1.msra.mxu0 %v337_v1  ;;  %v333_v5 = vld [vmem:[#allocation4 + $0xd0] sm:$0xff]  ;;  %v332_v6 = vld [vmem:[#allocation4 + $0xc8] sm:$0xff]  ;;  %v331_v7 = vld [vmem:[#allocation4 + $0xc0] sm:$0xff]  ;;  %s972_s25 = smov (!%p295_p5, %s821_s25), 1 }
  0x44   : > { %373 = vmatprep.subr.mxu0 %v336_v2  ;;  %v330_v8 = vld [vmem:[#allocation4 + $0xb8] sm:$0xff]  ;;  %v329_v9 = vld [vmem:[#allocation4 + $0xb0] sm:$0xff]  ;;  %v328_v10 = vld [vmem:[#allocation4 + $0xa8] sm:$0xff]  ;;  %s613_s26 = sshll.u32 %s972_s25, 4  ;;  %v448_v2 = vlaneseq }
  0x45   : > { %374 = vmatpush1.msra.mxu0 %v335_v3  ;;  %v327_v11 = vld [vmem:[#allocation4 + $0xa0] sm:$0xff]  ;;  %v326_v12 = vld [vmem:[#allocation4 + $0x98] sm:$0xff]  ;;  %v325_v13 = vld [vmem:[#allocation4 + $0x90] sm:$0xff]  ;;  %s914_s29 = scalar_lea.vmem %s949_s0, %s613_s26  ;;  %s304_s16 = scalar_lea.vmem %s955_s6, %s613_s26 }
  0x46   : > { %375 = vmatprep.subr.mxu0 %v334_v4  ;;  %v324_v14 = vld [vmem:[#allocation4 + $0x88] sm:$0xff]  ;;  %v323_v15 = vld [vmem:[#allocation4 + $0x80] sm:$0xff]  ;;  %v322_v16 = vld [vmem:[#allocation4 + $0x78] sm:$0xff]  ;;  %v449_v3 = vshrl.u32 %v448_v2, 7 }
  0x47   : > { %376 = vmatpush1.msra.mxu0 %v333_v5  ;;  %v321_v17 = vld [vmem:[#allocation4 + $0x70] sm:$0xff]  ;;  %v320_v18 = vld [vmem:[#allocation4 + $0x68] sm:$0xff]  ;;  %v319_v19 = vld [vmem:[#allocation4 + $0x60] sm:$0xff] }
  0x48   : > { %377 = vmatprep.subr.mxu0 %v332_v6  ;;  %v318_v20 = vld [vmem:[#allocation4 + $0x58] sm:$0xff]  ;;  %v317_v21 = vld [vmem:[#allocation4 + $0x50] sm:$0xff]  ;;  %v316_v22 = vld [vmem:[#allocation4 + $0x48] sm:$0xff]  ;;  %v450_v4 = vsub.s32 0, %v449_v3  ;;  %v454_v5 = vsub.s32 1, %v449_v3 }
  0x49   : > { %378 = vmatpush1.msra.mxu0 %v331_v7  ;;  %v315_v23 = vld [vmem:[#allocation4 + $0x40] sm:$0xff]  ;;  %v306_v24 = vld [vmem:[%s914_s29 + $0x8] sm:$0xff]  ;;  %v314_v25 = vld [vmem:[#allocation4 + $0x38] sm:$0xff] }
  0x4a   : > { %379 = vmatprep.subr.mxu0 %v330_v8  ;;  %435 = vmatprep.mubr.f32.mxu0 %v306_v24  ;;  %v313_v26 = vld [vmem:[#allocation4 + $0x30] sm:$0xff]  ;;  %v312_v27 = vld [vmem:[#allocation4 + $0x28] sm:$0xff]  ;;  %v311_v28 = vld [vmem:[#allocation4 + $0x20] sm:$0xff] }
  0x4b   : > { %380 = vmatpush1.msra.mxu0 %v329_v9  ;;  %v310_v29 = vld [vmem:[#allocation4 + $0x18] sm:$0xff]  ;;  %v309_v30 = vld [vmem:[#allocation4 + $0x10] sm:$0xff]  ;;  %v308_v31 = vld [vmem:[#allocation4 + $0x8] sm:$0xff] }
  0x4c   : > { %381 = vmatprep.subr.mxu0 %v328_v10  ;;  %v307_v32 = vld [vmem:[#allocation4] sm:$0xff]  ;;  %v370_v33 = vld [vmem:[#allocation4 + $0x1f8] sm:$0xff]  ;;  %v369_v34 = vld [vmem:[#allocation4 + $0x1f0] sm:$0xff] }
  0x4d   : > { %382 = vmatpush1.msra.mxu0 %v327_v11  ;;  %v368_v35 = vld [vmem:[#allocation4 + $0x1e8] sm:$0xff]  ;;  %v367_v36 = vld [vmem:[#allocation4 + $0x1e0] sm:$0xff]  ;;  %v366_v37 = vld [vmem:[#allocation4 + $0x1d8] sm:$0xff] }
  0x4e   : > { %383 = vmatprep.subr.mxu0 %v326_v12  ;;  %v365_v38 = vld [vmem:[#allocation4 + $0x1d0] sm:$0xff]  ;;  %v364_v39 = vld [vmem:[#allocation4 + $0x1c8] sm:$0xff]  ;;  %v363_v40 = vld [vmem:[#allocation4 + $0x1c0] sm:$0xff] }
  0x4f   : > { %384 = vmatpush1.msra.mxu0 %v325_v13  ;;  %v362_v41 = vld [vmem:[#allocation4 + $0x1b8] sm:$0xff]  ;;  %v361_v42 = vld [vmem:[#allocation4 + $0x1b0] sm:$0xff]  ;;  %v360_v43 = vld [vmem:[#allocation4 + $0x1a8] sm:$0xff] }
  0x50   : > { %385 = vmatprep.subr.mxu0 %v324_v14  ;;  %v359_v44 = vld [vmem:[#allocation4 + $0x1a0] sm:$0xff]  ;;  %v358_v45 = vld [vmem:[#allocation4 + $0x198] sm:$0xff]  ;;  %v357_v46 = vld [vmem:[#allocation4 + $0x190] sm:$0xff] }
  0x51   : > { %386 = vmatpush1.msra.mxu0 %v323_v15  ;;  %v356_v47 = vld [vmem:[#allocation4 + $0x188] sm:$0xff]  ;;  %v355_v48 = vld [vmem:[#allocation4 + $0x180] sm:$0xff]  ;;  %v354_v49 = vld [vmem:[#allocation4 + $0x178] sm:$0xff] }
  0x52   : > { %387 = vmatprep.subr.mxu0 %v322_v16  ;;  %v353_v50 = vld [vmem:[#allocation4 + $0x170] sm:$0xff]  ;;  %v352_v51 = vld [vmem:[#allocation4 + $0x168] sm:$0xff]  ;;  %v351_v52 = vld [vmem:[#allocation4 + $0x160] sm:$0xff] }
  0x53   : > { %388 = vmatpush1.msra.mxu0 %v321_v17  ;;  %v350_v53 = vld [vmem:[#allocation4 + $0x158] sm:$0xff]  ;;  %v349_v54 = vld [vmem:[#allocation4 + $0x150] sm:$0xff]  ;;  %v348_v55 = vld [vmem:[#allocation4 + $0x148] sm:$0xff] }
  0x54   : > { %389 = vmatprep.subr.mxu0 %v320_v18  ;;  %v347_v56 = vld [vmem:[#allocation4 + $0x140] sm:$0xff]  ;;  %v346_v57 = vld [vmem:[#allocation4 + $0x138] sm:$0xff]  ;;  %v345_v58 = vld [vmem:[#allocation4 + $0x130] sm:$0xff] }
  0x55   : > { %390 = vmatpush1.msra.mxu0 %v319_v19  ;;  %v344_v59 = vld [vmem:[#allocation4 + $0x128] sm:$0xff]  ;;  %v343_v60 = vld [vmem:[#allocation4 + $0x120] sm:$0xff]  ;;  %v342_v61 = vld [vmem:[#allocation4 + $0x118] sm:$0xff] }
  0x56   : > { %391 = vmatprep.subr.mxu0 %v318_v20  ;;  %v341_v62 = vld [vmem:[#allocation4 + $0x110] sm:$0xff]  ;;  %v340_v63 = vld [vmem:[#allocation4 + $0x108] sm:$0xff]  ;;  %v339_v0 = vld [vmem:[#allocation4 + $0x100] sm:$0xff] }
  0x57   : > { %392 = vmatpush1.msra.mxu0 %v317_v21  ;;  %v305_v1 = vld [vmem:[%s914_s29] sm:$0xff]  ;;  %v443_v9 = vld [vmem:[%s257_s9 + $0x8] sm:$0xff] }
  0x58   : > { %393 = vmatprep.subr.mxu0 %v316_v22  ;;  %v442_v6 = vld [vmem:[%s257_s9] sm:$0xff] }
  0x59   : > { %394 = vmatpush1.msra.mxu0 %v315_v23  ;;  %v446_v7 = vld [vmem:[%s952_s3] sm:$0x3] }
  0x5a   : > { %395 = vmatprep.subr.mxu0 %v314_v25  ;;  %v451_v11 = vrot.slane %v446_v7, %v450_v4  ;;  %v455_v12 = vrot.slane %v446_v7, %v454_v5 }
  0x5b   : > { %396 = vmatpush1.msra.mxu0 %v313_v26 }
  0x5c   : > { %397 = vmatprep.subr.mxu0 %v312_v27 }
  0x5d   : > { %398 = vmatpush1.msra.mxu0 %v311_v28  ;;  %v477_v28 = vld [vmem:[%s953_s4] sm:$0x3] }
  0x5e   : > { %399 = vmatprep.subr.mxu0 %v310_v29  ;;  %v491_v29 = vld [vmem:[%s954_s5] sm:$0x3] }
  0x5f   : > { %400 = vmatpush1.msra.mxu0 %v309_v30  ;;  %v482_v30 = vrot.slane %v477_v28, %v450_v4 }
  0x60   : > { %401 = vmatprep.subr.mxu0 %v308_v31  ;;  %v486_v31 = vrot.slane %v477_v28, %v454_v5 }
  0x61   : > { %402 = vmatpush1.msra.mxu0 %v307_v32 }
  0x62   : > { %403 = vmatprep.subr.mxu0 %v370_v33  ;;  %v496_v33 = vrot.slane %v491_v29, %v450_v4 }
  0x63   : > { %404 = vmatpush2.msra.mxu0 %v369_v34  ;;  %v500_v34 = vrot.slane %v491_v29, %v454_v5 }
  0x64   : > { %405 = vmatprep.subr.mxu0 %v368_v35 }
  0x65   : > { %406 = vmatpush2.msra.mxu0 %v367_v36 }
  0x66   : > { %407 = vmatprep.subr.mxu0 %v366_v37 }
  0x67   : > { %408 = vmatpush2.msra.mxu0 %v365_v38 }
  0x68   : > { %409 = vmatprep.subr.mxu0 %v364_v39 }
  0x69   : > { %410 = vmatpush2.msra.mxu0 %v363_v40 }
  0x6a   : > { %411 = vmatprep.subr.mxu0 %v362_v41 }
  0x6b   : > { %412 = vmatpush2.msra.mxu0 %v361_v42 }
  0x6c   : > { %413 = vmatprep.subr.mxu0 %v360_v43 }
  0x6d   : > { %414 = vmatpush2.msra.mxu0 %v359_v44 }
  0x6e   : > { %415 = vmatprep.subr.mxu0 %v358_v45 }
  0x6f   : > { %416 = vmatpush2.msra.mxu0 %v357_v46 }
  0x70   : > { %417 = vmatprep.subr.mxu0 %v356_v47 }
  0x71   : > { %418 = vmatpush2.msra.mxu0 %v355_v48 }
  0x72   : > { %419 = vmatprep.subr.mxu0 %v354_v49 }
  0x73   : > { %420 = vmatpush2.msra.mxu0 %v353_v50 }
  0x74   : > { %421 = vmatprep.subr.mxu0 %v352_v51 }
  0x75   : > { %422 = vmatpush2.msra.mxu0 %v351_v52 }
  0x76   : > { %423 = vmatprep.subr.mxu0 %v350_v53 }
  0x77   : > { %424 = vmatpush2.msra.mxu0 %v349_v54 }
  0x78   : > { %425 = vmatprep.subr.mxu0 %v348_v55 }
  0x79   : > { %426 = vmatpush2.msra.mxu0 %v347_v56 }
  0x7a   : > { %427 = vmatprep.subr.mxu0 %v346_v57 }
  0x7b   : > { %428 = vmatpush2.msra.mxu0 %v345_v58 }
  0x7c   : > { %429 = vmatprep.subr.mxu0 %v344_v59 }
  0x7d   : > { %430 = vmatpush2.msra.mxu0 %v343_v60 }
  0x7e   : > { %431 = vmatprep.subr.mxu0 %v342_v61 }
  0x7f   : > { %432 = vmatpush2.msra.mxu0 %v341_v62 }
  0x80   : > { %433 = vmatprep.subr.mxu0 %v340_v63 }
  0x81   : > { %434 = vmatpush2.msra.mxu0 %v339_v0 }
  0x82   : > { %436 = vmatmul.mubr.f32.vlgmr.msra.gmra.mxu0 %v305_v1 }
 0x142   : > { %v437_v8 = vpop.f32.mrf.mxu0 }
 0x143   : > { %v444_v10 = vadd.f32 %v442_v6, %v437_v8 }
 0x144   : > { %v439_v13 = vpop.f32.mrf.mxu0 }
 0x145   : > { %v445_v14 = vadd.f32 %v443_v9, %v439_v13  ;;  %v458_v15 = vadd.f32 %v451_v11, %v444_v10 }
 0x147   : > { %v459_v16 = vadd.f32 %v455_v12, %v445_v14 }
 0x149   : > { %v460_v17 = vadd.f32 %v459_v16, %v458_v15 }
 0x14b   : > { %461 = vadd.xlane.f32.xlu0 %v460_v17 }
 0x1d4   : > { %v462_v18 = vpop.xlane.xlu0 %461 }
 0x1d5   : > { %v464_v19 = vmul.f32 0.00390625, %v462_v18 }
 0x1d7   : > { %v465_v20 = vsub.f32 %v458_v15, %v464_v19  ;;  %v466_v21 = vsub.f32 %v459_v16, %v464_v19 }
 0x1d9   : > { %v467_v22 = vmul.f32 %v465_v20, %v465_v20  ;;  %v468_v23 = vmul.f32 %v466_v21, %v466_v21 }
 0x1db   : > { %v469_v24 = vadd.f32 %v468_v23, %v467_v22 }
 0x1dd   : > { %470 = vadd.xlane.f32.xlu0 %v469_v24 }
 0x266   : > { %v471_v25 = vpop.xlane.xlu0 %470 }
 0x267   : > { %v472_v26 = vmul.f32 0.00390625, %v471_v25 }
 0x269   : > { %v473_v27 = vadd.f32 1e-05, %v472_v26 }
 0x26b   : > { %667 = vrsqrt.f32 %v473_v27 }
 0x278   : > { %v668_v32 = vpop.eup %667 }
 0x279   : > { %v475_v35 = vmul.f32 %v668_v32, %v465_v20  ;;  %v476_v36 = vmul.f32 %v668_v32, %v466_v21 }
 0x27b   : > { %v489_v37 = vmul.f32 %v482_v30, %v475_v35  ;;  %v490_v38 = vmul.f32 %v486_v31, %v476_v36 }
 0x27d   : > { %v503_v39 = vadd.f32 %v496_v33, %v489_v37  ;;  %v504_v40 = vadd.f32 %v500_v34, %v490_v38 }
 0x27f   : > { %505 = vst [vmem:[%s304_s16] sm:$0xff] %v503_v39  ;;  %506 = vst [vmem:[%s304_s16 + $0x8] sm:$0xff] %v504_v40 }
 0x280 PF: > { %p17_p7 = scmp.ge.s32.totalorder %s846_s7, 4   ;;  %s967_s21 = smov %s753_s22 }
 0x281   : > { %s968_s22 = smov %s757_s23  ;;  %s969_s23 = smov %s863_s15 }
 0x282   : > { %s970_s24 = smov %s846_s7  ;;  %19 = sbr.rel (!%p17_p7) target bundleno = 4 (0x4), region = 91 }
 0x287   :  { %528 = vsyncpa [#allocation3], 1 }
 0x288   :  { %530 = vsyncpa [#allocation3 + $0x1], 1 }
 0x289   :  { %531 = vsyncpa [#allocation5], 1 }

// kernel: _lambda_.11
= control target key start
LH: loop header
LB: loop body
LE: loop exit
PB: predicated region body
PF: predicated region fallthrough
CT: control target
= control target key end

     0   :  { %8 = vsyncpa [#allocation3], 0  ;;  %s501_s12 = smov 0   ;;  %s554_s0 = inlined_call_operand.vmem [shape: f32[16,256], index: 0, kind: input, shape index: {}]   ;;  %s555_s1 = inlined_call_operand.hbm [shape: f32[256,256], index: 1, kind: input, shape index: {}]   ;;  %s556_s2 = inlined_call_operand.vmem [shape: f32[1,256], index: 2, kind: input, shape index: {}]   ;;  %s557_s3 = inlined_call_operand.vmem [shape: f32[16,256], index: 3, kind: output, shape index: {}]  }
   0x1 LB: > { %s507_s13 = sadd.s32 4294967295, %s476_s12   ;;  %p406_p0 = scmp.ge.s32.totalorder %s476_s12, 1  ;;  %s476_s12 = sphi %s501_s12, %s14_s12  }
   0x2   : > { %p113_p1 = scmp.lt.s32.totalorder %s476_s12, 3  ;;  %s478_s14 = smov [#allocation2]  }
   0x3   : > { %s125_s15 = sshll.u32 %s478_s14, 4  ;;  %p427_p3 = scmp.eq.s32.totalorder %s507_s13, 0  ;;  %s126_s15 = int_to_ptr.vmem [resolvable:$true] %s125_s15 }
   0x4   : > { %p511_p2 = pnand %p406_p0, %p113_p1  ;;  %s451_s17 = scalar_lea.vmem %s126_s15, 8192 }
   0x5   : > { %p452_p7 = scmp.ne.s32.totalorder %s126_s15, %s451_s17  ;;  %p459_p10 = scmp.lt.s32.totalorder %s126_s15, %s126_s15 }
   0x6   : > { %p423_p4 = pneg %p511_p2  ;;  %p460_p11 = scmp.lt.s32.totalorder %s451_s17, %s451_s17 }
   0x8   : > { %p424_p5 = pnand %p427_p3, %p423_p4  ;;  %p461_p12 = por %p460_p11, %p459_p10 }
   0xa   : > { %p442_p6 = pneg %p424_p5 }
   0xc   : > { %p454_p8 = pnand %p452_p7, %p442_p6 }
   0xe   : > { %p455_p9 = pneg %p454_p8 }
  0x10   : > { %p462_p13 = pnand %p461_p12, %p455_p9 }
  0x12   : > { %465 = shalt.err (!%p462_p13)
}
  0x13   : > { %s479_s18 = smov 256   ;;  %s480_s19 = smov 16  }
  0x14   : > { %426 = dma.hbm_to_vmem [thread:$0]  (!%p424_p5), %s555_s1, 8192, %s126_s15, [#allocation3], %s479_s18, %s479_s18, %s480_s19  }
  0x15   : > { %152 = sbr.rel (%p511_p2) target bundleno = 290 (0x122), region = 32 }
  0x1a   : > { %471 = dma.done.wait (%p427_p3), [#allocation3], 8192  }
  0x1b   : > { %473 = vsyncadd (%p427_p3), [#allocation3], 4294959104  ;;  %v219_v0 = vld [vmem:[#allocation2 + $0xf8] sm:$0xff]  ;;  %v218_v1 = vld [vmem:[#allocation2 + $0xf0] sm:$0xff]  ;;  %p176_p0 = scmp.lt.s32.totalorder %s507_s13, 1 }
  0x1c   : > { %v217_v2 = vld [vmem:[#allocation2 + $0xe8] sm:$0xff]  ;;  %264 = vmatprep.subr.mxu0 %v219_v0  ;;  %v216_v3 = vld [vmem:[#allocation2 + $0xe0] sm:$0xff]  ;;  %v215_v4 = vld [vmem:[#allocation2 + $0xd8] sm:$0xff] }
  0x1d   : > { %265 = vmatpush1.msra.mxu0 %v218_v1  ;;  %v214_v5 = vld [vmem:[#allocation2 + $0xd0] sm:$0xff]  ;;  %v213_v6 = vld [vmem:[#allocation2 + $0xc8] sm:$0xff]  ;;  %v212_v7 = vld [vmem:[#allocation2 + $0xc0] sm:$0xff]  ;;  %s560_s13 = smov (!%p176_p0, %s507_s13), 1 }
  0x1e   : > { %266 = vmatprep.subr.mxu0 %v217_v2  ;;  %v211_v8 = vld [vmem:[#allocation2 + $0xb8] sm:$0xff]  ;;  %v210_v9 = vld [vmem:[#allocation2 + $0xb0] sm:$0xff]  ;;  %v209_v10 = vld [vmem:[#allocation2 + $0xa8] sm:$0xff]  ;;  %s417_s22 = sshll.u32 %s560_s13, 4  ;;  %v254_v2 = vlaneseq }
  0x1f   : > { %267 = vmatpush1.msra.mxu0 %v216_v3  ;;  %v208_v11 = vld [vmem:[#allocation2 + $0xa0] sm:$0xff]  ;;  %v207_v12 = vld [vmem:[#allocation2 + $0x98] sm:$0xff]  ;;  %v206_v13 = vld [vmem:[#allocation2 + $0x90] sm:$0xff]  ;;  %s539_s25 = scalar_lea.vmem %s554_s0, %s417_s22  ;;  %s185_s30 = scalar_lea.vmem %s557_s3, %s417_s22 }
  0x20   : > { %268 = vmatprep.subr.mxu0 %v215_v4  ;;  %v205_v14 = vld [vmem:[#allocation2 + $0x88] sm:$0xff]  ;;  %v204_v15 = vld [vmem:[#allocation2 + $0x80] sm:$0xff]  ;;  %v203_v16 = vld [vmem:[#allocation2 + $0x78] sm:$0xff]  ;;  %v255_v3 = vshrl.u32 %v254_v2, 7 }
  0x21   : > { %269 = vmatpush1.msra.mxu0 %v214_v5  ;;  %v202_v17 = vld [vmem:[#allocation2 + $0x70] sm:$0xff]  ;;  %v201_v18 = vld [vmem:[#allocation2 + $0x68] sm:$0xff]  ;;  %v200_v19 = vld [vmem:[#allocation2 + $0x60] sm:$0xff] }
  0x22   : > { %270 = vmatprep.subr.mxu0 %v213_v6  ;;  %v199_v20 = vld [vmem:[#allocation2 + $0x58] sm:$0xff]  ;;  %v198_v21 = vld [vmem:[#allocation2 + $0x50] sm:$0xff]  ;;  %v197_v22 = vld [vmem:[#allocation2 + $0x48] sm:$0xff]  ;;  %v256_v4 = vsub.s32 0, %v255_v3  ;;  %v260_v6 = vsub.s32 1, %v255_v3 }
  0x23   : > { %271 = vmatpush1.msra.mxu0 %v212_v7  ;;  %v196_v23 = vld [vmem:[#allocation2 + $0x40] sm:$0xff]  ;;  %v187_v24 = vld [vmem:[%s539_s25 + $0x8] sm:$0xff]  ;;  %v195_v25 = vld [vmem:[#allocation2 + $0x38] sm:$0xff] }
  0x24   : > { %272 = vmatprep.subr.mxu0 %v211_v8  ;;  %328 = vmatprep.mubr.f32.mxu0 %v187_v24  ;;  %v194_v26 = vld [vmem:[#allocation2 + $0x30] sm:$0xff]  ;;  %v193_v27 = vld [vmem:[#allocation2 + $0x28] sm:$0xff]  ;;  %v192_v28 = vld [vmem:[#allocation2 + $0x20] sm:$0xff] }
  0x25   : > { %273 = vmatpush1.msra.mxu0 %v210_v9  ;;  %v191_v29 = vld [vmem:[#allocation2 + $0x18] sm:$0xff]  ;;  %v190_v30 = vld [vmem:[#allocation2 + $0x10] sm:$0xff]  ;;  %v189_v31 = vld [vmem:[#allocation2 + $0x8] sm:$0xff] }
  0x26   : > { %274 = vmatprep.subr.mxu0 %v209_v10  ;;  %v188_v32 = vld [vmem:[#allocation2] sm:$0xff]  ;;  %v251_v33 = vld [vmem:[#allocation2 + $0x1f8] sm:$0xff]  ;;  %v250_v34 = vld [vmem:[#allocation2 + $0x1f0] sm:$0xff] }
  0x27   : > { %275 = vmatpush1.msra.mxu0 %v208_v11  ;;  %v249_v35 = vld [vmem:[#allocation2 + $0x1e8] sm:$0xff]  ;;  %v248_v36 = vld [vmem:[#allocation2 + $0x1e0] sm:$0xff]  ;;  %v247_v37 = vld [vmem:[#allocation2 + $0x1d8] sm:$0xff] }
  0x28   : > { %276 = vmatprep.subr.mxu0 %v207_v12  ;;  %v246_v38 = vld [vmem:[#allocation2 + $0x1d0] sm:$0xff]  ;;  %v245_v39 = vld [vmem:[#allocation2 + $0x1c8] sm:$0xff]  ;;  %v244_v40 = vld [vmem:[#allocation2 + $0x1c0] sm:$0xff] }
  0x29   : > { %277 = vmatpush1.msra.mxu0 %v206_v13  ;;  %v243_v41 = vld [vmem:[#allocation2 + $0x1b8] sm:$0xff]  ;;  %v242_v42 = vld [vmem:[#allocation2 + $0x1b0] sm:$0xff]  ;;  %v241_v43 = vld [vmem:[#allocation2 + $0x1a8] sm:$0xff] }
  0x2a   : > { %278 = vmatprep.subr.mxu0 %v205_v14  ;;  %v240_v44 = vld [vmem:[#allocation2 + $0x1a0] sm:$0xff]  ;;  %v239_v45 = vld [vmem:[#allocation2 + $0x198] sm:$0xff]  ;;  %v238_v46 = vld [vmem:[#allocation2 + $0x190] sm:$0xff] }
  0x2b   : > { %279 = vmatpush1.msra.mxu0 %v204_v15  ;;  %v237_v47 = vld [vmem:[#allocation2 + $0x188] sm:$0xff]  ;;  %v236_v48 = vld [vmem:[#allocation2 + $0x180] sm:$0xff]  ;;  %v235_v49 = vld [vmem:[#allocation2 + $0x178] sm:$0xff] }
  0x2c   : > { %280 = vmatprep.subr.mxu0 %v203_v16  ;;  %v234_v50 = vld [vmem:[#allocation2 + $0x170] sm:$0xff]  ;;  %v233_v51 = vld [vmem:[#allocation2 + $0x168] sm:$0xff]  ;;  %v232_v52 = vld [vmem:[#allocation2 + $0x160] sm:$0xff] }
  0x2d   : > { %281 = vmatpush1.msra.mxu0 %v202_v17  ;;  %v231_v53 = vld [vmem:[#allocation2 + $0x158] sm:$0xff]  ;;  %v230_v54 = vld [vmem:[#allocation2 + $0x150] sm:$0xff]  ;;  %v229_v55 = vld [vmem:[#allocation2 + $0x148] sm:$0xff] }
  0x2e   : > { %282 = vmatprep.subr.mxu0 %v201_v18  ;;  %v228_v56 = vld [vmem:[#allocation2 + $0x140] sm:$0xff]  ;;  %v227_v57 = vld [vmem:[#allocation2 + $0x138] sm:$0xff]  ;;  %v226_v58 = vld [vmem:[#allocation2 + $0x130] sm:$0xff] }
  0x2f   : > { %283 = vmatpush1.msra.mxu0 %v200_v19  ;;  %v225_v59 = vld [vmem:[#allocation2 + $0x128] sm:$0xff]  ;;  %v224_v60 = vld [vmem:[#allocation2 + $0x120] sm:$0xff]  ;;  %v223_v61 = vld [vmem:[#allocation2 + $0x118] sm:$0xff] }
  0x30   : > { %284 = vmatprep.subr.mxu0 %v199_v20  ;;  %v222_v62 = vld [vmem:[#allocation2 + $0x110] sm:$0xff]  ;;  %v221_v63 = vld [vmem:[#allocation2 + $0x108] sm:$0xff]  ;;  %v220_v0 = vld [vmem:[#allocation2 + $0x100] sm:$0xff] }
  0x31   : > { %285 = vmatpush1.msra.mxu0 %v198_v21  ;;  %v186_v1 = vld [vmem:[%s539_s25] sm:$0xff] }
  0x32   : > { %286 = vmatprep.subr.mxu0 %v197_v22  ;;  %v252_v5 = vld [vmem:[%s556_s2] sm:$0x3] }
  0x33   : > { %287 = vmatpush1.msra.mxu0 %v196_v23  ;;  %v257_v7 = vrot.slane %v252_v5, %v256_v4  ;;  %v261_v8 = vrot.slane %v252_v5, %v260_v6 }
  0x34   : > { %288 = vmatprep.subr.mxu0 %v195_v25 }
  0x35   : > { %289 = vmatpush1.msra.mxu0 %v194_v26 }
  0x36   : > { %290 = vmatprep.subr.mxu0 %v193_v27 }
  0x37   : > { %291 = vmatpush1.msra.mxu0 %v192_v28 }
  0x38   : > { %292 = vmatprep.subr.mxu0 %v191_v29 }
  0x39   : > { %293 = vmatpush1.msra.mxu0 %v190_v30 }
  0x3a   : > { %294 = vmatprep.subr.mxu0 %v189_v31 }
  0x3b   : > { %295 = vmatpush1.msra.mxu0 %v188_v32 }
  0x3c   : > { %296 = vmatprep.subr.mxu0 %v251_v33 }
  0x3d   : > { %297 = vmatpush2.msra.mxu0 %v250_v34 }
  0x3e   : > { %298 = vmatprep.subr.mxu0 %v249_v35 }
  0x3f   : > { %299 = vmatpush2.msra.mxu0 %v248_v36 }
  0x40   : > { %300 = vmatprep.subr.mxu0 %v247_v37 }
  0x41   : > { %301 = vmatpush2.msra.mxu0 %v246_v38 }
  0x42   : > { %302 = vmatprep.subr.mxu0 %v245_v39 }
  0x43   : > { %303 = vmatpush2.msra.mxu0 %v244_v40 }
  0x44   : > { %304 = vmatprep.subr.mxu0 %v243_v41 }
  0x45   : > { %305 = vmatpush2.msra.mxu0 %v242_v42 }
  0x46   : > { %306 = vmatprep.subr.mxu0 %v241_v43 }
  0x47   : > { %307 = vmatpush2.msra.mxu0 %v240_v44 }
  0x48   : > { %308 = vmatprep.subr.mxu0 %v239_v45 }
  0x49   : > { %309 = vmatpush2.msra.mxu0 %v238_v46 }
  0x4a   : > { %310 = vmatprep.subr.mxu0 %v237_v47 }
  0x4b   : > { %311 = vmatpush2.msra.mxu0 %v236_v48 }
  0x4c   : > { %312 = vmatprep.subr.mxu0 %v235_v49 }
  0x4d   : > { %313 = vmatpush2.msra.mxu0 %v234_v50 }
  0x4e   : > { %314 = vmatprep.subr.mxu0 %v233_v51 }
  0x4f   : > { %315 = vmatpush2.msra.mxu0 %v232_v52 }
  0x50   : > { %316 = vmatprep.subr.mxu0 %v231_v53 }
  0x51   : > { %317 = vmatpush2.msra.mxu0 %v230_v54 }
  0x52   : > { %318 = vmatprep.subr.mxu0 %v229_v55 }
  0x53   : > { %319 = vmatpush2.msra.mxu0 %v228_v56 }
  0x54   : > { %320 = vmatprep.subr.mxu0 %v227_v57 }
  0x55   : > { %321 = vmatpush2.msra.mxu0 %v226_v58 }
  0x56   : > { %322 = vmatprep.subr.mxu0 %v225_v59 }
  0x57   : > { %323 = vmatpush2.msra.mxu0 %v224_v60 }
  0x58   : > { %324 = vmatprep.subr.mxu0 %v223_v61 }
  0x59   : > { %325 = vmatpush2.msra.mxu0 %v222_v62 }
  0x5a   : > { %326 = vmatprep.subr.mxu0 %v221_v63 }
  0x5b   : > { %327 = vmatpush2.msra.mxu0 %v220_v0 }
  0x5c   : > { %329 = vmatmul.mubr.f32.vlgmr.msra.gmra.mxu0 %v186_v1 }
 0x11c   : > { %v330_v9 = vpop.f32.mrf.mxu0 }
 0x11d   : > { %v331_v10 = vadd.f32 %v330_v9, %v257_v7 }
 0x11e   : > { %v332_v11 = vpop.f32.mrf.mxu0 }
 0x11f   : > { %335 = vst [vmem:[%s185_s30] sm:$0xff] %v331_v10  ;;  %v333_v12 = vadd.f32 %v332_v11, %v261_v8 }
 0x121   : > { %336 = vst [vmem:[%s185_s30 + $0x8] sm:$0xff] %v333_v12 }
 0x122 PF: > { %s14_s12 = sadd.s32 1, %s476_s12  }
 0x123   : > { %p11_p1 = scmp.ge.s32.totalorder %s14_s12, 4  }
 0x125   :  { %13 = sbr.rel (!%p11_p1) target bundleno = 1 (0x1), region = 67 }
 0x12a   :  { %358 = vsyncpa [#allocation3], 1 }
 0x12b   :  { %360 = vsyncpa [#allocation3 + $0x1], 1 }

// kernel: _lambda_.9
= control target key start
LH: loop header
LB: loop body
LE: loop exit
PB: predicated region body
PF: predicated region fallthrough
CT: control target
= control target key end

     0   :  { %s967_s12 = smov 0   ;;  %s969_s13 = smov 0   ;;  %s1041_s0 = inlined_call_operand.vmem [shape: f32[2,8,768], index: 0, kind: input, shape index: {}, may-alias: {0,1,2}]   ;;  %s1042_s1 = inlined_call_operand.vmem [shape: f32[2,8,768], index: 1, kind: input, shape index: {}, may-alias: {0,1,2}]   ;;  %s1043_s2 = inlined_call_operand.vmem [shape: f32[2,8,768], index: 2, kind: input, shape index: {}, may-alias: {0,1,2}]   ;;  %s1044_s3 = inlined_call_operand.vmem [shape: f32[2,8,256], index: 3, kind: output, shape index: {}]  }
   0x1   :  { %s971_s14 = smov 0  }
   0x2 LB: > { %s32_s15 = sadd.s32 1, %s937_s13  ;;  %p833_p0 = scmp.ge.s32.totalorder %s941_s14, 1  ;;  %s941_s14 = sphi %s971_s14, %s13_s14   ;;  %s937_s13 = sphi %s969_s13, %s1046_s13   ;;  %s933_s12 = sphi %s967_s12, %s1045_s12  }
   0x3   : > { %p34_p1 = scmp.ge.s32.totalorder %s32_s15, 2  ;;  %p198_p2 = scmp.lt.s32.totalorder %s941_s14, 3 }
   0x5   : > { %s1048_s15 = smov (%p34_p1, %s32_s15), 0  ;;  %p199_p3 = pnand %p833_p0, %p198_p2 }
   0x6   : > { %p250_p4 = scmp.lt.s32.totalorder (!%p199_p3), %s933_s12, 1 }
   0x7   : > { %202 = sbr.rel (%p199_p3) target bundleno = 1266 (0x4f2), region = 32 }
   0xc   : > { %v943_v0 = vmov 0.0   ;;  %vm944_vm0 = vmmov 0   ;;  %s1050_s12 = smov (!%p250_p4, %s933_s12), 1  ;;  %vm292_vm1 = vcmask 7168   ;;  %v945_v4 = vmov -inf  }
   0xd   : > { %856 = vmatprep.subr.mxu0 %v943_v0  ;;  %858 = vmatprep.mubr.msk.f32.mxu0 %vm944_vm0, %v943_v0  ;;  %s990_s16 = smul.u32 48, %s1050_s12  ;;  %293 = vst.msk [vmem:[#allocation2] sm:$0xff] %vm292_vm1, %v945_v4  ;;  %294 = vst.msk [vmem:[#allocation2 + $0x8] sm:$0xff] %vm292_vm1, %v945_v4  ;;  %vm374_vm2 = vcmask 64512   ;;  %v946_v8 = vmov 0   ;;  %s847_s26 = sshll.u32 %s1050_s12, 4 }
   0xe   : > { %861 = vmatprep.subr.mxu1 %v943_v0  ;;  %863 = vmatprep.mubr.msk.f32.mxu1 %vm944_vm0, %v943_v0  ;;  %295 = vst.msk [vmem:[#allocation3] sm:$0xff] %vm292_vm1, %v943_v0  ;;  %296 = vst.msk [vmem:[#allocation3 + $0x8] sm:$0xff] %vm292_vm1, %v943_v0  ;;  %s287_s29 = scalar_lea.vmem %s1044_s3, %s847_s26 }
   0xf   : > { %s996_s19 = scalar_lea.vmem %s1042_s1, %s990_s16  ;;  %s1002_s22 = scalar_lea.vmem %s1041_s0, %s990_s16  ;;  %905 = vset.pattern.permute.xlu0 %v946_v8  ;;  %906 = vset.pattern.permute.xlu1 %v946_v8 }
  0x10   : > { %v839_v1 = vld [vmem:[%s996_s19 + $0x10] sm:$0xff]  ;;  %v299_v2 = vld [vmem:[%s1002_s22] sm:$0xff]  ;;  %s769_s25 = scalar_lea.vmem %s1043_s2, %s990_s16  ;;  %v481_v18 = vld [vmem:[%s1002_s22 + $0x8] sm:$0xff] }
  0x11   : > { %857 = vmatpush3.xpose.msra.mxu0 %v839_v1  ;;  %v300_v3 = vmul.f32 0.088388346, %v299_v2  ;;  %v840_v13 = vld [vmem:[%s769_s25 + $0x20] sm:$0xff]  ;;  %v843_v14 = vld [vmem:[%s769_s25 + $0x28] sm:$0xff]  ;;  %v842_v19 = vld [vmem:[%s996_s19 + $0x18] sm:$0xff] }
  0x12   : > { %871 = vmatprep.subr.mxu0 %v943_v0  ;;  %862 = vmatpush3.msra.mxu1 %v840_v13  ;;  %v482_v21 = vmul.f32 0.088388346, %v481_v18 }
  0x13   : > { %866 = vmatprep.subr.mxu1 %v943_v0 }
  0x14   : > { %859 = vmatmul.mubr.f32.vlgmr.msra.gmra.mxu0 %v300_v3  ;;  %v373_v9 = vld [vmem:[#allocation2] sm:$0xff]  ;;  %v556_v27 = vld [vmem:[#allocation2 + $0x8] sm:$0xff] }
  0x15   : > { %873 = vmatprep.mubr.msk.f32.mxu0 %vm944_vm0, %v943_v0  ;;  %872 = vmatpush3.msra.mxu0 %v843_v14  ;;  %v390_v41 = vld [vmem:[#allocation3] sm:$0xff]  ;;  %v573_v47 = vld [vmem:[#allocation3 + $0x8] sm:$0xff] }
  0xd4   : > { %v369_v5 = vpop.f32.mrf.mxu0 }
  0xd5   : > { %v375_v6 = vsel %vm374_vm2, %v369_v5, -inf }
  0xd6   : > { %376 = vmax.xlane.f32.xlu0 %v375_v6  ;;  %v860_v7 = vpop.f32.mrf.mxu0 }
 0x15f   : > { %v377_v10 = vpop.xlane.xlu0 %376 }
 0x160   : > { %v378_v11 = vmax.f32 %v373_v9, %v377_v10 }
 0x162   : > { %v379_v12 = vsub.f32 %v373_v9, %v378_v11  ;;  %480 = vst.msk [vmem:[#allocation2] sm:$0xff] %vm292_vm1, %v378_v11  ;;  %384 = vperm.xlu0 %905, %v378_v11  }
 0x164   : > { %v380_v30 = vmul.f32 1.442695, %v379_v12 }
 0x1dd   : > { %v385_v15 = vpop.permute.xlu0 %384 }
 0x1de   : > { %v387_v16 = vsub.f32 %v369_v5, %v385_v15 }
 0x1e0   : > { %v388_v17 = vmul.f32 1.442695, %v387_v16 }
 0x1e2   : > { %907 = vpow2.f32 %v388_v17 }
 0x1e3   : > { %909 = vpow2.f32 %v380_v30 }
 0x1ef   : > { %v908_v20 = vpop.eup %907 }
 0x1f0   : > { %864 = vmatmul.mubr.msk.f32.vlgmr.msra.gmra.mxu1 %vm374_vm2, %v908_v20  ;;  %v392_v32 = vsel %vm374_vm2, %v908_v20, 0.0  ;;  %v910_v34 = vpop.eup %909 }
 0x1f1   : > { %867 = vmatpush3.xpose.msra.mxu1 %v842_v19  ;;  %868 = vmatprep.mubr.msk.f32.mxu1 %vm944_vm0, %v943_v0  ;;  %v391_v42 = vmul.f32 %v910_v34, %v390_v41 }
 0x1f4   : > { %869 = vmatmul.mubr.f32.vlgmr.msra.gmra.mxu1 %v482_v21 }
 0x2b0   : > { %v467_v22 = vpop.f32.mrf.mxu1 }
 0x2b2   : > { %v865_v23 = vpop.f32.mrf.mxu1 }
 0x2b4   : > { %v551_v24 = vpop.f32.mrf.mxu1 }
 0x2b5   : > { %v557_v25 = vsel %vm374_vm2, %v551_v24, -inf }
 0x2b6   : > { %558 = vmax.xlane.f32.xlu1 %v557_v25  ;;  %v870_v26 = vpop.f32.mrf.mxu1 }
 0x33f   : > { %v559_v28 = vpop.xlane.xlu1 %558 }
 0x340   : > { %v560_v29 = vmax.f32 %v556_v27, %v559_v28 }
 0x342   : > { %662 = vst.msk [vmem:[#allocation2 + $0x8] sm:$0xff] %vm292_vm1, %v560_v29  ;;  %566 = vperm.xlu1 %906, %v560_v29   ;;  %v561_v31 = vsub.f32 %v556_v27, %v560_v29 }
 0x344   : > { %v562_v33 = vmul.f32 1.442695, %v561_v31 }
 0x346   : > { %911 = vpow2.f32 %v562_v33 }
 0x353   : > { %v912_v35 = vpop.eup %911 }
 0x354   : > { %v574_v48 = vmul.f32 %v912_v35, %v573_v47 }
 0x366   : > { %393 = vadd.xlane.f32.xlu1 %v392_v32 }
 0x377   : > { %474 = vperm.xlu1 %906, %v910_v34  }
 0x37b   : > { %656 = vperm.xlu1 %906, %v912_v35  }
 0x3bd   : > { %v567_v36 = vpop.permute.xlu1 %566 }
 0x3be   : > { %v569_v37 = vsub.f32 %v551_v24, %v567_v36 }
 0x3c0   : > { %v570_v38 = vmul.f32 1.442695, %v569_v37 }
 0x3c2   : > { %913 = vpow2.f32 %v570_v38 }
 0x3cf   : > { %v914_v39 = vpop.eup %913 }
 0x3d0   : > { %874 = vmatmul.mubr.msk.f32.vlgmr.msra.gmra.mxu0 %vm374_vm2, %v914_v39  ;;  %v575_v40 = vsel %vm374_vm2, %v914_v39, 0.0 }
 0x3d1   : > { %576 = vadd.xlane.f32.xlu0 %v575_v40 }
 0x3ef   : > { %v394_v43 = vpop.xlane.xlu1 %393 }
 0x3f0   : > { %v395_v44 = vadd.f32 %v394_v43, %v391_v42 }
 0x3f2   : > { %397 = vst.msk [vmem:[#allocation3] sm:$0xff] %vm292_vm1, %v395_v44 }
 0x3f3   : > { %v475_v53 = vpop.permute.xlu1 %474 }
 0x3f4   : > { %v477_v54 = vmul.f32 0.0, %v475_v53 }
 0x3f6   : > { %v478_v56 = vadd.f32 %v477_v54, %v467_v22 }
 0x3f7   : > { %v657_v55 = vpop.permute.xlu1 %656 }
 0x3f8   : > { %v659_v61 = vmul.f32 0.0, %v657_v55 }
 0x3f9   : > { %v666_v45 = vld [vmem:[#allocation3] sm:$0xff] }
 0x3fa   : > { %915 = vrcp.f32 %v666_v45 }
 0x407   : > { %v916_v46 = vpop.eup %915 }
 0x408   : > { %671 = vperm.xlu1 %906, %v916_v46  }
 0x45a   : > { %v577_v49 = vpop.xlane.xlu0 %576 }
 0x45b   : > { %v578_v50 = vadd.f32 %v577_v49, %v574_v48 }
 0x45d   : > { %579 = vst.msk [vmem:[#allocation3 + $0x8] sm:$0xff] %vm292_vm1, %v578_v50 }
 0x464   : > { %v676_v51 = vld [vmem:[#allocation3 + $0x8] sm:$0xff] }
 0x465   : > { %917 = vrcp.f32 %v676_v51 }
 0x472   : > { %v918_v52 = vpop.eup %917 }
 0x473   : > { %681 = vperm.xlu0 %905, %v918_v52  }
 0x483   : > { %v672_v57 = vpop.permute.xlu1 %671 }
 0x484   : > { %v674_v58 = vmul.f32 %v672_v57, %v478_v56 }
 0x486   : > { %675 = vst [vmem:[%s287_s29] sm:$0xff] %v674_v58 }
 0x490   : > { %v649_v59 = vpop.f32.mrf.mxu0 }
 0x491   : > { %v660_v62 = vadd.f32 %v659_v61, %v649_v59 }
 0x492   : > { %v875_v60 = vpop.f32.mrf.mxu0 }
 0x4ee   : > { %v682_v63 = vpop.permute.xlu0 %681 }
 0x4ef   : > { %v684_v0 = vmul.f32 %v682_v63, %v660_v62 }
 0x4f1   : > { %685 = vst [vmem:[%s287_s29 + $0x8] sm:$0xff] %v684_v0 }
 0x4f2 PF: > { %s13_s14 = sadd.s32 1, %s941_s14   ;;  %s1045_s12 = smov %s937_s13 }
 0x4f3   : > { %p10_p5 = scmp.ge.s32.totalorder %s13_s14, 4   ;;  %s1046_s13 = smov %s1048_s15 }
 0x4f5   :  { %12 = sbr.rel (!%p10_p5) target bundleno = 2 (0x2), region = 78 }

// kernel: _lambda_.8
= control target key start
LH: loop header
LB: loop body
LE: loop exit
PB: predicated region body
PF: predicated region fallthrough
CT: control target
= control target key end

     0   :  { %8 = vsyncpa [#allocation3], 0  ;;  %s1048_s0 = inlined_call_operand.hbm [shape: f32[16,256], index: 0, kind: input, shape index: {}]   ;;  %s1049_s1 = inlined_call_operand.hbm [shape: f32[256,768], index: 1, kind: input, shape index: {}]   ;;  %s1050_s2 = inlined_call_operand.vmem [shape: f32[1,768], index: 2, kind: input, shape index: {}]   ;;  %s1051_s3 = inlined_call_operand.vmem [shape: f32[16,768], index: 3, kind: output, shape index: {}]  }
   0x1   :  { %10 = vsyncpa [#allocation3 + $0x1], 0 }
   0x2   :  { %11 = vsyncpa [#allocation5], 0  ;;  %s911_s12 = smov 0   ;;  %s913_s13 = smov 0  }
   0x3   :  { %s915_s14 = smov 0   ;;  %s917_s15 = smov 0  }
   0x4 LB: > { %s930_s16 = sadd.s32 4294967295, %s885_s15   ;;  %p37_p0 = scmp.ne.s32.totalorder %s877_s13, %s873_s12  ;;  %s885_s15 = sphi %s917_s15, %s1066_s15   ;;  %s881_s14 = sphi %s915_s14, %s1065_s14   ;;  %s877_s13 = sphi %s913_s13, %s1064_s13   ;;  %s873_s12 = sphi %s911_s12, %s1063_s12  }
   0x5   : > { %p1052_p1 = scmp.eq.s32.totalorder %s930_s16, 0  ;;  %p727_p2 = scmp.ge.s32.totalorder %s885_s15, 1 }
   0x6   : > { %p116_p3 = scmp.lt.s32.totalorder %s885_s15, 3  ;;  %s887_s19 = smov [#allocation4]  }
   0x7   : > { %p938_p4 = por %p1052_p1, %p37_p0  ;;  %s128_s20 = sshll.u32 %s887_s19, 4  ;;  %s129_s20 = int_to_ptr.vmem [resolvable:$true] %s128_s20 }
   0x8   : > { %p942_p5 = pnand %p727_p2, %p116_p3  ;;  %s955_s22 = sadd.s32 1, %s885_s15  }
   0x9   : > { %s1055_s17 = scalar_select %p938_p4, 1, 0 }
   0xa   : > { %s1056_s18 = scalar_select %p942_p5, 1, 0 }
   0xb   : > { %p747_p6 = pneg %p942_p5  ;;  %s24_s23 = sadd.s32 1, %s881_s14 }
   0xc   : > { %s21_s24 = ssub.s32 %s885_s15, %s955_s22  ;;  %s804_s25 = scalar_lea.vmem %s129_s20, 24576 }
   0xd   : > { %p950_p7 = pnand %p747_p6, %p1052_p1  ;;  %p805_p9 = scmp.ne.s32.totalorder %s129_s20, %s804_s25 }
   0xe   : > { %p812_p12 = scmp.lt.s32.totalorder %s129_s20, %s129_s20  ;;  %p813_p13 = scmp.lt.s32.totalorder %s804_s25, %s804_s25 }
   0xf   : > { %p795_p8 = pneg %p950_p7 }
  0x10   : > { %p814_p0 = por %p813_p13, %p812_p12 }
  0x11   : > { %p807_p10 = pnand %p805_p9, %p795_p8 }
  0x13   : > { %p808_p11 = pneg %p807_p10 }
  0x15   : > { %p815_p2 = pnand %p814_p0, %p808_p11 }
  0x17   : > { %818 = shalt.err (!%p815_p2)
}
  0x18   : > { %s888_s26 = smov 768   ;;  %s889_s27 = smov 48  }
  0x19   : > { %750 = dma.hbm_to_vmem [thread:$0]  (!%p950_p7), %s1049_s1, 24576, %s129_s20, [#allocation5], %s888_s26, %s888_s26, %s889_s27  }
  0x1a   : > { %p22_p3 = scmp.eq.s32.totalorder %s21_s24, 0  ;;  %p31_p6 = scmp.ne.s32.totalorder %s881_s14, %s877_s13 }
  0x1b   : > { %p32_p8 = scmp.eq.s32.totalorder %s885_s15, 0  ;;  %p756_p9 = scmp.lt.s32.totalorder %s885_s15, 2 }
  0x1c   : > { %s972_s30 = scalar_select %p22_p3, %s881_s14, %s24_s23  }
  0x1d   : > { %p33_p10 = por %p32_p8, %p31_p6  ;;  %s145_s4 = sand.u32 1, %s881_s14  }
  0x1e   : > { %s730_s5 = sshll.u32 %s145_s4, 4  ;;  %s739_s6 = sshll.u32 %s885_s15, 8 }
  0x1f   : > { %s979_s9 = scalar_lea.hbm %s1048_s0, %s739_s6  ;;  %s149_s10 = scalar_lea.vmem [#allocation2], %s730_s5 }
  0x20   : > { %s157_s11 = sshll.u32 %s149_s10, 4  ;;  %p981_p7 = pnand %p756_p9, %p33_p10  ;;  %s158_s11 = int_to_ptr.vmem [resolvable:$true] %s157_s11 }
  0x21   : > { %s146_s19 = scalar_lea.sflag [#allocation3], %s145_s4  ;;  %s819_s20 = scalar_lea.hbm %s979_s9, 256 }
  0x22   : > { %p820_p11 = scmp.ne.s32.totalorder %s979_s9, %s819_s20  ;;  %p821_p12 = pneg %p981_p7 }
  0x23   : > { %s824_s23 = scalar_lea.hbm %s1048_s0, 512  ;;  %p825_p2 = scmp.lt.s32.totalorder %s979_s9, %s1048_s0 }
  0x24   : > { %p822_p13 = pnand %p821_p12, %p820_p11  ;;  %p826_p3 = scmp.lt.s32.totalorder %s824_s23, %s819_s20 }
  0x26   : > { %p823_p0 = pneg %p822_p13  ;;  %p827_p6 = por %p826_p3, %p825_p2 }
  0x28   : > { %p828_p8 = pnand %p827_p6, %p823_p0 }
  0x2a   : > { %831 = shalt.err (!%p828_p8)
}
  0x2b   : > { %s832_s26 = scalar_lea.vmem %s158_s11, 256  ;;  %s890_s27 = smov [#allocation2]  }
  0x2c   : > { %p833_p9 = scmp.ne.s32.totalorder %s158_s11, %s832_s26  ;;  %s837_s28 = sshll.u32 %s890_s27, 4  ;;  %s838_s28 = int_to_ptr.vmem [resolvable:$false] %s837_s28 }
  0x2d   : > { %s839_s29 = scalar_lea.vmem %s838_s28, 512  ;;  %p840_p11 = scmp.lt.s32.totalorder %s158_s11, %s838_s28 }
  0x2e   : > { %p835_p10 = pnand %p833_p9, %p821_p12  ;;  %p841_p13 = scmp.lt.s32.totalorder %s839_s29, %s832_s26 }
  0x30   : > { %p836_p1 = pneg %p835_p10  ;;  %p842_p4 = por %p841_p13, %p840_p11 }
  0x32   : > { %p843_p5 = pnand %p842_p4, %p836_p1 }
  0x34   : > { %846 = shalt.err (!%p843_p5)
}
  0x35   : > { %754 = dma.hbm_to_vmem [thread:$0]  (!%p981_p7), %s979_s9, 256, %s158_s11, %s146_s19  }
  0x36   : > { %p1059_p0 = scmp.ne.s32.totalorder %s1056_s18, 0 }
  0x37   : > { %s168_s4 = sand.u32 (!%p1059_p0), 1, %s877_s13   ;;  %p1060_p12 = scmp.ne.s32.totalorder (!%p1059_p0), %s1055_s17, 0 }
  0x38   : > { %166 = sbr.rel (%p1059_p0) target bundleno = 392 (0x188), region = 32  ;;  %s1002_s5 = sshll.u32 (!%p1059_p0), %s168_s4, 4 }
  0x39   : > { %s169_s6 = scalar_lea.sflag (!%p1059_p0), [#allocation3], %s168_s4  ;;  %s172_s7 = scalar_lea.vmem (!%p1059_p0), [#allocation2], %s1002_s5 }
  0x3d   : > { %864 = dma.done.wait (%p1060_p12), %s169_s6, 256  }
  0x3e   : > { %866 = vsyncadd (%p1060_p12), %s169_s6, 4294967040  ;;  %p1061_p1 = scmp.eq.s32.totalorder %s930_s16, 0 }
  0x40   : > { %868 = dma.done.wait (%p1061_p1), [#allocation5], 24576   ;;  %p1062_p4 = pmov %p1061_p1 }
  0x41   : > { %v297_v0 = vld [vmem:[#allocation4 + $0x2d8] sm:$0xff]  ;;  %v296_v1 = vld [vmem:[#allocation4 + $0x2d0] sm:$0xff]  ;;  %v291_v2 = vld [vmem:[#allocation4 + $0x2a8] sm:$0xff]  ;;  %p199_p5 = scmp.lt.s32.totalorder %s930_s16, 1 }
  0x42   : > { %870 = vsyncadd (%p1062_p4), [#allocation5], 4294942720  ;;  %430 = vmatprep.subr.mxu0 %v297_v0  ;;  %v290_v3 = vld [vmem:[#allocation4 + $0x2a0] sm:$0xff]  ;;  %v285_v4 = vld [vmem:[#allocation4 + $0x278] sm:$0xff] }
  0x43   : > { %431 = vmatpush1.msra.mxu0 %v296_v1  ;;  %v284_v5 = vld [vmem:[#allocation4 + $0x270] sm:$0xff]  ;;  %v279_v6 = vld [vmem:[#allocation4 + $0x248] sm:$0xff]  ;;  %v278_v7 = vld [vmem:[#allocation4 + $0x240] sm:$0xff]  ;;  %s1068_s16 = smov (!%p199_p5, %s930_s16), 1 }
  0x44   : > { %432 = vmatprep.subr.mxu0 %v291_v2  ;;  %v273_v8 = vld [vmem:[#allocation4 + $0x218] sm:$0xff]  ;;  %v272_v9 = vld [vmem:[#allocation4 + $0x210] sm:$0xff]  ;;  %v267_v10 = vld [vmem:[#allocation4 + $0x1e8] sm:$0xff]  ;;  %s740_s8 = smul.u32 48, %s1068_s16 }
  0x45   : > { %433 = vmatpush1.msra.mxu0 %v290_v3  ;;  %v266_v11 = vld [vmem:[#allocation4 + $0x1e0] sm:$0xff]  ;;  %v261_v12 = vld [vmem:[#allocation4 + $0x1b8] sm:$0xff]  ;;  %v260_v13 = vld [vmem:[#allocation4 + $0x1b0] sm:$0xff] }
  0x46   : > { %434 = vmatprep.subr.mxu0 %v285_v4  ;;  %v255_v14 = vld [vmem:[#allocation4 + $0x188] sm:$0xff]  ;;  %v254_v15 = vld [vmem:[#allocation4 + $0x180] sm:$0xff]  ;;  %v249_v16 = vld [vmem:[#allocation4 + $0x158] sm:$0xff]  ;;  %s203_s11 = scalar_lea.vmem %s1051_s3, %s740_s8 }
  0x47   : > { %435 = vmatpush1.msra.mxu0 %v284_v5  ;;  %v248_v17 = vld [vmem:[#allocation4 + $0x150] sm:$0xff]  ;;  %v243_v18 = vld [vmem:[#allocation4 + $0x128] sm:$0xff]  ;;  %v242_v19 = vld [vmem:[#allocation4 + $0x120] sm:$0xff] }
  0x48   : > { %436 = vmatprep.subr.mxu0 %v279_v6  ;;  %v237_v20 = vld [vmem:[#allocation4 + $0xf8] sm:$0xff]  ;;  %v236_v21 = vld [vmem:[#allocation4 + $0xf0] sm:$0xff]  ;;  %v231_v22 = vld [vmem:[#allocation4 + $0xc8] sm:$0xff] }
  0x49   : > { %437 = vmatpush1.msra.mxu0 %v278_v7  ;;  %v230_v23 = vld [vmem:[#allocation4 + $0xc0] sm:$0xff]  ;;  %v299_v24 = vld [vmem:[#allocation4 + $0x2e8] sm:$0xff]  ;;  %v225_v26 = vld [vmem:[#allocation4 + $0x98] sm:$0xff] }
  0x4a   : > { %438 = vmatprep.subr.mxu0 %v273_v8  ;;  %v1015_v25 = vld [vmem:[%s172_s7 + $0x8] sm:$0xff]  ;;  %501 = vmatprep.subr.mxu1 %v299_v24  ;;  %v298_v27 = vld [vmem:[#allocation4 + $0x2e0] sm:$0xff]  ;;  %v224_v29 = vld [vmem:[#allocation4 + $0x90] sm:$0xff] }
  0x4b   : > { %439 = vmatpush1.msra.mxu0 %v272_v9  ;;  %v293_v28 = vld [vmem:[#allocation4 + $0x2b8] sm:$0xff]  ;;  %494 = vmatprep.mubr.f32.mxu0 %v1015_v25  ;;  %v292_v30 = vld [vmem:[#allocation4 + $0x2b0] sm:$0xff]  ;;  %v219_v31 = vld [vmem:[#allocation4 + $0x68] sm:$0xff] }
  0x4c   : > { %440 = vmatprep.subr.mxu0 %v267_v10  ;;  %502 = vmatpush1.msra.mxu1 %v298_v27  ;;  %v287_v32 = vld [vmem:[#allocation4 + $0x288] sm:$0xff]  ;;  %v218_v33 = vld [vmem:[#allocation4 + $0x60] sm:$0xff]  ;;  %v213_v35 = vld [vmem:[#allocation4 + $0x38] sm:$0xff] }
  0x4d   : > { %441 = vmatpush1.msra.mxu0 %v266_v11  ;;  %503 = vmatprep.subr.mxu1 %v293_v28  ;;  %v286_v34 = vld [vmem:[#allocation4 + $0x280] sm:$0xff]  ;;  %v281_v36 = vld [vmem:[#allocation4 + $0x258] sm:$0xff]  ;;  %v212_v37 = vld [vmem:[#allocation4 + $0x30] sm:$0xff] }
  0x4e   : > { %442 = vmatprep.subr.mxu0 %v261_v12  ;;  %504 = vmatpush1.msra.mxu1 %v292_v30  ;;  %v280_v38 = vld [vmem:[#allocation4 + $0x250] sm:$0xff]  ;;  %v207_v39 = vld [vmem:[#allocation4 + $0x8] sm:$0xff]  ;;  %v206_v41 = vld [vmem:[#allocation4] sm:$0xff] }
  0x4f   : > { %443 = vmatpush1.msra.mxu0 %v260_v13  ;;  %505 = vmatprep.subr.mxu1 %v287_v32  ;;  %v275_v40 = vld [vmem:[#allocation4 + $0x228] sm:$0xff]  ;;  %v274_v42 = vld [vmem:[#allocation4 + $0x220] sm:$0xff]  ;;  %v393_v43 = vld [vmem:[#allocation4 + $0x5d8] sm:$0xff] }
  0x50   : > { %444 = vmatprep.subr.mxu0 %v255_v14  ;;  %506 = vmatpush1.msra.mxu1 %v286_v34  ;;  %v269_v44 = vld [vmem:[#allocation4 + $0x1f8] sm:$0xff]  ;;  %v392_v45 = vld [vmem:[#allocation4 + $0x5d0] sm:$0xff]  ;;  %v387_v47 = vld [vmem:[#allocation4 + $0x5a8] sm:$0xff] }
  0x51   : > { %445 = vmatpush1.msra.mxu0 %v254_v15  ;;  %507 = vmatprep.subr.mxu1 %v281_v36  ;;  %v268_v46 = vld [vmem:[#allocation4 + $0x1f0] sm:$0xff]  ;;  %v263_v48 = vld [vmem:[#allocation4 + $0x1c8] sm:$0xff]  ;;  %v386_v49 = vld [vmem:[#allocation4 + $0x5a0] sm:$0xff] }
  0x52   : > { %446 = vmatprep.subr.mxu0 %v249_v16  ;;  %508 = vmatpush1.msra.mxu1 %v280_v38  ;;  %v262_v50 = vld [vmem:[#allocation4 + $0x1c0] sm:$0xff]  ;;  %v381_v51 = vld [vmem:[#allocation4 + $0x578] sm:$0xff]  ;;  %v380_v53 = vld [vmem:[#allocation4 + $0x570] sm:$0xff] }
  0x53   : > { %447 = vmatpush1.msra.mxu0 %v248_v17  ;;  %509 = vmatprep.subr.mxu1 %v275_v40  ;;  %v257_v52 = vld [vmem:[#allocation4 + $0x198] sm:$0xff]  ;;  %v256_v54 = vld [vmem:[#allocation4 + $0x190] sm:$0xff]  ;;  %v375_v55 = vld [vmem:[#allocation4 + $0x548] sm:$0xff] }
  0x54   : > { %448 = vmatprep.subr.mxu0 %v243_v18  ;;  %510 = vmatpush1.msra.mxu1 %v274_v42  ;;  %v251_v56 = vld [vmem:[#allocation4 + $0x168] sm:$0xff]  ;;  %v374_v57 = vld [vmem:[#allocation4 + $0x540] sm:$0xff]  ;;  %v369_v59 = vld [vmem:[#allocation4 + $0x518] sm:$0xff] }
  0x55   : > { %449 = vmatpush1.msra.mxu0 %v242_v19  ;;  %511 = vmatprep.subr.mxu1 %v269_v44  ;;  %v250_v58 = vld [vmem:[#allocation4 + $0x160] sm:$0xff]  ;;  %v245_v60 = vld [vmem:[#allocation4 + $0x138] sm:$0xff]  ;;  %v368_v61 = vld [vmem:[#allocation4 + $0x510] sm:$0xff] }
  0x56   : > { %450 = vmatprep.subr.mxu0 %v237_v20  ;;  %512 = vmatpush1.msra.mxu1 %v268_v46  ;;  %v244_v62 = vld [vmem:[#allocation4 + $0x130] sm:$0xff]  ;;  %v363_v63 = vld [vmem:[#allocation4 + $0x4e8] sm:$0xff]  ;;  %v362_v1 = vld [vmem:[#allocation4 + $0x4e0] sm:$0xff] }
  0x57   : > { %451 = vmatpush1.msra.mxu0 %v236_v21  ;;  %513 = vmatprep.subr.mxu1 %v263_v48  ;;  %v239_v0 = vld [vmem:[#allocation4 + $0x108] sm:$0xff]  ;;  %v238_v2 = vld [vmem:[#allocation4 + $0x100] sm:$0xff]  ;;  %v357_v3 = vld [vmem:[#allocation4 + $0x4b8] sm:$0xff] }
  0x58   : > { %452 = vmatprep.subr.mxu0 %v231_v22  ;;  %514 = vmatpush1.msra.mxu1 %v262_v50  ;;  %v233_v4 = vld [vmem:[#allocation4 + $0xd8] sm:$0xff]  ;;  %v356_v5 = vld [vmem:[#allocation4 + $0x4b0] sm:$0xff]  ;;  %v351_v7 = vld [vmem:[#allocation4 + $0x488] sm:$0xff] }
  0x59   : > { %453 = vmatpush1.msra.mxu0 %v230_v23  ;;  %515 = vmatprep.subr.mxu1 %v257_v52  ;;  %v232_v6 = vld [vmem:[#allocation4 + $0xd0] sm:$0xff]  ;;  %v227_v8 = vld [vmem:[#allocation4 + $0xa8] sm:$0xff]  ;;  %v350_v9 = vld [vmem:[#allocation4 + $0x480] sm:$0xff] }
  0x5a   : > { %454 = vmatprep.subr.mxu0 %v225_v26  ;;  %516 = vmatpush1.msra.mxu1 %v256_v54  ;;  %v226_v10 = vld [vmem:[#allocation4 + $0xa0] sm:$0xff]  ;;  %v345_v11 = vld [vmem:[#allocation4 + $0x458] sm:$0xff]  ;;  %v344_v13 = vld [vmem:[#allocation4 + $0x450] sm:$0xff] }
  0x5b   : > { %455 = vmatpush1.msra.mxu0 %v224_v29  ;;  %517 = vmatprep.subr.mxu1 %v251_v56  ;;  %v221_v12 = vld [vmem:[#allocation4 + $0x78] sm:$0xff]  ;;  %v220_v14 = vld [vmem:[#allocation4 + $0x70] sm:$0xff]  ;;  %v339_v15 = vld [vmem:[#allocation4 + $0x428] sm:$0xff] }
  0x5c   : > { %456 = vmatprep.subr.mxu0 %v219_v31  ;;  %518 = vmatpush1.msra.mxu1 %v250_v58  ;;  %v215_v16 = vld [vmem:[#allocation4 + $0x48] sm:$0xff]  ;;  %v338_v17 = vld [vmem:[#allocation4 + $0x420] sm:$0xff]  ;;  %v333_v19 = vld [vmem:[#allocation4 + $0x3f8] sm:$0xff] }
  0x5d   : > { %457 = vmatpush1.msra.mxu0 %v218_v33  ;;  %519 = vmatprep.subr.mxu1 %v245_v60  ;;  %v214_v18 = vld [vmem:[#allocation4 + $0x40] sm:$0xff]  ;;  %v209_v20 = vld [vmem:[#allocation4 + $0x18] sm:$0xff]  ;;  %v332_v21 = vld [vmem:[#allocation4 + $0x3f0] sm:$0xff] }
  0x5e   : > { %458 = vmatprep.subr.mxu0 %v213_v35  ;;  %520 = vmatpush1.msra.mxu1 %v244_v62  ;;  %v208_v22 = vld [vmem:[#allocation4 + $0x10] sm:$0xff]  ;;  %v327_v23 = vld [vmem:[#allocation4 + $0x3c8] sm:$0xff]  ;;  %v326_v26 = vld [vmem:[#allocation4 + $0x3c0] sm:$0xff] }
  0x5f   : > { %459 = vmatpush1.msra.mxu0 %v212_v37  ;;  %521 = vmatprep.subr.mxu1 %v239_v0  ;;  %v395_v24 = vld [vmem:[#allocation4 + $0x5e8] sm:$0xff]  ;;  %v394_v27 = vld [vmem:[#allocation4 + $0x5e0] sm:$0xff]  ;;  %v321_v28 = vld [vmem:[#allocation4 + $0x398] sm:$0xff] }
  0x60   : > { %460 = vmatprep.subr.mxu0 %v207_v39  ;;  %522 = vmatpush1.msra.mxu1 %v238_v2  ;;  %v389_v29 = vld [vmem:[#allocation4 + $0x5b8] sm:$0xff]  ;;  %v320_v30 = vld [vmem:[#allocation4 + $0x390] sm:$0xff]  ;;  %v315_v32 = vld [vmem:[#allocation4 + $0x368] sm:$0xff] }
  0x61   : > { %461 = vmatpush1.msra.mxu0 %v206_v41  ;;  %523 = vmatprep.subr.mxu1 %v233_v4  ;;  %v388_v31 = vld [vmem:[#allocation4 + $0x5b0] sm:$0xff]  ;;  %v383_v33 = vld [vmem:[#allocation4 + $0x588] sm:$0xff]  ;;  %v314_v34 = vld [vmem:[#allocation4 + $0x360] sm:$0xff] }
  0x62   : > { %462 = vmatprep.subr.mxu0 %v393_v43  ;;  %524 = vmatpush1.msra.mxu1 %v232_v6  ;;  %v382_v35 = vld [vmem:[#allocation4 + $0x580] sm:$0xff]  ;;  %v309_v36 = vld [vmem:[#allocation4 + $0x338] sm:$0xff]  ;;  %v308_v38 = vld [vmem:[#allocation4 + $0x330] sm:$0xff] }
  0x63   : > { %463 = vmatpush2.msra.mxu0 %v392_v45  ;;  %525 = vmatprep.subr.mxu1 %v227_v8  ;;  %v377_v37 = vld [vmem:[#allocation4 + $0x558] sm:$0xff]  ;;  %v376_v39 = vld [vmem:[#allocation4 + $0x550] sm:$0xff]  ;;  %v303_v40 = vld [vmem:[#allocation4 + $0x308] sm:$0xff] }
  0x64   : > { %464 = vmatprep.subr.mxu0 %v387_v47  ;;  %526 = vmatpush1.msra.mxu1 %v226_v10  ;;  %v371_v41 = vld [vmem:[#allocation4 + $0x528] sm:$0xff]  ;;  %v302_v42 = vld [vmem:[#allocation4 + $0x300] sm:$0xff]  ;;  %v301_v45 = vld [vmem:[#allocation4 + $0x2f8] sm:$0xff] }
  0x65   : > { %465 = vmatpush2.msra.mxu0 %v386_v49  ;;  %527 = vmatprep.subr.mxu1 %v221_v12  ;;  %v370_v43 = vld [vmem:[#allocation4 + $0x520] sm:$0xff]  ;;  %v300_v46 = vld [vmem:[#allocation4 + $0x2f0] sm:$0xff]  ;;  %v365_v47 = vld [vmem:[#allocation4 + $0x4f8] sm:$0xff] }
  0x66   : > { %466 = vmatprep.subr.mxu0 %v381_v51  ;;  %528 = vmatpush1.msra.mxu1 %v220_v14  ;;  %v1020_v44 = vld [vmem:[%s172_s7] sm:$0xff]  ;;  %v295_v48 = vld [vmem:[#allocation4 + $0x2c8] sm:$0xff]  ;;  %v289_v52 = vld [vmem:[#allocation4 + $0x298] sm:$0xff] }
  0x67   : > { %467 = vmatpush2.msra.mxu0 %v380_v53  ;;  %529 = vmatprep.subr.mxu1 %v215_v16  ;;  %v364_v49 = vld [vmem:[#allocation4 + $0x4f0] sm:$0xff]  ;;  %v294_v50 = vld [vmem:[#allocation4 + $0x2c0] sm:$0xff]  ;;  %v359_v51 = vld [vmem:[#allocation4 + $0x4c8] sm:$0xff] }
  0x68   : > { %468 = vmatprep.subr.mxu0 %v375_v55  ;;  %530 = vmatpush1.msra.mxu1 %v214_v18  ;;  %v358_v53 = vld [vmem:[#allocation4 + $0x4c0] sm:$0xff]  ;;  %v288_v54 = vld [vmem:[#allocation4 + $0x290] sm:$0xff]  ;;  %v353_v55 = vld [vmem:[#allocation4 + $0x498] sm:$0xff] }
  0x69   : > { %469 = vmatpush2.msra.mxu0 %v374_v57  ;;  %531 = vmatprep.subr.mxu1 %v209_v20  ;;  %v283_v56 = vld [vmem:[#allocation4 + $0x268] sm:$0xff]  ;;  %v352_v57 = vld [vmem:[#allocation4 + $0x490] sm:$0xff]  ;;  %v282_v58 = vld [vmem:[#allocation4 + $0x260] sm:$0xff] }
  0x6a   : > { %470 = vmatprep.subr.mxu0 %v369_v59  ;;  %532 = vmatpush1.msra.mxu1 %v208_v22  ;;  %v347_v59 = vld [vmem:[#allocation4 + $0x468] sm:$0xff]  ;;  %v277_v60 = vld [vmem:[#allocation4 + $0x238] sm:$0xff]  ;;  %v276_v62 = vld [vmem:[#allocation4 + $0x230] sm:$0xff] }
  0x6b   : > { %471 = vmatpush2.msra.mxu0 %v368_v61  ;;  %533 = vmatprep.subr.mxu1 %v395_v24  ;;  %v346_v61 = vld [vmem:[#allocation4 + $0x460] sm:$0xff]  ;;  %v271_v0 = vld [vmem:[#allocation4 + $0x208] sm:$0xff]  ;;  %v265_v4 = vld [vmem:[#allocation4 + $0x1d8] sm:$0xff] }
  0x6c   : > { %472 = vmatprep.subr.mxu0 %v363_v63  ;;  %534 = vmatpush2.msra.mxu1 %v394_v27  ;;  %v341_v63 = vld [vmem:[#allocation4 + $0x438] sm:$0xff]  ;;  %v270_v2 = vld [vmem:[#allocation4 + $0x200] sm:$0xff]  ;;  %v264_v6 = vld [vmem:[#allocation4 + $0x1d0] sm:$0xff] }
  0x6d   : > { %473 = vmatpush2.msra.mxu0 %v362_v1  ;;  %535 = vmatprep.subr.mxu1 %v389_v29  ;;  %v340_v1 = vld [vmem:[#allocation4 + $0x430] sm:$0xff]  ;;  %v259_v8 = vld [vmem:[#allocation4 + $0x1a8] sm:$0xff]  ;;  %v258_v10 = vld [vmem:[#allocation4 + $0x1a0] sm:$0xff] }
  0x6e   : > { %474 = vmatprep.subr.mxu0 %v357_v3  ;;  %536 = vmatpush2.msra.mxu1 %v388_v31  ;;  %v335_v3 = vld [vmem:[#allocation4 + $0x408] sm:$0xff]  ;;  %v253_v12 = vld [vmem:[#allocation4 + $0x178] sm:$0xff]  ;;  %v252_v14 = vld [vmem:[#allocation4 + $0x170] sm:$0xff] }
  0x6f   : > { %475 = vmatpush2.msra.mxu0 %v356_v5  ;;  %537 = vmatprep.subr.mxu1 %v383_v33  ;;  %v334_v5 = vld [vmem:[#allocation4 + $0x400] sm:$0xff]  ;;  %v247_v16 = vld [vmem:[#allocation4 + $0x148] sm:$0xff]  ;;  %v241_v20 = vld [vmem:[#allocation4 + $0x118] sm:$0xff] }
  0x70   : > { %476 = vmatprep.subr.mxu0 %v351_v7  ;;  %538 = vmatpush2.msra.mxu1 %v382_v35  ;;  %v329_v7 = vld [vmem:[#allocation4 + $0x3d8] sm:$0xff]  ;;  %v246_v18 = vld [vmem:[#allocation4 + $0x140] sm:$0xff]  ;;  %v240_v22 = vld [vmem:[#allocation4 + $0x110] sm:$0xff] }
  0x71   : > { %477 = vmatpush2.msra.mxu0 %v350_v9  ;;  %539 = vmatprep.subr.mxu1 %v377_v37  ;;  %v328_v9 = vld [vmem:[#allocation4 + $0x3d0] sm:$0xff]  ;;  %v235_v24 = vld [vmem:[#allocation4 + $0xe8] sm:$0xff]  ;;  %v234_v27 = vld [vmem:[#allocation4 + $0xe0] sm:$0xff] }
  0x72   : > { %478 = vmatprep.subr.mxu0 %v345_v11  ;;  %540 = vmatpush2.msra.mxu1 %v376_v39  ;;  %v323_v11 = vld [vmem:[#allocation4 + $0x3a8] sm:$0xff]  ;;  %v228_v29 = vld [vmem:[#allocation4 + $0xb0] sm:$0xff]  ;;  %v222_v31 = vld [vmem:[#allocation4 + $0x80] sm:$0xff] }
  0x73   : > { %479 = vmatpush2.msra.mxu0 %v344_v13  ;;  %541 = vmatprep.subr.mxu1 %v371_v41  ;;  %v322_v13 = vld [vmem:[#allocation4 + $0x3a0] sm:$0xff]  ;;  %v216_v33 = vld [vmem:[#allocation4 + $0x50] sm:$0xff] }
  0x74   : > { %480 = vmatprep.subr.mxu0 %v339_v15  ;;  %542 = vmatpush2.msra.mxu1 %v370_v43  ;;  %v317_v15 = vld [vmem:[#allocation4 + $0x378] sm:$0xff]  ;;  %v210_v35 = vld [vmem:[#allocation4 + $0x20] sm:$0xff]  ;;  %v396_v37 = vld [vmem:[#allocation4 + $0x5f0] sm:$0xff] }
  0x75   : > { %481 = vmatpush2.msra.mxu0 %v338_v17  ;;  %543 = vmatprep.subr.mxu1 %v365_v47  ;;  %v316_v17 = vld [vmem:[#allocation4 + $0x370] sm:$0xff]  ;;  %v390_v39 = vld [vmem:[#allocation4 + $0x5c0] sm:$0xff]  ;;  %v373_v43 = vld [vmem:[#allocation4 + $0x538] sm:$0xff] }
  0x76   : > { %482 = vmatprep.subr.mxu0 %v333_v19  ;;  %544 = vmatpush2.msra.mxu1 %v364_v49  ;;  %v311_v19 = vld [vmem:[#allocation4 + $0x348] sm:$0xff]  ;;  %v384_v41 = vld [vmem:[#allocation4 + $0x590] sm:$0xff]  ;;  %v366_v47 = vld [vmem:[#allocation4 + $0x500] sm:$0xff] }
  0x77   : > { %483 = vmatpush2.msra.mxu0 %v332_v21  ;;  %545 = vmatprep.subr.mxu1 %v359_v51  ;;  %v310_v21 = vld [vmem:[#allocation4 + $0x340] sm:$0xff]  ;;  %v360_v49 = vld [vmem:[#allocation4 + $0x4d0] sm:$0xff] }
  0x78   : > { %484 = vmatprep.subr.mxu0 %v327_v23  ;;  %546 = vmatpush2.msra.mxu1 %v358_v53  ;;  %v305_v23 = vld [vmem:[#allocation4 + $0x318] sm:$0xff]  ;;  %v354_v51 = vld [vmem:[#allocation4 + $0x4a0] sm:$0xff]  ;;  %v348_v53 = vld [vmem:[#allocation4 + $0x470] sm:$0xff] }
  0x79   : > { %485 = vmatpush2.msra.mxu0 %v326_v26  ;;  %547 = vmatprep.subr.mxu1 %v353_v55  ;;  %v304_v26 = vld [vmem:[#allocation4 + $0x310] sm:$0xff]  ;;  %v342_v55 = vld [vmem:[#allocation4 + $0x440] sm:$0xff] }
  0x7a   : > { %486 = vmatprep.subr.mxu0 %v321_v28  ;;  %548 = vmatpush2.msra.mxu1 %v352_v57  ;;  %v229_v28 = vld [vmem:[#allocation4 + $0xb8] sm:$0xff]  ;;  %v336_v57 = vld [vmem:[#allocation4 + $0x410] sm:$0xff] }
  0x7b   : > { %487 = vmatpush2.msra.mxu0 %v320_v30  ;;  %549 = vmatprep.subr.mxu1 %v347_v59  ;;  %v223_v30 = vld [vmem:[#allocation4 + $0x88] sm:$0xff]  ;;  %v330_v59 = vld [vmem:[#allocation4 + $0x3e0] sm:$0xff] }
  0x7c   : > { %488 = vmatprep.subr.mxu0 %v315_v32  ;;  %550 = vmatpush2.msra.mxu1 %v346_v61  ;;  %v217_v32 = vld [vmem:[#allocation4 + $0x58] sm:$0xff]  ;;  %v324_v61 = vld [vmem:[#allocation4 + $0x3b0] sm:$0xff] }
  0x7d   : > { %489 = vmatpush2.msra.mxu0 %v314_v34  ;;  %551 = vmatprep.subr.mxu1 %v341_v63  ;;  %v211_v34 = vld [vmem:[#allocation4 + $0x28] sm:$0xff]  ;;  %v318_v63 = vld [vmem:[#allocation4 + $0x380] sm:$0xff] }
  0x7e   : > { %490 = vmatprep.subr.mxu0 %v309_v36  ;;  %552 = vmatpush2.msra.mxu1 %v340_v1  ;;  %v397_v36 = vld [vmem:[#allocation4 + $0x5f8] sm:$0xff]  ;;  %v312_v1 = vld [vmem:[#allocation4 + $0x350] sm:$0xff] }
  0x7f   : > { %491 = vmatpush2.msra.mxu0 %v308_v38  ;;  %553 = vmatprep.subr.mxu1 %v335_v3  ;;  %v391_v38 = vld [vmem:[#allocation4 + $0x5c8] sm:$0xff]  ;;  %v306_v3 = vld [vmem:[#allocation4 + $0x320] sm:$0xff] }
  0x80   : > { %492 = vmatprep.subr.mxu0 %v303_v40  ;;  %554 = vmatpush2.msra.mxu1 %v334_v5  ;;  %v385_v40 = vld [vmem:[#allocation4 + $0x598] sm:$0xff] }
  0x81   : > { %493 = vmatpush2.msra.mxu0 %v302_v42  ;;  %555 = vmatprep.subr.mxu1 %v329_v7  ;;  %v378_v42 = vld [vmem:[#allocation4 + $0x560] sm:$0xff] }
  0x82   : > { %495 = vmatmul.mubr.f32.vlgmr.msra.gmra.mxu0 %v1020_v44  ;;  %572 = vmatprep.subr.mxu0 %v301_v45  ;;  %v372_v45 = vld [vmem:[#allocation4 + $0x530] sm:$0xff]  ;;  %v398_v7 = vld [vmem:[%s1050_s2] sm:$0x3f] }
  0x83   : > { %573 = vmatpush1.msra.mxu0 %v300_v46  ;;  %556 = vmatpush2.msra.mxu1 %v328_v9  ;;  %v367_v46 = vld [vmem:[#allocation4 + $0x508] sm:$0xff] }
  0x84   : > { %574 = vmatprep.subr.mxu0 %v295_v48  ;;  %557 = vmatprep.subr.mxu1 %v323_v11  ;;  %v361_v48 = vld [vmem:[#allocation4 + $0x4d8] sm:$0xff] }
  0x85   : > { %575 = vmatpush1.msra.mxu0 %v294_v50  ;;  %558 = vmatpush2.msra.mxu1 %v322_v13  ;;  %v355_v50 = vld [vmem:[#allocation4 + $0x4a8] sm:$0xff] }
  0x86   : > { %576 = vmatprep.subr.mxu0 %v289_v52  ;;  %559 = vmatprep.subr.mxu1 %v317_v15  ;;  %v349_v52 = vld [vmem:[#allocation4 + $0x478] sm:$0xff] }
  0x87   : > { %577 = vmatpush1.msra.mxu0 %v288_v54  ;;  %560 = vmatpush2.msra.mxu1 %v316_v17  ;;  %v343_v54 = vld [vmem:[#allocation4 + $0x448] sm:$0xff] }
  0x88   : > { %578 = vmatprep.subr.mxu0 %v283_v56  ;;  %561 = vmatprep.subr.mxu1 %v311_v19  ;;  %v337_v56 = vld [vmem:[#allocation4 + $0x418] sm:$0xff] }
  0x89   : > { %579 = vmatpush1.msra.mxu0 %v282_v58  ;;  %562 = vmatpush2.msra.mxu1 %v310_v21  ;;  %v331_v58 = vld [vmem:[#allocation4 + $0x3e8] sm:$0xff] }
  0x8a   : > { %580 = vmatprep.subr.mxu0 %v277_v60  ;;  %563 = vmatprep.subr.mxu1 %v305_v23  ;;  %v325_v60 = vld [vmem:[#allocation4 + $0x3b8] sm:$0xff] }
  0x8b   : > { %581 = vmatpush1.msra.mxu0 %v276_v62  ;;  %564 = vmatpush2.msra.mxu1 %v304_v26  ;;  %v319_v62 = vld [vmem:[#allocation4 + $0x388] sm:$0xff] }
  0x8c   : > { %582 = vmatprep.subr.mxu0 %v271_v0  ;;  %565 = vmatprep.mubr.f32.mxu1 %v1015_v25  ;;  %v313_v0 = vld [vmem:[#allocation4 + $0x358] sm:$0xff] }
  0x8d   : > { %583 = vmatpush1.msra.mxu0 %v270_v2  ;;  %566 = vmatmul.mubr.f32.vlgmr.msra.gmra.mxu1 %v1020_v44  ;;  %v307_v2 = vld [vmem:[#allocation4 + $0x328] sm:$0xff] }
  0x8e   : > { %584 = vmatprep.subr.mxu0 %v265_v4  ;;  %636 = vmatprep.mubr.f32.mxu0 %v1015_v25  ;;  %v379_v25 = vld [vmem:[#allocation4 + $0x568] sm:$0xff]  ;;  %v400_v4 = vlaneseq }
  0x8f   : > { %585 = vmatpush1.msra.mxu0 %v264_v6 }
  0x90   : > { %586 = vmatprep.subr.mxu0 %v259_v8  ;;  %v401_v5 = vshrl.u32 %v400_v4, 7 }
  0x91   : > { %587 = vmatpush1.msra.mxu0 %v258_v10 }
  0x92   : > { %588 = vmatprep.subr.mxu0 %v253_v12  ;;  %v402_v6 = vsub.s32 0, %v401_v5  ;;  %v406_v8 = vsub.s32 1, %v401_v5  ;;  %v414_v15 = vsub.s32 3, %v401_v5  ;;  %v422_v23 = vsub.s32 5, %v401_v5 }
  0x93   : > { %589 = vmatpush1.msra.mxu0 %v252_v14  ;;  %v410_v14 = vsub.s32 2, %v401_v5 }
  0x94   : > { %590 = vmatprep.subr.mxu0 %v247_v16  ;;  %v403_v9 = vrot.slane %v398_v7, %v402_v6  ;;  %v407_v10 = vrot.slane %v398_v7, %v406_v8  ;;  %v415_v17 = vrot.slane %v398_v7, %v414_v15  ;;  %v423_v26 = vrot.slane %v398_v7, %v422_v23 }
  0x95   : > { %591 = vmatpush1.msra.mxu0 %v246_v18  ;;  %v411_v16 = vrot.slane %v398_v7, %v410_v14 }
  0x96   : > { %592 = vmatprep.subr.mxu0 %v241_v20 }
  0x97   : > { %593 = vmatpush1.msra.mxu0 %v240_v22  ;;  %v418_v22 = vsub.s32 4, %v401_v5 }
  0x98   : > { %594 = vmatprep.subr.mxu0 %v235_v24 }
  0x99   : > { %595 = vmatpush1.msra.mxu0 %v234_v27  ;;  %v419_v24 = vrot.slane %v398_v7, %v418_v22 }
  0x9a   : > { %596 = vmatprep.subr.mxu0 %v229_v28 }
  0x9b   : > { %597 = vmatpush1.msra.mxu0 %v228_v29 }
  0x9c   : > { %598 = vmatprep.subr.mxu0 %v223_v30 }
  0x9d   : > { %599 = vmatpush1.msra.mxu0 %v222_v31 }
  0x9e   : > { %600 = vmatprep.subr.mxu0 %v217_v32 }
  0x9f   : > { %601 = vmatpush1.msra.mxu0 %v216_v33 }
  0xa0   : > { %602 = vmatprep.subr.mxu0 %v211_v34 }
  0xa1   : > { %603 = vmatpush1.msra.mxu0 %v210_v35 }
  0xa2   : > { %604 = vmatprep.subr.mxu0 %v397_v36 }
  0xa3   : > { %605 = vmatpush2.msra.mxu0 %v396_v37 }
  0xa4   : > { %606 = vmatprep.subr.mxu0 %v391_v38 }
  0xa5   : > { %607 = vmatpush2.msra.mxu0 %v390_v39 }
  0xa6   : > { %608 = vmatprep.subr.mxu0 %v385_v40 }
  0xa7   : > { %609 = vmatpush2.msra.mxu0 %v384_v41 }
  0xa8   : > { %610 = vmatprep.subr.mxu0 %v379_v25 }
  0xa9   : > { %611 = vmatpush2.msra.mxu0 %v378_v42 }
  0xaa   : > { %612 = vmatprep.subr.mxu0 %v373_v43 }
  0xab   : > { %613 = vmatpush2.msra.mxu0 %v372_v45 }
  0xac   : > { %614 = vmatprep.subr.mxu0 %v367_v46 }
  0xad   : > { %615 = vmatpush2.msra.mxu0 %v366_v47 }
  0xae   : > { %616 = vmatprep.subr.mxu0 %v361_v48 }
  0xaf   : > { %617 = vmatpush2.msra.mxu0 %v360_v49 }
  0xb0   : > { %618 = vmatprep.subr.mxu0 %v355_v50 }
  0xb1   : > { %619 = vmatpush2.msra.mxu0 %v354_v51 }
  0xb2   : > { %620 = vmatprep.subr.mxu0 %v349_v52 }
  0xb3   : > { %621 = vmatpush2.msra.mxu0 %v348_v53 }
  0xb4   : > { %622 = vmatprep.subr.mxu0 %v343_v54 }
  0xb5   : > { %623 = vmatpush2.msra.mxu0 %v342_v55 }
  0xb6   : > { %624 = vmatprep.subr.mxu0 %v337_v56 }
  0xb7   : > { %625 = vmatpush2.msra.mxu0 %v336_v57 }
  0xb8   : > { %626 = vmatprep.subr.mxu0 %v331_v58 }
  0xb9   : > { %627 = vmatpush2.msra.mxu0 %v330_v59 }
  0xba   : > { %628 = vmatprep.subr.mxu0 %v325_v60 }
  0xbb   : > { %629 = vmatpush2.msra.mxu0 %v324_v61 }
  0xbc   : > { %630 = vmatprep.subr.mxu0 %v319_v62 }
  0xbd   : > { %631 = vmatpush2.msra.mxu0 %v318_v63 }
  0xbe   : > { %632 = vmatprep.subr.mxu0 %v313_v0 }
  0xbf   : > { %633 = vmatpush2.msra.mxu0 %v312_v1 }
  0xc0   : > { %634 = vmatprep.subr.mxu0 %v307_v2 }
  0xc1   : > { %635 = vmatpush2.msra.mxu0 %v306_v3 }
  0xc2   : > { %637 = vmatmul.mubr.f32.vlgmr.msra.gmra.mxu0 %v1020_v44 }
 0x142   : > { %v496_v11 = vpop.f32.mrf.mxu0 }
 0x143   : > { %v497_v12 = vadd.f32 %v496_v11, %v403_v9 }
 0x144   : > { %v498_v44 = vpop.f32.mrf.mxu0 }
 0x145   : > { %643 = vst [vmem:[%s203_s11] sm:$0xff] %v497_v12  ;;  %v499_v13 = vadd.f32 %v498_v44, %v407_v10 }
 0x147   : > { %644 = vst [vmem:[%s203_s11 + $0x8] sm:$0xff] %v499_v13 }
 0x14d   : > { %v567_v18 = vpop.f32.mrf.mxu1 }
 0x14e   : > { %v568_v19 = vadd.f32 %v567_v18, %v411_v16 }
 0x14f   : > { %v569_v20 = vpop.f32.mrf.mxu1 }
 0x150   : > { %645 = vst [vmem:[%s203_s11 + $0x10] sm:$0xff] %v568_v19  ;;  %v570_v21 = vadd.f32 %v569_v20, %v415_v17 }
 0x152   : > { %646 = vst [vmem:[%s203_s11 + $0x18] sm:$0xff] %v570_v21 }
 0x182   : > { %v638_v27 = vpop.f32.mrf.mxu0 }
 0x183   : > { %v639_v28 = vadd.f32 %v638_v27, %v419_v24 }
 0x184   : > { %v640_v29 = vpop.f32.mrf.mxu0 }
 0x185   : > { %647 = vst [vmem:[%s203_s11 + $0x20] sm:$0xff] %v639_v28  ;;  %v641_v30 = vadd.f32 %v640_v29, %v423_v26 }
 0x187   : > { %648 = vst [vmem:[%s203_s11 + $0x28] sm:$0xff] %v641_v30 }
 0x188 PF: > { %p14_p7 = scmp.ge.s32.totalorder %s955_s22, 4   ;;  %s1063_s12 = smov %s877_s13 }
 0x189   : > { %s1064_s13 = smov %s881_s14  ;;  %s1065_s14 = smov %s972_s30 }
 0x18a   : > { %s1066_s15 = smov %s955_s22  ;;  %16 = sbr.rel (!%p14_p7) target bundleno = 4 (0x4), region = 76 }
 0x18f   :  { %670 = vsyncpa [#allocation3], 1 }
 0x190   :  { %672 = vsyncpa [#allocation3 + $0x1], 1 }
 0x191   :  { %673 = vsyncpa [#allocation5], 1 }

// kernel: _lambda_.12
= control target key start
LH: loop header
LB: loop body
LE: loop exit
PB: predicated region body
PF: predicated region fallthrough
CT: control target
= control target key end

     0   :  { %s604_s12 = smov 0   ;;  %s1020_s0 = inlined_call_operand.vmem [shape: f32[32,256], index: 0, kind: input, shape index: {}]   ;;  %s1021_s1 = inlined_call_operand.vmem [shape: f32[256,512], index: 1, kind: input, shape index: {}]   ;;  %s1022_s2 = inlined_call_operand.vmem [shape: f32[1,512], index: 2, kind: input, shape index: {}]   ;;  %s1023_s3 = inlined_call_operand.vmem [shape: f32[32,512], index: 3, kind: output, shape index: {}]  }
   0x1 LB: > { %s553_s13 = sadd.s32 4294967295, %s582_s12   ;;  %p557_p0 = scmp.ge.s32.totalorder %s582_s12, 1  ;;  %s582_s12 = sphi %s604_s12, %s13_s12  }
   0x2   : > { %p139_p1 = scmp.lt.s32.totalorder %s582_s12, 3 }
   0x4   : > { %p140_p2 = pnand %p557_p0, %p139_p1 }
   0x5   : > { %s896_s27 = sshll.u32 (!%p140_p2), %s553_s13, 1 }
   0x6   : > { %143 = sbr.rel (%p140_p2) target bundleno = 279 (0x117), region = 32  ;;  %p166_p3 = scmp.lt.s32.totalorder (!%p140_p2), %s896_s27, 3 }
   0xb   : > { %v244_v0 = vld [vmem:[%s1021_s1 + $0x1e8] sm:$0xff]  ;;  %v246_v1 = vld [vmem:[%s1021_s1 + $0x1f8] sm:$0xff]  ;;  %v243_v2 = vld [vmem:[%s1021_s1 + $0x1e0] sm:$0xff]  ;;  %s1025_s27 = smov (!%p166_p3, %s896_s27), 3 }
   0xc   : > { %333 = vmatprep.subr.mxu0 %v244_v0  ;;  %410 = vmatprep.subr.mxu1 %v246_v1  ;;  %v245_v3 = vld [vmem:[%s1021_s1 + $0x1f0] sm:$0xff]  ;;  %v240_v4 = vld [vmem:[%s1021_s1 + $0x1c8] sm:$0xff]  ;;  %v242_v5 = vld [vmem:[%s1021_s1 + $0x1d8] sm:$0xff]  ;;  %s566_s21 = sshll.u32 %s1025_s27, 4  ;;  %s567_s26 = sshll.u32 %s1025_s27, 5 }
   0xd   : > { %334 = vmatpush1.msra.mxu0 %v243_v2  ;;  %411 = vmatpush1.msra.mxu1 %v245_v3  ;;  %v239_v6 = vld [vmem:[%s1021_s1 + $0x1c0] sm:$0xff]  ;;  %v241_v7 = vld [vmem:[%s1021_s1 + $0x1d0] sm:$0xff]  ;;  %v236_v8 = vld [vmem:[%s1021_s1 + $0x1a8] sm:$0xff]  ;;  %s170_s9 = scalar_lea.vmem %s1020_s0, %s566_s21  ;;  %s177_s30 = scalar_lea.vmem %s1023_s3, %s567_s26 }
   0xe   : > { %335 = vmatprep.subr.mxu0 %v240_v4  ;;  %412 = vmatprep.subr.mxu1 %v242_v5  ;;  %v238_v9 = vld [vmem:[%s1021_s1 + $0x1b8] sm:$0xff]  ;;  %v235_v10 = vld [vmem:[%s1021_s1 + $0x1a0] sm:$0xff]  ;;  %v237_v11 = vld [vmem:[%s1021_s1 + $0x1b0] sm:$0xff] }
   0xf   : > { %336 = vmatpush1.msra.mxu0 %v239_v6  ;;  %413 = vmatpush1.msra.mxu1 %v241_v7  ;;  %v232_v12 = vld [vmem:[%s1021_s1 + $0x188] sm:$0xff]  ;;  %v234_v13 = vld [vmem:[%s1021_s1 + $0x198] sm:$0xff]  ;;  %v231_v14 = vld [vmem:[%s1021_s1 + $0x180] sm:$0xff] }
  0x10   : > { %337 = vmatprep.subr.mxu0 %v236_v8  ;;  %414 = vmatprep.subr.mxu1 %v238_v9  ;;  %v233_v15 = vld [vmem:[%s1021_s1 + $0x190] sm:$0xff]  ;;  %v228_v16 = vld [vmem:[%s1021_s1 + $0x168] sm:$0xff]  ;;  %v230_v17 = vld [vmem:[%s1021_s1 + $0x178] sm:$0xff] }
  0x11   : > { %338 = vmatpush1.msra.mxu0 %v235_v10  ;;  %415 = vmatpush1.msra.mxu1 %v237_v11  ;;  %v227_v18 = vld [vmem:[%s1021_s1 + $0x160] sm:$0xff]  ;;  %v229_v19 = vld [vmem:[%s1021_s1 + $0x170] sm:$0xff]  ;;  %v224_v20 = vld [vmem:[%s1021_s1 + $0x148] sm:$0xff] }
  0x12   : > { %339 = vmatprep.subr.mxu0 %v232_v12  ;;  %416 = vmatprep.subr.mxu1 %v234_v13  ;;  %v226_v21 = vld [vmem:[%s1021_s1 + $0x158] sm:$0xff]  ;;  %v223_v22 = vld [vmem:[%s1021_s1 + $0x140] sm:$0xff]  ;;  %v225_v23 = vld [vmem:[%s1021_s1 + $0x150] sm:$0xff] }
  0x13   : > { %340 = vmatpush1.msra.mxu0 %v231_v14  ;;  %417 = vmatpush1.msra.mxu1 %v233_v15  ;;  %v220_v24 = vld [vmem:[%s1021_s1 + $0x128] sm:$0xff]  ;;  %v222_v25 = vld [vmem:[%s1021_s1 + $0x138] sm:$0xff]  ;;  %v219_v26 = vld [vmem:[%s1021_s1 + $0x120] sm:$0xff] }
  0x14   : > { %341 = vmatprep.subr.mxu0 %v228_v16  ;;  %418 = vmatprep.subr.mxu1 %v230_v17  ;;  %v221_v27 = vld [vmem:[%s1021_s1 + $0x130] sm:$0xff]  ;;  %v216_v28 = vld [vmem:[%s1021_s1 + $0x108] sm:$0xff]  ;;  %v218_v29 = vld [vmem:[%s1021_s1 + $0x118] sm:$0xff] }
  0x15   : > { %342 = vmatpush1.msra.mxu0 %v227_v18  ;;  %419 = vmatpush1.msra.mxu1 %v229_v19  ;;  %v215_v30 = vld [vmem:[%s1021_s1 + $0x100] sm:$0xff]  ;;  %v217_v31 = vld [vmem:[%s1021_s1 + $0x110] sm:$0xff]  ;;  %v212_v32 = vld [vmem:[%s1021_s1 + $0xe8] sm:$0xff] }
  0x16   : > { %343 = vmatprep.subr.mxu0 %v224_v20  ;;  %420 = vmatprep.subr.mxu1 %v226_v21  ;;  %v214_v33 = vld [vmem:[%s1021_s1 + $0xf8] sm:$0xff]  ;;  %v211_v34 = vld [vmem:[%s1021_s1 + $0xe0] sm:$0xff]  ;;  %v213_v35 = vld [vmem:[%s1021_s1 + $0xf0] sm:$0xff] }
  0x17   : > { %344 = vmatpush1.msra.mxu0 %v223_v22  ;;  %421 = vmatpush1.msra.mxu1 %v225_v23  ;;  %v208_v36 = vld [vmem:[%s1021_s1 + $0xc8] sm:$0xff]  ;;  %v210_v37 = vld [vmem:[%s1021_s1 + $0xd8] sm:$0xff]  ;;  %v207_v38 = vld [vmem:[%s1021_s1 + $0xc0] sm:$0xff] }
  0x18   : > { %345 = vmatprep.subr.mxu0 %v220_v24  ;;  %422 = vmatprep.subr.mxu1 %v222_v25  ;;  %v209_v39 = vld [vmem:[%s1021_s1 + $0xd0] sm:$0xff]  ;;  %v204_v40 = vld [vmem:[%s1021_s1 + $0xa8] sm:$0xff]  ;;  %v206_v41 = vld [vmem:[%s1021_s1 + $0xb8] sm:$0xff] }
  0x19   : > { %346 = vmatpush1.msra.mxu0 %v219_v26  ;;  %423 = vmatpush1.msra.mxu1 %v221_v27  ;;  %v203_v42 = vld [vmem:[%s1021_s1 + $0xa0] sm:$0xff]  ;;  %v205_v43 = vld [vmem:[%s1021_s1 + $0xb0] sm:$0xff]  ;;  %v200_v44 = vld [vmem:[%s1021_s1 + $0x88] sm:$0xff] }
  0x1a   : > { %347 = vmatprep.subr.mxu0 %v216_v28  ;;  %424 = vmatprep.subr.mxu1 %v218_v29  ;;  %v202_v45 = vld [vmem:[%s1021_s1 + $0x98] sm:$0xff]  ;;  %v199_v46 = vld [vmem:[%s1021_s1 + $0x80] sm:$0xff]  ;;  %v201_v47 = vld [vmem:[%s1021_s1 + $0x90] sm:$0xff] }
  0x1b   : > { %348 = vmatpush1.msra.mxu0 %v215_v30  ;;  %425 = vmatpush1.msra.mxu1 %v217_v31  ;;  %v196_v48 = vld [vmem:[%s1021_s1 + $0x68] sm:$0xff]  ;;  %v198_v49 = vld [vmem:[%s1021_s1 + $0x78] sm:$0xff]  ;;  %v195_v50 = vld [vmem:[%s1021_s1 + $0x60] sm:$0xff] }
  0x1c   : > { %349 = vmatprep.subr.mxu0 %v212_v32  ;;  %426 = vmatprep.subr.mxu1 %v214_v33  ;;  %v197_v51 = vld [vmem:[%s1021_s1 + $0x70] sm:$0xff]  ;;  %v192_v52 = vld [vmem:[%s1021_s1 + $0x48] sm:$0xff]  ;;  %v194_v53 = vld [vmem:[%s1021_s1 + $0x58] sm:$0xff] }
  0x1d   : > { %350 = vmatpush1.msra.mxu0 %v211_v34  ;;  %427 = vmatpush1.msra.mxu1 %v213_v35  ;;  %v191_v54 = vld [vmem:[%s1021_s1 + $0x40] sm:$0xff]  ;;  %v193_v55 = vld [vmem:[%s1021_s1 + $0x50] sm:$0xff]  ;;  %v188_v56 = vld [vmem:[%s1021_s1 + $0x28] sm:$0xff] }
  0x1e   : > { %351 = vmatprep.subr.mxu0 %v208_v36  ;;  %428 = vmatprep.subr.mxu1 %v210_v37  ;;  %v190_v57 = vld [vmem:[%s1021_s1 + $0x38] sm:$0xff]  ;;  %v187_v58 = vld [vmem:[%s1021_s1 + $0x20] sm:$0xff]  ;;  %v189_v59 = vld [vmem:[%s1021_s1 + $0x30] sm:$0xff] }
  0x1f   : > { %352 = vmatpush1.msra.mxu0 %v207_v38  ;;  %429 = vmatpush1.msra.mxu1 %v209_v39  ;;  %v184_v60 = vld [vmem:[%s1021_s1 + $0x8] sm:$0xff]  ;;  %v186_v61 = vld [vmem:[%s1021_s1 + $0x18] sm:$0xff]  ;;  %v183_v62 = vld [vmem:[%s1021_s1] sm:$0xff] }
  0x20   : > { %353 = vmatprep.subr.mxu0 %v204_v40  ;;  %430 = vmatprep.subr.mxu1 %v206_v41  ;;  %v185_v63 = vld [vmem:[%s1021_s1 + $0x10] sm:$0xff]  ;;  %v308_v0 = vld [vmem:[%s1021_s1 + $0x3e8] sm:$0xff]  ;;  %v310_v1 = vld [vmem:[%s1021_s1 + $0x3f8] sm:$0xff] }
  0x21   : > { %354 = vmatpush1.msra.mxu0 %v203_v42  ;;  %431 = vmatpush1.msra.mxu1 %v205_v43  ;;  %v307_v2 = vld [vmem:[%s1021_s1 + $0x3e0] sm:$0xff]  ;;  %v309_v3 = vld [vmem:[%s1021_s1 + $0x3f0] sm:$0xff]  ;;  %v304_v4 = vld [vmem:[%s1021_s1 + $0x3c8] sm:$0xff] }
  0x22   : > { %355 = vmatprep.subr.mxu0 %v200_v44  ;;  %432 = vmatprep.subr.mxu1 %v202_v45  ;;  %v306_v5 = vld [vmem:[%s1021_s1 + $0x3d8] sm:$0xff]  ;;  %v303_v6 = vld [vmem:[%s1021_s1 + $0x3c0] sm:$0xff]  ;;  %v305_v7 = vld [vmem:[%s1021_s1 + $0x3d0] sm:$0xff] }
  0x23   : > { %356 = vmatpush1.msra.mxu0 %v199_v46  ;;  %433 = vmatpush1.msra.mxu1 %v201_v47  ;;  %v300_v8 = vld [vmem:[%s1021_s1 + $0x3a8] sm:$0xff]  ;;  %v302_v9 = vld [vmem:[%s1021_s1 + $0x3b8] sm:$0xff]  ;;  %v299_v10 = vld [vmem:[%s1021_s1 + $0x3a0] sm:$0xff] }
  0x24   : > { %357 = vmatprep.subr.mxu0 %v196_v48  ;;  %434 = vmatprep.subr.mxu1 %v198_v49  ;;  %v301_v11 = vld [vmem:[%s1021_s1 + $0x3b0] sm:$0xff]  ;;  %v296_v12 = vld [vmem:[%s1021_s1 + $0x388] sm:$0xff]  ;;  %v298_v13 = vld [vmem:[%s1021_s1 + $0x398] sm:$0xff] }
  0x25   : > { %358 = vmatpush1.msra.mxu0 %v195_v50  ;;  %435 = vmatpush1.msra.mxu1 %v197_v51  ;;  %v295_v14 = vld [vmem:[%s1021_s1 + $0x380] sm:$0xff]  ;;  %v297_v15 = vld [vmem:[%s1021_s1 + $0x390] sm:$0xff]  ;;  %v292_v16 = vld [vmem:[%s1021_s1 + $0x368] sm:$0xff] }
  0x26   : > { %359 = vmatprep.subr.mxu0 %v192_v52  ;;  %436 = vmatprep.subr.mxu1 %v194_v53  ;;  %v294_v17 = vld [vmem:[%s1021_s1 + $0x378] sm:$0xff]  ;;  %v291_v18 = vld [vmem:[%s1021_s1 + $0x360] sm:$0xff]  ;;  %v293_v19 = vld [vmem:[%s1021_s1 + $0x370] sm:$0xff] }
  0x27   : > { %360 = vmatpush1.msra.mxu0 %v191_v54  ;;  %437 = vmatpush1.msra.mxu1 %v193_v55  ;;  %v288_v20 = vld [vmem:[%s1021_s1 + $0x348] sm:$0xff]  ;;  %v290_v21 = vld [vmem:[%s1021_s1 + $0x358] sm:$0xff]  ;;  %v287_v22 = vld [vmem:[%s1021_s1 + $0x340] sm:$0xff] }
  0x28   : > { %361 = vmatprep.subr.mxu0 %v188_v56  ;;  %438 = vmatprep.subr.mxu1 %v190_v57  ;;  %v289_v23 = vld [vmem:[%s1021_s1 + $0x350] sm:$0xff]  ;;  %v284_v24 = vld [vmem:[%s1021_s1 + $0x328] sm:$0xff]  ;;  %v286_v25 = vld [vmem:[%s1021_s1 + $0x338] sm:$0xff] }
  0x29   : > { %362 = vmatpush1.msra.mxu0 %v187_v58  ;;  %439 = vmatpush1.msra.mxu1 %v189_v59  ;;  %v283_v26 = vld [vmem:[%s1021_s1 + $0x320] sm:$0xff]  ;;  %v285_v27 = vld [vmem:[%s1021_s1 + $0x330] sm:$0xff]  ;;  %v280_v28 = vld [vmem:[%s1021_s1 + $0x308] sm:$0xff] }
  0x2a   : > { %363 = vmatprep.subr.mxu0 %v184_v60  ;;  %440 = vmatprep.subr.mxu1 %v186_v61  ;;  %v282_v29 = vld [vmem:[%s1021_s1 + $0x318] sm:$0xff]  ;;  %v279_v30 = vld [vmem:[%s1021_s1 + $0x300] sm:$0xff]  ;;  %v281_v31 = vld [vmem:[%s1021_s1 + $0x310] sm:$0xff] }
  0x2b   : > { %364 = vmatpush1.msra.mxu0 %v183_v62  ;;  %441 = vmatpush1.msra.mxu1 %v185_v63  ;;  %v276_v32 = vld [vmem:[%s1021_s1 + $0x2e8] sm:$0xff]  ;;  %v278_v33 = vld [vmem:[%s1021_s1 + $0x2f8] sm:$0xff]  ;;  %v275_v34 = vld [vmem:[%s1021_s1 + $0x2e0] sm:$0xff] }
  0x2c   : > { %365 = vmatprep.subr.mxu0 %v308_v0  ;;  %442 = vmatprep.subr.mxu1 %v310_v1  ;;  %v277_v35 = vld [vmem:[%s1021_s1 + $0x2f0] sm:$0xff]  ;;  %v272_v36 = vld [vmem:[%s1021_s1 + $0x2c8] sm:$0xff]  ;;  %v274_v37 = vld [vmem:[%s1021_s1 + $0x2d8] sm:$0xff] }
  0x2d   : > { %366 = vmatpush2.msra.mxu0 %v307_v2  ;;  %443 = vmatpush2.msra.mxu1 %v309_v3  ;;  %v271_v38 = vld [vmem:[%s1021_s1 + $0x2c0] sm:$0xff]  ;;  %v273_v39 = vld [vmem:[%s1021_s1 + $0x2d0] sm:$0xff]  ;;  %v268_v40 = vld [vmem:[%s1021_s1 + $0x2a8] sm:$0xff] }
  0x2e   : > { %367 = vmatprep.subr.mxu0 %v304_v4  ;;  %444 = vmatprep.subr.mxu1 %v306_v5  ;;  %v270_v41 = vld [vmem:[%s1021_s1 + $0x2b8] sm:$0xff]  ;;  %v267_v42 = vld [vmem:[%s1021_s1 + $0x2a0] sm:$0xff]  ;;  %v269_v43 = vld [vmem:[%s1021_s1 + $0x2b0] sm:$0xff]  ;;  %v313_v4 = vlaneseq }
  0x2f   : > { %368 = vmatpush2.msra.mxu0 %v303_v6  ;;  %445 = vmatpush2.msra.mxu1 %v305_v7  ;;  %v264_v44 = vld [vmem:[%s1021_s1 + $0x288] sm:$0xff]  ;;  %v266_v45 = vld [vmem:[%s1021_s1 + $0x298] sm:$0xff]  ;;  %v263_v46 = vld [vmem:[%s1021_s1 + $0x280] sm:$0xff] }
  0x30   : > { %369 = vmatprep.subr.mxu0 %v300_v8  ;;  %446 = vmatprep.subr.mxu1 %v302_v9  ;;  %v265_v47 = vld [vmem:[%s1021_s1 + $0x290] sm:$0xff]  ;;  %v260_v48 = vld [vmem:[%s1021_s1 + $0x268] sm:$0xff]  ;;  %v262_v49 = vld [vmem:[%s1021_s1 + $0x278] sm:$0xff]  ;;  %v314_v5 = vshrl.u32 %v313_v4, 7 }
  0x31   : > { %370 = vmatpush2.msra.mxu0 %v299_v10  ;;  %447 = vmatpush2.msra.mxu1 %v301_v11  ;;  %v259_v50 = vld [vmem:[%s1021_s1 + $0x260] sm:$0xff]  ;;  %v261_v51 = vld [vmem:[%s1021_s1 + $0x270] sm:$0xff]  ;;  %v256_v52 = vld [vmem:[%s1021_s1 + $0x248] sm:$0xff] }
  0x32   : > { %371 = vmatprep.subr.mxu0 %v296_v12  ;;  %448 = vmatprep.subr.mxu1 %v298_v13  ;;  %v258_v53 = vld [vmem:[%s1021_s1 + $0x258] sm:$0xff]  ;;  %v255_v54 = vld [vmem:[%s1021_s1 + $0x240] sm:$0xff]  ;;  %v257_v55 = vld [vmem:[%s1021_s1 + $0x250] sm:$0xff]  ;;  %v315_v6 = vsub.s32 0, %v314_v5  ;;  %v323_v7 = vsub.s32 2, %v314_v5  ;;  %v319_v9 = vsub.s32 1, %v314_v5 }
  0x33   : > { %372 = vmatpush2.msra.mxu0 %v295_v14  ;;  %449 = vmatpush2.msra.mxu1 %v297_v15  ;;  %v252_v56 = vld [vmem:[%s1021_s1 + $0x228] sm:$0xff]  ;;  %v254_v57 = vld [vmem:[%s1021_s1 + $0x238] sm:$0xff]  ;;  %v251_v58 = vld [vmem:[%s1021_s1 + $0x220] sm:$0xff]  ;;  %v327_v10 = vsub.s32 3, %v314_v5 }
  0x34   : > { %373 = vmatprep.subr.mxu0 %v292_v16  ;;  %450 = vmatprep.subr.mxu1 %v294_v17  ;;  %v253_v59 = vld [vmem:[%s1021_s1 + $0x230] sm:$0xff]  ;;  %v248_v60 = vld [vmem:[%s1021_s1 + $0x208] sm:$0xff]  ;;  %v250_v61 = vld [vmem:[%s1021_s1 + $0x218] sm:$0xff] }
  0x35   : > { %374 = vmatpush2.msra.mxu0 %v291_v18  ;;  %451 = vmatpush2.msra.mxu1 %v293_v19  ;;  %v247_v62 = vld [vmem:[%s1021_s1 + $0x200] sm:$0xff]  ;;  %v180_v63 = vld [vmem:[%s170_s9 + $0x8] sm:$0xff]  ;;  %v249_v0 = vld [vmem:[%s1021_s1 + $0x210] sm:$0xff] }
  0x36   : > { %375 = vmatprep.subr.mxu0 %v288_v20  ;;  %452 = vmatprep.subr.mxu1 %v290_v21  ;;  %v179_v1 = vld [vmem:[%s170_s9] sm:$0xff]  ;;  %v182_v2 = vld [vmem:[%s170_s9 + $0x18] sm:$0xff]  ;;  %v181_v3 = vld [vmem:[%s170_s9 + $0x10] sm:$0xff] }
  0x37   : > { %376 = vmatpush2.msra.mxu0 %v287_v22  ;;  %453 = vmatpush2.msra.mxu1 %v289_v23  ;;  %v311_v8 = vld [vmem:[%s1022_s2] sm:$0xf] }
  0x38   : > { %377 = vmatprep.subr.mxu0 %v284_v24  ;;  %454 = vmatprep.subr.mxu1 %v286_v25  ;;  %v316_v11 = vrot.slane %v311_v8, %v315_v6  ;;  %v324_v12 = vrot.slane %v311_v8, %v323_v7  ;;  %v320_v13 = vrot.slane %v311_v8, %v319_v9 }
  0x39   : > { %378 = vmatpush2.msra.mxu0 %v283_v26  ;;  %455 = vmatpush2.msra.mxu1 %v285_v27  ;;  %v328_v14 = vrot.slane %v311_v8, %v327_v10 }
  0x3a   : > { %379 = vmatprep.subr.mxu0 %v280_v28  ;;  %456 = vmatprep.subr.mxu1 %v282_v29 }
  0x3b   : > { %380 = vmatpush2.msra.mxu0 %v279_v30  ;;  %457 = vmatpush2.msra.mxu1 %v281_v31 }
  0x3c   : > { %381 = vmatprep.subr.mxu0 %v276_v32  ;;  %458 = vmatprep.subr.mxu1 %v278_v33 }
  0x3d   : > { %382 = vmatpush2.msra.mxu0 %v275_v34  ;;  %459 = vmatpush2.msra.mxu1 %v277_v35 }
  0x3e   : > { %383 = vmatprep.subr.mxu0 %v272_v36  ;;  %460 = vmatprep.subr.mxu1 %v274_v37 }
  0x3f   : > { %384 = vmatpush2.msra.mxu0 %v271_v38  ;;  %461 = vmatpush2.msra.mxu1 %v273_v39 }
  0x40   : > { %385 = vmatprep.subr.mxu0 %v268_v40  ;;  %462 = vmatprep.subr.mxu1 %v270_v41 }
  0x41   : > { %386 = vmatpush2.msra.mxu0 %v267_v42  ;;  %463 = vmatpush2.msra.mxu1 %v269_v43 }
  0x42   : > { %387 = vmatprep.subr.mxu0 %v264_v44  ;;  %464 = vmatprep.subr.mxu1 %v266_v45 }
  0x43   : > { %388 = vmatpush2.msra.mxu0 %v263_v46  ;;  %465 = vmatpush2.msra.mxu1 %v265_v47 }
  0x44   : > { %389 = vmatprep.subr.mxu0 %v260_v48  ;;  %466 = vmatprep.subr.mxu1 %v262_v49 }
  0x45   : > { %390 = vmatpush2.msra.mxu0 %v259_v50  ;;  %467 = vmatpush2.msra.mxu1 %v261_v51 }
  0x46   : > { %391 = vmatprep.subr.mxu0 %v256_v52  ;;  %468 = vmatprep.subr.mxu1 %v258_v53 }
  0x47   : > { %392 = vmatpush2.msra.mxu0 %v255_v54  ;;  %469 = vmatpush2.msra.mxu1 %v257_v55 }
  0x48   : > { %393 = vmatprep.subr.mxu0 %v252_v56  ;;  %470 = vmatprep.subr.mxu1 %v254_v57 }
  0x49   : > { %394 = vmatpush2.msra.mxu0 %v251_v58  ;;  %471 = vmatpush2.msra.mxu1 %v253_v59 }
  0x4a   : > { %395 = vmatprep.subr.mxu0 %v248_v60  ;;  %472 = vmatprep.subr.mxu1 %v250_v61 }
  0x4b   : > { %396 = vmatpush2.msra.mxu0 %v247_v62  ;;  %397 = vmatprep.mubr.f32.mxu0 %v180_v63 }
  0x4c   : > { %473 = vmatpush2.msra.mxu1 %v249_v0  ;;  %474 = vmatprep.mubr.f32.mxu1 %v180_v63 }
  0x4d   : > { %398 = vmatmul.mubr.f32.vlgmr.msra.gmra.mxu0 %v179_v1  ;;  %475 = vmatmul.mubr.f32.vlgmr.msra.gmra.mxu1 %v179_v1 }
  0x4e   : > { %403 = vmatprep.mubr.f32.mxu0 %v182_v2  ;;  %480 = vmatprep.mubr.f32.mxu1 %v182_v2 }
  0x51   : > { %404 = vmatmul.mubr.f32.gmra.mxu0 %v181_v3  ;;  %481 = vmatmul.mubr.f32.gmra.mxu1 %v181_v3 }
 0x10d   : > { %v399_v15 = vpop.f32.mrf.mxu0  ;;  %v476_v16 = vpop.f32.mrf.mxu1 }
 0x10e   : > { %v400_v17 = vadd.f32 %v399_v15, %v316_v11  ;;  %v477_v18 = vadd.f32 %v476_v16, %v324_v12 }
 0x10f   : > { %v401_v19 = vpop.f32.mrf.mxu0  ;;  %v478_v20 = vpop.f32.mrf.mxu1 }
 0x110   : > { %487 = vst [vmem:[%s177_s30] sm:$0xff] %v400_v17  ;;  %489 = vst [vmem:[%s177_s30 + $0x10] sm:$0xff] %v477_v18  ;;  %v402_v21 = vadd.f32 %v401_v19, %v320_v13  ;;  %v479_v22 = vadd.f32 %v478_v20, %v328_v14 }
 0x111   : > { %v405_v23 = vpop.f32.mrf.mxu0  ;;  %v482_v24 = vpop.f32.mrf.mxu1 }
 0x112   : > { %488 = vst [vmem:[%s177_s30 + $0x8] sm:$0xff] %v402_v21  ;;  %490 = vst [vmem:[%s177_s30 + $0x18] sm:$0xff] %v479_v22  ;;  %v406_v25 = vadd.f32 %v405_v23, %v316_v11  ;;  %v483_v26 = vadd.f32 %v482_v24, %v324_v12 }
 0x113   : > { %v407_v27 = vpop.f32.mrf.mxu0  ;;  %v484_v28 = vpop.f32.mrf.mxu1 }
 0x114   : > { %491 = vst [vmem:[%s177_s30 + $0x20] sm:$0xff] %v406_v25  ;;  %493 = vst [vmem:[%s177_s30 + $0x30] sm:$0xff] %v483_v26  ;;  %v408_v29 = vadd.f32 %v407_v27, %v320_v13  ;;  %v485_v30 = vadd.f32 %v484_v28, %v328_v14 }
 0x116   : > { %492 = vst [vmem:[%s177_s30 + $0x28] sm:$0xff] %v408_v29  ;;  %494 = vst [vmem:[%s177_s30 + $0x38] sm:$0xff] %v485_v30 }
 0x117 PF: > { %s13_s12 = sadd.s32 1, %s582_s12  }
 0x118   : > { %p10_p4 = scmp.ge.s32.totalorder %s13_s12, 4  }
 0x11a   :  { %12 = sbr.rel (!%p10_p4) target bundleno = 1 (0x1), region = 62 }

// kernel: _lambda_.14
= control target key start
LH: loop header
LB: loop body
LE: loop exit
PB: predicated region body
PF: predicated region fallthrough
CT: control target
= control target key end

     0   :  { %11 = vsyncpa [#allocation3], 0  ;;  %s685_s21 = smov 0   ;;  %s745_s0 = inlined_call_operand.vmem [shape: f32[16,256], index: 0, kind: input, shape index: {}]   ;;  %s746_s1 = inlined_call_operand.vmem [shape: f32[16,256], index: 1, kind: input, shape index: {}]   ;;  %s747_s2 = inlined_call_operand.hbm [shape: f32[256,256], index: 2, kind: input, shape index: {}]   ;;  %s748_s3 = inlined_call_operand.vmem [shape: f32[1,256], index: 3, kind: input, shape index: {}]   ;;  %s749_s4 = inlined_call_operand.vmem [shape: f32[1,256], index: 4, kind: input, shape index: {}]   ;;  %s750_s5 = inlined_call_operand.vmem [shape: f32[1,256], index: 5, kind: input, shape index: {}]   ;;  %s751_s6 = inlined_call_operand.vmem [shape: f32[16,256], index: 6, kind: output, shape index: {}]  }
   0x1 LB: > { %s691_s22 = sadd.s32 4294967295, %s645_s21   ;;  %p570_p0 = scmp.ge.s32.totalorder %s645_s21, 1  ;;  %s645_s21 = sphi %s685_s21, %s17_s21  }
   0x2   : > { %p184_p1 = scmp.lt.s32.totalorder %s645_s21, 3  ;;  %s647_s23 = smov [#allocation2]  }
   0x3   : > { %s196_s24 = sshll.u32 %s647_s23, 4  ;;  %p594_p3 = scmp.eq.s32.totalorder %s691_s22, 0  ;;  %s197_s24 = int_to_ptr.vmem [resolvable:$true] %s196_s24 }
   0x4   : > { %p695_p2 = pnand %p570_p0, %p184_p1  ;;  %s620_s26 = scalar_lea.vmem %s197_s24, 8192 }
   0x5   : > { %p621_p7 = scmp.ne.s32.totalorder %s197_s24, %s620_s26  ;;  %p628_p10 = scmp.lt.s32.totalorder %s197_s24, %s197_s24 }
   0x6   : > { %p590_p4 = pneg %p695_p2  ;;  %p629_p11 = scmp.lt.s32.totalorder %s620_s26, %s620_s26 }
   0x8   : > { %p591_p5 = pnand %p594_p3, %p590_p4  ;;  %p630_p12 = por %p629_p11, %p628_p10 }
   0xa   : > { %p611_p6 = pneg %p591_p5 }
   0xc   : > { %p623_p8 = pnand %p621_p7, %p611_p6 }
   0xe   : > { %p624_p9 = pneg %p623_p8 }
  0x10   : > { %p631_p13 = pnand %p630_p12, %p624_p9 }
  0x12   : > { %634 = shalt.err (!%p631_p13)
}
  0x13   : > { %s648_s27 = smov 256   ;;  %s649_s28 = smov 16  }
  0x14   : > { %593 = dma.hbm_to_vmem [thread:$0]  (!%p591_p5), %s747_s2, 8192, %s197_s24, [#allocation3], %s648_s27, %s648_s27, %s649_s28  }
  0x15   : > { %237 = sbr.rel (%p695_p2) target bundleno = 602 (0x25a), region = 44 }
  0x1a   : > { %640 = dma.done.wait (%p594_p3), [#allocation3], 8192  }
  0x1b   : > { %642 = vsyncadd (%p594_p3), [#allocation3], 4294959104  ;;  %v320_v0 = vld [vmem:[#allocation2 + $0xf8] sm:$0xff]  ;;  %v319_v1 = vld [vmem:[#allocation2 + $0xf0] sm:$0xff]  ;;  %p272_p0 = scmp.lt.s32.totalorder %s691_s22, 1 }
  0x1c   : > { %v318_v2 = vld [vmem:[#allocation2 + $0xe8] sm:$0xff]  ;;  %353 = vmatprep.subr.mxu0 %v320_v0  ;;  %v317_v3 = vld [vmem:[#allocation2 + $0xe0] sm:$0xff]  ;;  %v316_v4 = vld [vmem:[#allocation2 + $0xd8] sm:$0xff] }
  0x1d   : > { %354 = vmatpush1.msra.mxu0 %v319_v1  ;;  %v315_v5 = vld [vmem:[#allocation2 + $0xd0] sm:$0xff]  ;;  %v314_v6 = vld [vmem:[#allocation2 + $0xc8] sm:$0xff]  ;;  %v313_v7 = vld [vmem:[#allocation2 + $0xc0] sm:$0xff]  ;;  %s754_s22 = smov (!%p272_p0, %s691_s22), 1 }
  0x1e   : > { %355 = vmatprep.subr.mxu0 %v318_v2  ;;  %v312_v8 = vld [vmem:[#allocation2 + $0xb8] sm:$0xff]  ;;  %v311_v9 = vld [vmem:[#allocation2 + $0xb0] sm:$0xff]  ;;  %v310_v10 = vld [vmem:[#allocation2 + $0xa8] sm:$0xff]  ;;  %s715_s7 = sshll.u32 %s754_s22, 4  ;;  %v430_v2 = vlaneseq }
  0x1f   : > { %356 = vmatpush1.msra.mxu0 %v317_v3  ;;  %v309_v11 = vld [vmem:[#allocation2 + $0xa0] sm:$0xff]  ;;  %v308_v12 = vld [vmem:[#allocation2 + $0x98] sm:$0xff]  ;;  %v307_v13 = vld [vmem:[#allocation2 + $0x90] sm:$0xff]  ;;  %s721_s10 = scalar_lea.vmem %s745_s0, %s715_s7  ;;  %s281_s13 = scalar_lea.vmem %s746_s1, %s715_s7 }
  0x20   : > { %357 = vmatprep.subr.mxu0 %v316_v4  ;;  %v306_v14 = vld [vmem:[#allocation2 + $0x88] sm:$0xff]  ;;  %v305_v15 = vld [vmem:[#allocation2 + $0x80] sm:$0xff]  ;;  %v304_v16 = vld [vmem:[#allocation2 + $0x78] sm:$0xff]  ;;  %v431_v3 = vshrl.u32 %v430_v2, 7  ;;  %s286_s23 = scalar_lea.vmem %s751_s6, %s715_s7 }
  0x21   : > { %358 = vmatpush1.msra.mxu0 %v315_v5  ;;  %v303_v17 = vld [vmem:[#allocation2 + $0x70] sm:$0xff]  ;;  %v302_v18 = vld [vmem:[#allocation2 + $0x68] sm:$0xff]  ;;  %v301_v19 = vld [vmem:[#allocation2 + $0x60] sm:$0xff] }
  0x22   : > { %359 = vmatprep.subr.mxu0 %v314_v6  ;;  %v300_v20 = vld [vmem:[#allocation2 + $0x58] sm:$0xff]  ;;  %v299_v21 = vld [vmem:[#allocation2 + $0x50] sm:$0xff]  ;;  %v298_v22 = vld [vmem:[#allocation2 + $0x48] sm:$0xff]  ;;  %v432_v4 = vsub.s32 0, %v431_v3  ;;  %v436_v5 = vsub.s32 1, %v431_v3 }
  0x23   : > { %360 = vmatpush1.msra.mxu0 %v313_v7  ;;  %v297_v23 = vld [vmem:[#allocation2 + $0x40] sm:$0xff]  ;;  %v288_v24 = vld [vmem:[%s721_s10 + $0x8] sm:$0xff]  ;;  %v296_v25 = vld [vmem:[#allocation2 + $0x38] sm:$0xff] }
  0x24   : > { %361 = vmatprep.subr.mxu0 %v312_v8  ;;  %417 = vmatprep.mubr.f32.mxu0 %v288_v24  ;;  %v295_v26 = vld [vmem:[#allocation2 + $0x30] sm:$0xff]  ;;  %v294_v27 = vld [vmem:[#allocation2 + $0x28] sm:$0xff]  ;;  %v293_v28 = vld [vmem:[#allocation2 + $0x20] sm:$0xff] }
  0x25   : > { %362 = vmatpush1.msra.mxu0 %v311_v9  ;;  %v292_v29 = vld [vmem:[#allocation2 + $0x18] sm:$0xff]  ;;  %v291_v30 = vld [vmem:[#allocation2 + $0x10] sm:$0xff]  ;;  %v290_v31 = vld [vmem:[#allocation2 + $0x8] sm:$0xff] }
  0x26   : > { %363 = vmatprep.subr.mxu0 %v310_v10  ;;  %v289_v32 = vld [vmem:[#allocation2] sm:$0xff]  ;;  %v352_v33 = vld [vmem:[#allocation2 + $0x1f8] sm:$0xff]  ;;  %v351_v34 = vld [vmem:[#allocation2 + $0x1f0] sm:$0xff] }
  0x27   : > { %364 = vmatpush1.msra.mxu0 %v309_v11  ;;  %v350_v35 = vld [vmem:[#allocation2 + $0x1e8] sm:$0xff]  ;;  %v349_v36 = vld [vmem:[#allocation2 + $0x1e0] sm:$0xff]  ;;  %v348_v37 = vld [vmem:[#allocation2 + $0x1d8] sm:$0xff] }
  0x28   : > { %365 = vmatprep.subr.mxu0 %v308_v12  ;;  %v347_v38 = vld [vmem:[#allocation2 + $0x1d0] sm:$0xff]  ;;  %v346_v39 = vld [vmem:[#allocation2 + $0x1c8] sm:$0xff]  ;;  %v345_v40 = vld [vmem:[#allocation2 + $0x1c0] sm:$0xff] }
  0x29   : > { %366 = vmatpush1.msra.mxu0 %v307_v13  ;;  %v344_v41 = vld [vmem:[#allocation2 + $0x1b8] sm:$0xff]  ;;  %v343_v42 = vld [vmem:[#allocation2 + $0x1b0] sm:$0xff]  ;;  %v342_v43 = vld [vmem:[#allocation2 + $0x1a8] sm:$0xff] }
  0x2a   : > { %367 = vmatprep.subr.mxu0 %v306_v14  ;;  %v341_v44 = vld [vmem:[#allocation2 + $0x1a0] sm:$0xff]  ;;  %v340_v45 = vld [vmem:[#allocation2 + $0x198] sm:$0xff]  ;;  %v339_v46 = vld [vmem:[#allocation2 + $0x190] sm:$0xff] }
  0x2b   : > { %368 = vmatpush1.msra.mxu0 %v305_v15  ;;  %v338_v47 = vld [vmem:[#allocation2 + $0x188] sm:$0xff]  ;;  %v337_v48 = vld [vmem:[#allocation2 + $0x180] sm:$0xff]  ;;  %v336_v49 = vld [vmem:[#allocation2 + $0x178] sm:$0xff] }
  0x2c   : > { %369 = vmatprep.subr.mxu0 %v304_v16  ;;  %v335_v50 = vld [vmem:[#allocation2 + $0x170] sm:$0xff]  ;;  %v334_v51 = vld [vmem:[#allocation2 + $0x168] sm:$0xff]  ;;  %v333_v52 = vld [vmem:[#allocation2 + $0x160] sm:$0xff] }
  0x2d   : > { %370 = vmatpush1.msra.mxu0 %v303_v17  ;;  %v332_v53 = vld [vmem:[#allocation2 + $0x158] sm:$0xff]  ;;  %v331_v54 = vld [vmem:[#allocation2 + $0x150] sm:$0xff]  ;;  %v330_v55 = vld [vmem:[#allocation2 + $0x148] sm:$0xff] }
  0x2e   : > { %371 = vmatprep.subr.mxu0 %v302_v18  ;;  %v329_v56 = vld [vmem:[#allocation2 + $0x140] sm:$0xff]  ;;  %v328_v57 = vld [vmem:[#allocation2 + $0x138] sm:$0xff]  ;;  %v327_v58 = vld [vmem:[#allocation2 + $0x130] sm:$0xff] }
  0x2f   : > { %372 = vmatpush1.msra.mxu0 %v301_v19  ;;  %v326_v59 = vld [vmem:[#allocation2 + $0x128] sm:$0xff]  ;;  %v325_v60 = vld [vmem:[#allocation2 + $0x120] sm:$0xff]  ;;  %v324_v61 = vld [vmem:[#allocation2 + $0x118] sm:$0xff] }
  0x30   : > { %373 = vmatprep.subr.mxu0 %v300_v20  ;;  %v323_v62 = vld [vmem:[#allocation2 + $0x110] sm:$0xff]  ;;  %v322_v63 = vld [vmem:[#allocation2 + $0x108] sm:$0xff]  ;;  %v321_v0 = vld [vmem:[#allocation2 + $0x100] sm:$0xff] }
  0x31   : > { %374 = vmatpush1.msra.mxu0 %v299_v21  ;;  %v287_v1 = vld [vmem:[%s721_s10] sm:$0xff]  ;;  %v425_v9 = vld [vmem:[%s281_s13 + $0x8] sm:$0xff] }
  0x32   : > { %375 = vmatprep.subr.mxu0 %v298_v22  ;;  %v424_v6 = vld [vmem:[%s281_s13] sm:$0xff] }
  0x33   : > { %376 = vmatpush1.msra.mxu0 %v297_v23  ;;  %v428_v7 = vld [vmem:[%s748_s3] sm:$0x3] }
  0x34   : > { %377 = vmatprep.subr.mxu0 %v296_v25  ;;  %v433_v11 = vrot.slane %v428_v7, %v432_v4  ;;  %v437_v12 = vrot.slane %v428_v7, %v436_v5 }
  0x35   : > { %378 = vmatpush1.msra.mxu0 %v295_v26 }
  0x36   : > { %379 = vmatprep.subr.mxu0 %v294_v27 }
  0x37   : > { %380 = vmatpush1.msra.mxu0 %v293_v28  ;;  %v459_v28 = vld [vmem:[%s749_s4] sm:$0x3] }
  0x38   : > { %381 = vmatprep.subr.mxu0 %v292_v29  ;;  %v473_v29 = vld [vmem:[%s750_s5] sm:$0x3] }
  0x39   : > { %382 = vmatpush1.msra.mxu0 %v291_v30  ;;  %v464_v30 = vrot.slane %v459_v28, %v432_v4 }
  0x3a   : > { %383 = vmatprep.subr.mxu0 %v290_v31  ;;  %v468_v31 = vrot.slane %v459_v28, %v436_v5 }
  0x3b   : > { %384 = vmatpush1.msra.mxu0 %v289_v32 }
  0x3c   : > { %385 = vmatprep.subr.mxu0 %v352_v33  ;;  %v478_v33 = vrot.slane %v473_v29, %v432_v4 }
  0x3d   : > { %386 = vmatpush2.msra.mxu0 %v351_v34  ;;  %v482_v34 = vrot.slane %v473_v29, %v436_v5 }
  0x3e   : > { %387 = vmatprep.subr.mxu0 %v350_v35 }
  0x3f   : > { %388 = vmatpush2.msra.mxu0 %v349_v36 }
  0x40   : > { %389 = vmatprep.subr.mxu0 %v348_v37 }
  0x41   : > { %390 = vmatpush2.msra.mxu0 %v347_v38 }
  0x42   : > { %391 = vmatprep.subr.mxu0 %v346_v39 }
  0x43   : > { %392 = vmatpush2.msra.mxu0 %v345_v40 }
  0x44   : > { %393 = vmatprep.subr.mxu0 %v344_v41 }
  0x45   : > { %394 = vmatpush2.msra.mxu0 %v343_v42 }
  0x46   : > { %395 = vmatprep.subr.mxu0 %v342_v43 }
  0x47   : > { %396 = vmatpush2.msra.mxu0 %v341_v44 }
  0x48   : > { %397 = vmatprep.subr.mxu0 %v340_v45 }
  0x49   : > { %398 = vmatpush2.msra.mxu0 %v339_v46 }
  0x4a   : > { %399 = vmatprep.subr.mxu0 %v338_v47 }
  0x4b   : > { %400 = vmatpush2.msra.mxu0 %v337_v48 }
  0x4c   : > { %401 = vmatprep.subr.mxu0 %v336_v49 }
  0x4d   : > { %402 = vmatpush2.msra.mxu0 %v335_v50 }
  0x4e   : > { %403 = vmatprep.subr.mxu0 %v334_v51 }
  0x4f   : > { %404 = vmatpush2.msra.mxu0 %v333_v52 }
  0x50   : > { %405 = vmatprep.subr.mxu0 %v332_v53 }
  0x51   : > { %406 = vmatpush2.msra.mxu0 %v331_v54 }
  0x52   : > { %407 = vmatprep.subr.mxu0 %v330_v55 }
  0x53   : > { %408 = vmatpush2.msra.mxu0 %v329_v56 }
  0x54   : > { %409 = vmatprep.subr.mxu0 %v328_v57 }
  0x55   : > { %410 = vmatpush2.msra.mxu0 %v327_v58 }
  0x56   : > { %411 = vmatprep.subr.mxu0 %v326_v59 }
  0x57   : > { %412 = vmatpush2.msra.mxu0 %v325_v60 }
  0x58   : > { %413 = vmatprep.subr.mxu0 %v324_v61 }
  0x59   : > { %414 = vmatpush2.msra.mxu0 %v323_v62 }
  0x5a   : > { %415 = vmatprep.subr.mxu0 %v322_v63 }
  0x5b   : > { %416 = vmatpush2.msra.mxu0 %v321_v0 }
  0x5c   : > { %418 = vmatmul.mubr.f32.vlgmr.msra.gmra.mxu0 %v287_v1 }
 0x11c   : > { %v419_v8 = vpop.f32.mrf.mxu0 }
 0x11d   : > { %v426_v10 = vadd.f32 %v424_v6, %v419_v8 }
 0x11e   : > { %v421_v13 = vpop.f32.mrf.mxu0 }
 0x11f   : > { %v427_v14 = vadd.f32 %v425_v9, %v421_v13  ;;  %v440_v15 = vadd.f32 %v433_v11, %v426_v10 }
 0x121   : > { %v441_v16 = vadd.f32 %v437_v12, %v427_v14 }
 0x123   : > { %v442_v17 = vadd.f32 %v441_v16, %v440_v15 }
 0x125   : > { %443 = vadd.xlane.f32.xlu0 %v442_v17 }
 0x1ae   : > { %v444_v18 = vpop.xlane.xlu0 %443 }
 0x1af   : > { %v446_v19 = vmul.f32 0.00390625, %v444_v18 }
 0x1b1   : > { %v447_v20 = vsub.f32 %v440_v15, %v446_v19  ;;  %v448_v21 = vsub.f32 %v441_v16, %v446_v19 }
 0x1b3   : > { %v449_v22 = vmul.f32 %v447_v20, %v447_v20  ;;  %v450_v23 = vmul.f32 %v448_v21, %v448_v21 }
 0x1b5   : > { %v451_v24 = vadd.f32 %v450_v23, %v449_v22 }
 0x1b7   : > { %452 = vadd.xlane.f32.xlu0 %v451_v24 }
 0x240   : > { %v453_v25 = vpop.xlane.xlu0 %452 }
 0x241   : > { %v454_v26 = vmul.f32 0.00390625, %v453_v25 }
 0x243   : > { %v455_v27 = vadd.f32 1e-05, %v454_v26 }
 0x245   : > { %607 = vrsqrt.f32 %v455_v27 }
 0x252   : > { %v608_v32 = vpop.eup %607 }
 0x253   : > { %v457_v35 = vmul.f32 %v608_v32, %v447_v20  ;;  %v458_v36 = vmul.f32 %v608_v32, %v448_v21 }
 0x255   : > { %v471_v37 = vmul.f32 %v464_v30, %v457_v35  ;;  %v472_v38 = vmul.f32 %v468_v31, %v458_v36 }
 0x257   : > { %v485_v39 = vadd.f32 %v478_v33, %v471_v37  ;;  %v486_v40 = vadd.f32 %v482_v34, %v472_v38 }
 0x259   : > { %487 = vst [vmem:[%s286_s23] sm:$0xff] %v485_v39  ;;  %488 = vst [vmem:[%s286_s23 + $0x8] sm:$0xff] %v486_v40 }
 0x25a PF: > { %s17_s21 = sadd.s32 1, %s645_s21  }
 0x25b   : > { %p14_p1 = scmp.ge.s32.totalorder %s17_s21, 4  }
 0x25d   :  { %16 = sbr.rel (!%p14_p1) target bundleno = 1 (0x1), region = 82 }
 0x262   :  { %510 = vsyncpa [#allocation3], 1 }
 0x263   :  { %512 = vsyncpa [#allocation3 + $0x1], 1 }

// kernel: _lambda_.13
= control target key start
LH: loop header
LB: loop body
LE: loop exit
PB: predicated region body
PF: predicated region fallthrough
CT: control target
= control target key end

     0   :  { %s1007_s12 = smov 0   ;;  %s1009_s13 = smov 0   ;;  %s1100_s0 = inlined_call_operand.vmem [shape: f32[2,8,256], index: 0, kind: input, shape index: {}]   ;;  %s1101_s1 = inlined_call_operand.vmem [shape: f32[2,16,512], index: 1, kind: input, shape index: {}, may-alias: {1,2}]   ;;  %s1102_s2 = inlined_call_operand.vmem [shape: f32[2,16,512], index: 2, kind: input, shape index: {}, may-alias: {1,2}]   ;;  %s1103_s3 = inlined_call_operand.vmem [shape: f32[2,8,256], index: 3, kind: output, shape index: {}]  }
   0x1   :  { %s1011_s14 = smov 0   ;;  %s1013_s15 = smov 0  }
   0x2   :  { %s1015_s16 = smov 0  }
   0x3 LB: > { %s25_s17 = sadd.s32 1, %s971_s14  ;;  %s32_s18 = sadd.s32 1, %s975_s15  ;;  %s979_s16 = sphi %s1015_s16, %s13_s16   ;;  %s975_s15 = sphi %s1013_s15, %s1107_s15   ;;  %s971_s14 = sphi %s1011_s14, %s1106_s14   ;;  %s967_s13 = sphi %s1009_s13, %s1105_s13   ;;  %s963_s12 = sphi %s1007_s12, %s1104_s12  }
   0x4   : > { %p26_p0 = scmp.ge.s32.totalorder %s25_s17, 2  ;;  %p831_p1 = scmp.ge.s32.totalorder %s979_s16, 1 }
   0x5   : > { %p197_p2 = scmp.lt.s32.totalorder %s979_s16, 5 }
   0x6   : > { %s1109_s17 = smov (%p26_p0, %s25_s17), 0  ;;  %s1111_s18 = smov (!%p26_p0, %s32_s18), %s975_s15 }
   0x7   : > { %p198_p3 = pnand %p831_p1, %p197_p2  ;;  %p34_p4 = scmp.ge.s32.totalorder %s1111_s18, 2 }
   0x8   : > { %p248_p5 = scmp.lt.s32.totalorder (!%p198_p3), %s967_s13, 1  ;;  %p259_p6 = scmp.lt.s32.totalorder (!%p198_p3), %s963_s12, 1 }
   0x9   : > { %s1113_s18 = smov (%p34_p4, %s1111_s18), 0  ;;  %201 = sbr.rel (%p198_p3) target bundleno = 1331 (0x533), region = 32 }
   0xa   : > { %p842_p7 = scmp.ne.s32.totalorder (!%p198_p3), %s963_s12, 0 }
   0xe   : > { %s1115_s13 = smov (!%p248_p5, %s967_s13), 1 }
   0xf   : > { %s260_s19 = scalar_select %p259_p6, %s963_s12, 1 }
  0x10   : > { %s850_s20 = sshll.u32 %s1115_s13, 4  ;;  %s835_s21 = sshll.u32 %s1115_s13, 3 }
  0x11   : > { %s1044_s24 = scalar_lea.vmem %s1100_s0, %s850_s20  ;;  %s834_s25 = sshll.u32 %s260_s19, 2 }
  0x12   : > { %s263_s26 = sadd.s32 %s835_s21, %s834_s25  ;;  %s1049_s29 = scalar_lea.vmem %s1103_s3, %s850_s20 }
  0x13   : > { %s836_s30 = sshll.u32 %s263_s26, 3  ;;  %288 = sbr.rel (%p842_p7) target bundleno = 28 (0x1c), region = 36 }
  0x14   : > { %s1054_s6 = scalar_lea.vmem %s1101_s1, %s836_s30  ;;  %s1059_s9 = scalar_lea.vmem %s1102_s2, %s836_s30 }
  0x18   : > { %vm289_vm0 = vcmask 7168   ;;  %v981_v0 = vmov -inf   ;;  %v982_v1 = vmov 0.0  }
  0x19   : > { %290 = vst.msk [vmem:[#allocation2] sm:$0xff] %vm289_vm0, %v981_v0  ;;  %291 = vst.msk [vmem:[#allocation2 + $0x8] sm:$0xff] %vm289_vm0, %v981_v0 }
  0x1a   : > { %292 = vst.msk [vmem:[#allocation3] sm:$0xff] %vm289_vm0, %v982_v1  ;;  %293 = vst.msk [vmem:[#allocation3 + $0x8] sm:$0xff] %vm289_vm0, %v982_v1 }
  0x1b   : > { %294 = vst [vmem:[#allocation4] sm:$0xff] %v982_v1  ;;  %295 = vst [vmem:[#allocation4 + $0x8] sm:$0xff] %v982_v1 }
  0x1c PF: > { %v298_v2 = vld [vmem:[%s1054_s6] sm:$0xff]  ;;  %v983_v4 = vmov 0.0   ;;  %vm984_vm1 = vmmov 0   ;;  %vm371_vm2 = vcmask 64512   ;;  %v985_v9 = vmov 0   ;;  %v843_v14 = vld [vmem:[%s1059_s9 + $0x10] sm:$0xff] }
  0x1d   : > { %v296_v3 = vld [vmem:[%s1044_s24] sm:$0xff]  ;;  %860 = vmatprep.subr.mxu0 %v983_v4  ;;  %862 = vmatprep.mubr.msk.f32.mxu0 %vm984_vm1, %v983_v4  ;;  %vm393_vm3 = vcmask 7168   ;;  %v478_v18 = vld [vmem:[%s1044_s24 + $0x8] sm:$0xff]  ;;  %v845_v30 = vld [vmem:[%s1059_s9 + $0x18] sm:$0xff]  ;;  %p847_p8 = scmp.ne.s32.totalorder %s963_s12, 1 }
  0x1e   : > { %v297_v5 = vmul.f32 0.088388346, %v296_v3  ;;  %861 = vmatpush3.xpose.msra.mxu0 %v298_v2  ;;  %865 = vmatprep.subr.mxu1 %v983_v4  ;;  %v480_v19 = vld [vmem:[%s1054_s6 + $0x8] sm:$0xff]  ;;  %v479_v21 = vmul.f32 0.088388346, %v478_v18 }
  0x1f   : > { %867 = vmatprep.mubr.msk.f32.mxu1 %vm984_vm1, %v983_v4  ;;  %875 = vmatprep.subr.mxu0 %v983_v4 }
  0x20   : > { %926 = vset.pattern.permute.xlu0 %v985_v9  ;;  %927 = vset.pattern.permute.xlu1 %v985_v9  ;;  %v370_v10 = vld [vmem:[#allocation2] sm:$0xff]  ;;  %v553_v27 = vld [vmem:[#allocation2 + $0x8] sm:$0xff] }
  0x21   : > { %863 = vmatmul.mubr.f32.vlgmr.msra.gmra.mxu0 %v297_v5  ;;  %866 = vmatpush3.msra.mxu1 %v843_v14  ;;  %v387_v42 = vld [vmem:[#allocation3] sm:$0xff]  ;;  %v570_v50 = vld [vmem:[#allocation3 + $0x8] sm:$0xff] }
  0x22   : > { %877 = vmatprep.mubr.msk.f32.mxu0 %vm984_vm1, %v983_v4  ;;  %870 = vmatprep.subr.mxu1 %v983_v4  ;;  %v468_v46 = vld [vmem:[#allocation4] sm:$0xff]  ;;  %v650_v54 = vld [vmem:[#allocation4 + $0x8] sm:$0xff] }
  0x23   : > { %876 = vmatpush3.msra.mxu0 %v845_v30 }
  0xe1   : > { %v366_v6 = vpop.f32.mrf.mxu0 }
  0xe2   : > { %v372_v7 = vsel %vm371_vm2, %v366_v6, -inf }
  0xe3   : > { %373 = vmax.xlane.f32.xlu0 %v372_v7  ;;  %v864_v8 = vpop.f32.mrf.mxu0 }
 0x16c   : > { %v374_v11 = vpop.xlane.xlu0 %373 }
 0x16d   : > { %v375_v12 = vmax.f32 %v370_v10, %v374_v11 }
 0x16f   : > { %v376_v13 = vsub.f32 %v370_v10, %v375_v12  ;;  %477 = vst.msk [vmem:[#allocation2] sm:$0xff] %vm393_vm3, %v375_v12  ;;  %381 = vperm.xlu0 %926, %v375_v12  }
 0x171   : > { %v377_v31 = vmul.f32 1.442695, %v376_v13 }
 0x1ea   : > { %v382_v15 = vpop.permute.xlu0 %381 }
 0x1eb   : > { %v384_v16 = vsub.f32 %v366_v6, %v382_v15 }
 0x1ed   : > { %v385_v17 = vmul.f32 1.442695, %v384_v16 }
 0x1ef   : > { %928 = vpow2.f32 %v385_v17 }
 0x1f0   : > { %930 = vpow2.f32 %v377_v31 }
 0x1fc   : > { %v929_v20 = vpop.eup %928 }
 0x1fd   : > { %868 = vmatmul.mubr.msk.f32.vlgmr.msra.gmra.mxu1 %vm371_vm2, %v929_v20  ;;  %v389_v33 = vsel %vm371_vm2, %v929_v20, 0.0  ;;  %v931_v35 = vpop.eup %930 }
 0x1fe   : > { %871 = vmatpush3.xpose.msra.mxu1 %v480_v19  ;;  %872 = vmatprep.mubr.msk.f32.mxu1 %vm984_vm1, %v983_v4  ;;  %v388_v43 = vmul.f32 %v931_v35, %v387_v42 }
 0x201   : > { %873 = vmatmul.mubr.f32.vlgmr.msra.gmra.mxu1 %v479_v21 }
 0x2bd   : > { %v464_v22 = vpop.f32.mrf.mxu1 }
 0x2bf   : > { %v869_v23 = vpop.f32.mrf.mxu1 }
 0x2c1   : > { %v548_v24 = vpop.f32.mrf.mxu1 }
 0x2c2   : > { %v554_v25 = vsel %vm371_vm2, %v548_v24, -inf }
 0x2c3   : > { %555 = vmax.xlane.f32.xlu1 %v554_v25  ;;  %v874_v26 = vpop.f32.mrf.mxu1 }
 0x34c   : > { %v556_v28 = vpop.xlane.xlu1 %555 }
 0x34d   : > { %v557_v29 = vmax.f32 %v553_v27, %v556_v28 }
 0x34f   : > { %659 = vst.msk [vmem:[#allocation2 + $0x8] sm:$0xff] %vm393_vm3, %v557_v29  ;;  %563 = vperm.xlu1 %927, %v557_v29   ;;  %v558_v32 = vsub.f32 %v553_v27, %v557_v29 }
 0x351   : > { %v559_v34 = vmul.f32 1.442695, %v558_v32 }
 0x353   : > { %932 = vpow2.f32 %v559_v34 }
 0x360   : > { %v933_v36 = vpop.eup %932 }
 0x361   : > { %v571_v51 = vmul.f32 %v933_v36, %v570_v50 }
 0x373   : > { %390 = vadd.xlane.f32.xlu1 %v389_v33 }
 0x384   : > { %471 = vperm.xlu1 %927, %v931_v35  }
 0x388   : > { %653 = vperm.xlu1 %927, %v933_v36  }
 0x3ca   : > { %v564_v37 = vpop.permute.xlu1 %563 }
 0x3cb   : > { %v566_v38 = vsub.f32 %v548_v24, %v564_v37 }
 0x3cd   : > { %v567_v39 = vmul.f32 1.442695, %v566_v38 }
 0x3cf   : > { %934 = vpow2.f32 %v567_v39 }
 0x3dc   : > { %v935_v40 = vpop.eup %934 }
 0x3dd   : > { %878 = vmatmul.mubr.msk.f32.vlgmr.msra.gmra.mxu0 %vm371_vm2, %v935_v40  ;;  %v572_v41 = vsel %vm371_vm2, %v935_v40, 0.0 }
 0x3de   : > { %573 = vadd.xlane.f32.xlu0 %v572_v41 }
 0x3fc   : > { %v391_v44 = vpop.xlane.xlu1 %390 }
 0x3fd   : > { %v392_v45 = vadd.f32 %v391_v44, %v388_v43 }
 0x3ff   : > { %394 = vst.msk [vmem:[#allocation3] sm:$0xff] %vm393_vm3, %v392_v45 }
 0x400   : > { %v472_v47 = vpop.permute.xlu1 %471 }
 0x401   : > { %v474_v48 = vmul.f32 %v472_v47, %v468_v46 }
 0x403   : > { %v475_v49 = vadd.f32 %v474_v48, %v464_v22 }
 0x404   : > { %v654_v55 = vpop.permute.xlu1 %653 }
 0x405   : > { %476 = vst [vmem:[#allocation4] sm:$0xff] %v475_v49  ;;  %v656_v56 = vmul.f32 %v654_v55, %v650_v54 }
 0x467   : > { %v574_v52 = vpop.xlane.xlu0 %573 }
 0x468   : > { %v575_v53 = vadd.f32 %v574_v52, %v571_v51 }
 0x46a   : > { %576 = vst.msk [vmem:[#allocation3 + $0x8] sm:$0xff] %vm393_vm3, %v575_v53 }
 0x49c   : > { %663 = sbr.rel (%p847_p8) target bundleno = 1331 (0x533), region = 40 }
 0x49d   : > { %v646_v57 = vpop.f32.mrf.mxu0 }
 0x49e   : > { %v657_v58 = vadd.f32 %v656_v56, %v646_v57 }
 0x49f   : > { %v879_v59 = vpop.f32.mrf.mxu0 }
 0x4a0   : > { %658 = vst [vmem:[#allocation4 + $0x8] sm:$0xff] %v657_v58 }
 0x4a1   : > { %v664_v60 = vld [vmem:[#allocation3] sm:$0xff]  ;;  %v674_v61 = vld [vmem:[#allocation3 + $0x8] sm:$0xff]  ;;  %v986_v62 = vmov 0   ;;  %v666_v1 = vld [vmem:[#allocation4] sm:$0xff] }
 0x4a2   : > { %936 = vset.pattern.permute.xlu0 %v986_v62  ;;  %937 = vrcp.f32 %v664_v60 }
 0x4a3   : > { %939 = vrcp.f32 %v674_v61 }
 0x4a7   : > { %v676_v4 = vld [vmem:[#allocation4 + $0x8] sm:$0xff] }
 0x4af   : > { %v938_v63 = vpop.eup %937 }
 0x4b0   : > { %669 = vperm.xlu0 %936, %v938_v63   ;;  %v940_v0 = vpop.eup %939 }
 0x4b4   : > { %679 = vperm.xlu0 %936, %v940_v0  }
 0x52b   : > { %v670_v2 = vpop.permute.xlu0 %669 }
 0x52c   : > { %v672_v3 = vmul.f32 %v670_v2, %v666_v1 }
 0x52e   : > { %673 = vst [vmem:[%s1049_s29] sm:$0xff] %v672_v3 }
 0x52f   : > { %v680_v5 = vpop.permute.xlu0 %679 }
 0x530   : > { %v682_v6 = vmul.f32 %v680_v5, %v676_v4 }
 0x532   : > { %683 = vst [vmem:[%s1049_s29 + $0x8] sm:$0xff] %v682_v6 }
 0x533 PF: > { %s13_s16 = sadd.s32 1, %s979_s16   ;;  %s1104_s12 = smov %s971_s14 }
 0x534   : > { %p10_p9 = scmp.ge.s32.totalorder %s13_s16, 6   ;;  %s1105_s13 = smov %s975_s15 }
 0x535   : > { %s1106_s14 = smov %s1109_s17  ;;  %s1107_s15 = smov %s1113_s18 }
 0x536   :  { %12 = sbr.rel (!%p10_p9) target bundleno = 3 (0x3), region = 78 }

// kernel: _lambda_.15
= control target key start
LH: loop header
LB: loop body
LE: loop exit
PB: predicated region body
PF: predicated region fallthrough
CT: control target
= control target key end

     0   :  { %s1729_s0 = inlined_call_operand.vmem [shape: f32[16,256], index: 0, kind: input, shape index: {}]   ;;  %s1730_s1 = inlined_call_operand.vmem [shape: f32[256,1024], index: 1, kind: input, shape index: {}]   ;;  %s1731_s2 = inlined_call_operand.vmem [shape: f32[1,1024], index: 2, kind: input, shape index: {}]   ;;  %s1732_s3 = inlined_call_operand.vmem [shape: f32[1024,256], index: 3, kind: input, shape index: {}]   ;;  %s1733_s4 = inlined_call_operand.vmem [shape: f32[1,256], index: 4, kind: input, shape index: {}]   ;;  %s1734_s5 = inlined_call_operand.vmem [shape: f32[1,256], index: 5, kind: input, shape index: {}]   ;;  %s1735_s6 = inlined_call_operand.vmem [shape: f32[1,256], index: 6, kind: input, shape index: {}]   ;;  %s1736_s7 = inlined_call_operand.hbm [shape: f32[16,256], index: 7, kind: output, shape index: {}]  }
   0x1   :  { %1744 = sst [smem:[#allocation15_spill]] %s1730_s1 }
   0x2   :  { %12 = vsyncpa [#allocation5], 0 }
   0x3   :  { %14 = vsyncpa [#allocation5 + $0x1], 0  ;;  %s1260_s24 = smov 0   ;;  %s1262_s25 = smov 0  }
   0x4   :  { %s1264_s26 = smov 0   ;;  %s1266_s27 = smov 0  }
   0x5   :  { %s1268_s28 = smov 0   ;;  %s1270_s29 = smov 0  }
   0x6   :  { %s1272_s30 = smov 0   ;;  %s1274_s8 = smov 0  }
   0x7   :  { %s1276_s9 = smov 0   ;;  %s1278_s10 = smov 0  }
   0x8 LB: > { %1745 = sst [smem:[#allocation7_spill]] %s1188_s26  ;;  %s991_s11 = sadd.s32 4294967295, %s1216_s10   ;;  %s1216_s10 = sphi %s1278_s10, %s20_s10   ;;  %s1212_s9 = sphi %s1276_s9, %s1765_s9   ;;  %s1208_s8 = sphi %s1274_s8, %s1764_s8   ;;  %s1204_s30 = sphi %s1272_s30, %s1763_s30   ;;  %s1200_s29 = sphi %s1270_s29, %s1762_s29   ;;  %s1196_s28 = sphi %s1268_s28, %s1761_s28   ;;  %s1192_s27 = sphi %s1266_s27, %s1760_s27   ;;  %s1188_s26 = sphi %s1264_s26, %s1759_s26   ;;  %s1184_s25 = sphi %s1262_s25, %s1767_s25   ;;  %s1180_s24 = sphi %s1260_s24, %s1766_s24  }
   0x9   : > { %1746 = sst [smem:[#allocation8_spill]] %s1196_s28  ;;  %s992_s12 = sadd.s32 4294967294, %s1216_s10  }
   0xa   : > { %1747 = sst [smem:[#allocation9_spill]] %s1208_s8  ;;  %s29_s13 = sadd.s32 1, %s1208_s8 }
   0xb   : > { %1748 = sst [smem:[#allocation10_spill]] %s1212_s9  ;;  %s32_s14 = sadd.s32 1, %s1212_s9 }
   0xc   : > { %p30_p0 = scmp.ge.s32.totalorder %s29_s13, 4  ;;  %s65_s15 = sadd.s32 1, %s1196_s28 }
   0xd   : > { %p72_p1 = scmp.ne.s32.totalorder %s1196_s28, %s1192_s27  ;;  %p73_p2 = scmp.eq.s32.totalorder %s1216_s10, 0 }
   0xe   : > { %s1769_s13 = smov (%p30_p0, %s29_s13), 0  ;;  %s1771_s14 = smov (!%p30_p0, %s32_s14), %s1212_s9 }
   0xf   : > { %1749 = sst [smem:[#allocation11_spill]] %s1769_s13  ;;  %s62_s16 = ssub.s32 %s1208_s8, %s1769_s13 }
  0x10   : > { %p1323_p3 = por %p73_p2, %p72_p1  ;;  %p34_p4 = scmp.ge.s32.totalorder %s1771_s14, 2 }
  0x11   : > { %p63_p5 = scmp.eq.s32.totalorder %s62_s16, 0  ;;  %s206_s18 = sadd.s32 1, %s1188_s26 }
  0x12   : > { %p216_p6 = scmp.ne.s32.totalorder %s1188_s26, %s1184_s25  ;;  %s1773_s14 = smov (%p34_p4, %s1771_s14), 0 }
  0x13   : > { %1751 = sst [smem:[#allocation12_spill]] %s1773_s14  ;;  %s203_s20 = ssub.s32 %s1212_s9, %s1773_s14 }
  0x14   : > { %s1333_s19 = scalar_select %p63_p5, %s1196_s28, %s65_s15  }
  0x15   : > { %p217_p7 = scmp.eq.s32.totalorder %s991_s11, 7  ;;  %p204_p8 = scmp.eq.s32.totalorder %s203_s20, 0 }
  0x16   : > { %1752 = sst [smem:[#allocation13_spill]] %s1333_s19  ;;  %p222_p9 = scmp.ne.s32.totalorder %s1184_s25, %s1180_s24 }
  0x17   : > { %p1339_p10 = por %p217_p7, %p216_p6  ;;  %p223_p11 = scmp.eq.s32.totalorder %s992_s12, 7 }
  0x18   : > { %s1344_s22 = scalar_select %p204_p8, %s1188_s26, %s206_s18  }
  0x19   : > { %p1346_p12 = por %p223_p11, %p222_p9  ;;  %p994_p13 = scmp.ge.s32.totalorder %s1216_s10, 8 }
  0x1a   : > { %1754 = sst [smem:[#allocation14_spill]] %s1344_s22 }
  0x1b   : > { %248 = sbr.rel (%p994_p13) target bundleno = 74 (0x4a), region = 28 }
  0x20   : > { %259 = sbr.rel (!%p1323_p3) target bundleno = 74 (0x4a), region = 36  ;;  %s261_s11 = sand.u32 (%p1323_p3), 1, %s1196_s28  }
  0x21   : > { %s1014_s15 = sshll.u32 (%p1323_p3), %s1208_s8, 4  ;;  %s995_s16 = sshll.u32 (%p1323_p3), %s261_s11, 9 }
  0x22   : > { %s1756_s1 = sld [smem:[#allocation15_spill]] (%p1323_p3)  ;;  %s1363_s17 = scalar_lea.vmem (%p1323_p3), [#allocation3], %s995_s16 }
  0x28   : > { %s1358_s12 = scalar_lea.vmem %s1756_s1, %s1014_s15 }
  0x29   : > { %v279_v0 = vld [vmem:[%s1358_s12] sm:$0xff]  ;;  %v281_v1 = vld [vmem:[%s1358_s12 + $0x8] sm:$0xff] }
  0x2a   : > { %v283_v2 = vld [vmem:[%s1358_s12 + $0x40] sm:$0xff]  ;;  %280 = vst [vmem:[%s1363_s17] sm:$0xff] %v279_v0  ;;  %282 = vst [vmem:[%s1363_s17 + $0x8] sm:$0xff] %v281_v1  ;;  %v285_v3 = vld [vmem:[%s1358_s12 + $0x48] sm:$0xff] }
  0x2b   : > { %284 = vst [vmem:[%s1363_s17 + $0x10] sm:$0xff] %v283_v2  ;;  %v287_v4 = vld [vmem:[%s1358_s12 + $0x80] sm:$0xff]  ;;  %v289_v5 = vld [vmem:[%s1358_s12 + $0x88] sm:$0xff]  ;;  %286 = vst [vmem:[%s1363_s17 + $0x18] sm:$0xff] %v285_v3 }
  0x2c   : > { %288 = vst [vmem:[%s1363_s17 + $0x20] sm:$0xff] %v287_v4  ;;  %290 = vst [vmem:[%s1363_s17 + $0x28] sm:$0xff] %v289_v5  ;;  %v291_v6 = vld [vmem:[%s1358_s12 + $0xc0] sm:$0xff]  ;;  %v293_v7 = vld [vmem:[%s1358_s12 + $0xc8] sm:$0xff] }
  0x2d   : > { %v295_v8 = vld [vmem:[%s1358_s12 + $0x100] sm:$0xff]  ;;  %292 = vst [vmem:[%s1363_s17 + $0x30] sm:$0xff] %v291_v6  ;;  %294 = vst [vmem:[%s1363_s17 + $0x38] sm:$0xff] %v293_v7  ;;  %v297_v9 = vld [vmem:[%s1358_s12 + $0x108] sm:$0xff] }
  0x2e   : > { %296 = vst [vmem:[%s1363_s17 + $0x40] sm:$0xff] %v295_v8  ;;  %v299_v10 = vld [vmem:[%s1358_s12 + $0x140] sm:$0xff]  ;;  %v301_v11 = vld [vmem:[%s1358_s12 + $0x148] sm:$0xff]  ;;  %298 = vst [vmem:[%s1363_s17 + $0x48] sm:$0xff] %v297_v9 }
  0x2f   : > { %300 = vst [vmem:[%s1363_s17 + $0x50] sm:$0xff] %v299_v10  ;;  %302 = vst [vmem:[%s1363_s17 + $0x58] sm:$0xff] %v301_v11  ;;  %v303_v12 = vld [vmem:[%s1358_s12 + $0x180] sm:$0xff]  ;;  %v305_v13 = vld [vmem:[%s1358_s12 + $0x188] sm:$0xff] }
  0x30   : > { %v307_v14 = vld [vmem:[%s1358_s12 + $0x1c0] sm:$0xff]  ;;  %304 = vst [vmem:[%s1363_s17 + $0x60] sm:$0xff] %v303_v12  ;;  %306 = vst [vmem:[%s1363_s17 + $0x68] sm:$0xff] %v305_v13  ;;  %v309_v15 = vld [vmem:[%s1358_s12 + $0x1c8] sm:$0xff] }
  0x31   : > { %308 = vst [vmem:[%s1363_s17 + $0x70] sm:$0xff] %v307_v14  ;;  %v311_v16 = vld [vmem:[%s1358_s12 + $0x200] sm:$0xff]  ;;  %v313_v17 = vld [vmem:[%s1358_s12 + $0x208] sm:$0xff]  ;;  %310 = vst [vmem:[%s1363_s17 + $0x78] sm:$0xff] %v309_v15 }
  0x32   : > { %312 = vst [vmem:[%s1363_s17 + $0x80] sm:$0xff] %v311_v16  ;;  %314 = vst [vmem:[%s1363_s17 + $0x88] sm:$0xff] %v313_v17  ;;  %v315_v18 = vld [vmem:[%s1358_s12 + $0x240] sm:$0xff]  ;;  %v317_v19 = vld [vmem:[%s1358_s12 + $0x248] sm:$0xff] }
  0x33   : > { %v319_v20 = vld [vmem:[%s1358_s12 + $0x280] sm:$0xff]  ;;  %316 = vst [vmem:[%s1363_s17 + $0x90] sm:$0xff] %v315_v18  ;;  %318 = vst [vmem:[%s1363_s17 + $0x98] sm:$0xff] %v317_v19  ;;  %v321_v21 = vld [vmem:[%s1358_s12 + $0x288] sm:$0xff] }
  0x34   : > { %320 = vst [vmem:[%s1363_s17 + $0xa0] sm:$0xff] %v319_v20  ;;  %v323_v22 = vld [vmem:[%s1358_s12 + $0x2c0] sm:$0xff]  ;;  %v325_v23 = vld [vmem:[%s1358_s12 + $0x2c8] sm:$0xff]  ;;  %322 = vst [vmem:[%s1363_s17 + $0xa8] sm:$0xff] %v321_v21 }
  0x35   : > { %324 = vst [vmem:[%s1363_s17 + $0xb0] sm:$0xff] %v323_v22  ;;  %326 = vst [vmem:[%s1363_s17 + $0xb8] sm:$0xff] %v325_v23  ;;  %v327_v24 = vld [vmem:[%s1358_s12 + $0x300] sm:$0xff]  ;;  %v329_v25 = vld [vmem:[%s1358_s12 + $0x308] sm:$0xff] }
  0x36   : > { %v331_v26 = vld [vmem:[%s1358_s12 + $0x340] sm:$0xff]  ;;  %328 = vst [vmem:[%s1363_s17 + $0xc0] sm:$0xff] %v327_v24  ;;  %330 = vst [vmem:[%s1363_s17 + $0xc8] sm:$0xff] %v329_v25  ;;  %v333_v27 = vld [vmem:[%s1358_s12 + $0x348] sm:$0xff] }
  0x37   : > { %332 = vst [vmem:[%s1363_s17 + $0xd0] sm:$0xff] %v331_v26  ;;  %v335_v28 = vld [vmem:[%s1358_s12 + $0x380] sm:$0xff]  ;;  %v337_v29 = vld [vmem:[%s1358_s12 + $0x388] sm:$0xff]  ;;  %334 = vst [vmem:[%s1363_s17 + $0xd8] sm:$0xff] %v333_v27 }
  0x38   : > { %336 = vst [vmem:[%s1363_s17 + $0xe0] sm:$0xff] %v335_v28  ;;  %338 = vst [vmem:[%s1363_s17 + $0xe8] sm:$0xff] %v337_v29  ;;  %v339_v30 = vld [vmem:[%s1358_s12 + $0x3c0] sm:$0xff]  ;;  %v341_v31 = vld [vmem:[%s1358_s12 + $0x3c8] sm:$0xff] }
  0x39   : > { %v343_v32 = vld [vmem:[%s1358_s12 + $0x400] sm:$0xff]  ;;  %340 = vst [vmem:[%s1363_s17 + $0xf0] sm:$0xff] %v339_v30  ;;  %342 = vst [vmem:[%s1363_s17 + $0xf8] sm:$0xff] %v341_v31  ;;  %v345_v33 = vld [vmem:[%s1358_s12 + $0x408] sm:$0xff] }
  0x3a   : > { %344 = vst [vmem:[%s1363_s17 + $0x100] sm:$0xff] %v343_v32  ;;  %v347_v34 = vld [vmem:[%s1358_s12 + $0x440] sm:$0xff]  ;;  %v349_v35 = vld [vmem:[%s1358_s12 + $0x448] sm:$0xff]  ;;  %346 = vst [vmem:[%s1363_s17 + $0x108] sm:$0xff] %v345_v33 }
  0x3b   : > { %348 = vst [vmem:[%s1363_s17 + $0x110] sm:$0xff] %v347_v34  ;;  %350 = vst [vmem:[%s1363_s17 + $0x118] sm:$0xff] %v349_v35  ;;  %v351_v36 = vld [vmem:[%s1358_s12 + $0x480] sm:$0xff]  ;;  %v353_v37 = vld [vmem:[%s1358_s12 + $0x488] sm:$0xff] }
  0x3c   : > { %v355_v38 = vld [vmem:[%s1358_s12 + $0x4c0] sm:$0xff]  ;;  %352 = vst [vmem:[%s1363_s17 + $0x120] sm:$0xff] %v351_v36  ;;  %354 = vst [vmem:[%s1363_s17 + $0x128] sm:$0xff] %v353_v37  ;;  %v357_v39 = vld [vmem:[%s1358_s12 + $0x4c8] sm:$0xff] }
  0x3d   : > { %356 = vst [vmem:[%s1363_s17 + $0x130] sm:$0xff] %v355_v38  ;;  %v359_v40 = vld [vmem:[%s1358_s12 + $0x500] sm:$0xff]  ;;  %v361_v41 = vld [vmem:[%s1358_s12 + $0x508] sm:$0xff]  ;;  %358 = vst [vmem:[%s1363_s17 + $0x138] sm:$0xff] %v357_v39 }
  0x3e   : > { %360 = vst [vmem:[%s1363_s17 + $0x140] sm:$0xff] %v359_v40  ;;  %362 = vst [vmem:[%s1363_s17 + $0x148] sm:$0xff] %v361_v41  ;;  %v363_v42 = vld [vmem:[%s1358_s12 + $0x540] sm:$0xff]  ;;  %v365_v43 = vld [vmem:[%s1358_s12 + $0x548] sm:$0xff] }
  0x3f   : > { %v367_v44 = vld [vmem:[%s1358_s12 + $0x580] sm:$0xff]  ;;  %364 = vst [vmem:[%s1363_s17 + $0x150] sm:$0xff] %v363_v42  ;;  %366 = vst [vmem:[%s1363_s17 + $0x158] sm:$0xff] %v365_v43  ;;  %v369_v45 = vld [vmem:[%s1358_s12 + $0x588] sm:$0xff] }
  0x40   : > { %368 = vst [vmem:[%s1363_s17 + $0x160] sm:$0xff] %v367_v44  ;;  %v371_v46 = vld [vmem:[%s1358_s12 + $0x5c0] sm:$0xff]  ;;  %v373_v47 = vld [vmem:[%s1358_s12 + $0x5c8] sm:$0xff]  ;;  %370 = vst [vmem:[%s1363_s17 + $0x168] sm:$0xff] %v369_v45 }
  0x41   : > { %372 = vst [vmem:[%s1363_s17 + $0x170] sm:$0xff] %v371_v46  ;;  %374 = vst [vmem:[%s1363_s17 + $0x178] sm:$0xff] %v373_v47  ;;  %v375_v48 = vld [vmem:[%s1358_s12 + $0x600] sm:$0xff]  ;;  %v377_v49 = vld [vmem:[%s1358_s12 + $0x608] sm:$0xff] }
  0x42   : > { %v379_v50 = vld [vmem:[%s1358_s12 + $0x640] sm:$0xff]  ;;  %376 = vst [vmem:[%s1363_s17 + $0x180] sm:$0xff] %v375_v48  ;;  %378 = vst [vmem:[%s1363_s17 + $0x188] sm:$0xff] %v377_v49  ;;  %v381_v51 = vld [vmem:[%s1358_s12 + $0x648] sm:$0xff] }
  0x43   : > { %380 = vst [vmem:[%s1363_s17 + $0x190] sm:$0xff] %v379_v50  ;;  %v383_v52 = vld [vmem:[%s1358_s12 + $0x680] sm:$0xff]  ;;  %v385_v53 = vld [vmem:[%s1358_s12 + $0x688] sm:$0xff]  ;;  %382 = vst [vmem:[%s1363_s17 + $0x198] sm:$0xff] %v381_v51 }
  0x44   : > { %384 = vst [vmem:[%s1363_s17 + $0x1a0] sm:$0xff] %v383_v52  ;;  %386 = vst [vmem:[%s1363_s17 + $0x1a8] sm:$0xff] %v385_v53  ;;  %v387_v54 = vld [vmem:[%s1358_s12 + $0x6c0] sm:$0xff]  ;;  %v389_v55 = vld [vmem:[%s1358_s12 + $0x6c8] sm:$0xff] }
  0x45   : > { %v391_v56 = vld [vmem:[%s1358_s12 + $0x700] sm:$0xff]  ;;  %388 = vst [vmem:[%s1363_s17 + $0x1b0] sm:$0xff] %v387_v54  ;;  %390 = vst [vmem:[%s1363_s17 + $0x1b8] sm:$0xff] %v389_v55  ;;  %v393_v57 = vld [vmem:[%s1358_s12 + $0x708] sm:$0xff] }
  0x46   : > { %392 = vst [vmem:[%s1363_s17 + $0x1c0] sm:$0xff] %v391_v56  ;;  %v395_v58 = vld [vmem:[%s1358_s12 + $0x740] sm:$0xff]  ;;  %v397_v59 = vld [vmem:[%s1358_s12 + $0x748] sm:$0xff]  ;;  %394 = vst [vmem:[%s1363_s17 + $0x1c8] sm:$0xff] %v393_v57 }
  0x47   : > { %396 = vst [vmem:[%s1363_s17 + $0x1d0] sm:$0xff] %v395_v58  ;;  %398 = vst [vmem:[%s1363_s17 + $0x1d8] sm:$0xff] %v397_v59  ;;  %v399_v60 = vld [vmem:[%s1358_s12 + $0x780] sm:$0xff]  ;;  %v401_v61 = vld [vmem:[%s1358_s12 + $0x788] sm:$0xff] }
  0x48   : > { %v403_v62 = vld [vmem:[%s1358_s12 + $0x7c0] sm:$0xff]  ;;  %400 = vst [vmem:[%s1363_s17 + $0x1e0] sm:$0xff] %v399_v60  ;;  %402 = vst [vmem:[%s1363_s17 + $0x1e8] sm:$0xff] %v401_v61  ;;  %v405_v63 = vld [vmem:[%s1358_s12 + $0x7c8] sm:$0xff] }
  0x49   : > { %404 = vst [vmem:[%s1363_s17 + $0x1f0] sm:$0xff] %v403_v62  ;;  %406 = vst [vmem:[%s1363_s17 + $0x1f8] sm:$0xff] %v405_v63 }
  0x4a PF: > { %p998_p0 = scmp.ge.s32.totalorder %s1216_s10, 1  ;;  %p429_p1 = scmp.lt.s32.totalorder %s1216_s10, 9 }
  0x4c   : > { %p430_p2 = pnand %p998_p0, %p429_p1 }
  0x4d   : > { %s436_s14 = sand.u32 (!%p430_p2), 1, %s1192_s27   ;;  %s1741_s18 = sand.u32 (!%p430_p2), 1, %s1184_s25  }
  0x4e   : > { %433 = sbr.rel (%p430_p2) target bundleno = 904 (0x388), region = 67  ;;  %s999_s11 = sshll.u32 (!%p430_p2), %s436_s14, 9 }
  0x4f   : > { %s1000_s15 = sshll.u32 (!%p430_p2), %s1741_s18, 4  ;;  %p482_p3 = scmp.lt.s32.totalorder (!%p430_p2), %s1204_s30, 1 }
  0x50   : > { %s1003_s16 = sshll.u32 (!%p430_p2), %s1200_s29, 1  ;;  %s1004_s20 = sshll.u32 (!%p430_p2), %s1200_s29, 5 }
  0x51   : > { %p489_p4 = scmp.lt.s32.totalorder (!%p430_p2), %s1003_s16, 7  ;;  %p494_p5 = scmp.lt.s32.totalorder (!%p430_p2), %s1004_s20, 127 }
  0x52   : > { %s1516_s26 = scalar_lea.vmem (!%p430_p2), [#allocation3], %s999_s11  ;;  %p1007_p6 = scmp.ne.s32.totalorder (!%p430_p2), %s1200_s29, 0 }
  0x53   : > { %s483_s12 = scalar_select %p482_p3, %s1204_s30, 1 }
  0x54   : > { %s1775_s16 = smov (!%p489_p4, %s1003_s16), 7  ;;  %s1777_s20 = smov (!%p494_p5, %s1004_s20), 127 }
  0x55   : > { %s1015_s17 = sshll.u32 %s483_s12, 4  ;;  %s491_s14 = scalar_lea.vmem %s1731_s2, %s1775_s16 }
  0x56   : > { %s1505_s9 = scalar_lea.vmem %s1729_s0, %s1015_s17  ;;  %s1016_s18 = sshll.u32 %s1777_s20, 4 }
  0x57   : > { %s1514_s22 = scalar_lea.vmem %s1732_s3, %s1016_s18  ;;  %s1518_s12 = scalar_lea.vmem [#allocation4], %s1000_s15 }
  0x58   : > { %503 = sbr.rel (%p1007_p6) target bundleno = 95 (0x5f), region = 75 }
  0x5d   : > { %v1218_v0 = vmov 0.0  }
  0x5e   : > { %504 = vst [vmem:[#allocation2] sm:$0xff] %v1218_v0  ;;  %505 = vst [vmem:[#allocation2 + $0x8] sm:$0xff] %v1218_v0 }
  0x5f PF: > { %v539_v1 = vld [vmem:[%s1516_s26 + $0xf8] sm:$0xff]  ;;  %v538_v2 = vld [vmem:[%s1516_s26 + $0xf0] sm:$0xff]  ;;  %v537_v3 = vld [vmem:[%s1516_s26 + $0xe8] sm:$0xff]  ;;  %p1008_p7 = scmp.ne.s32.totalorder %s1200_s29, 3 }
  0x60   : > { %584 = vmatprep.subr.mxu0 %v539_v1  ;;  %v536_v4 = vld [vmem:[%s1516_s26 + $0xe0] sm:$0xff]  ;;  %v535_v5 = vld [vmem:[%s1516_s26 + $0xd8] sm:$0xff]  ;;  %v534_v6 = vld [vmem:[%s1516_s26 + $0xd0] sm:$0xff] }
  0x61   : > { %585 = vmatpush1.msra.mxu0 %v538_v2  ;;  %v533_v7 = vld [vmem:[%s1516_s26 + $0xc8] sm:$0xff]  ;;  %v532_v8 = vld [vmem:[%s1516_s26 + $0xc0] sm:$0xff]  ;;  %v531_v9 = vld [vmem:[%s1516_s26 + $0xb8] sm:$0xff] }
  0x62   : > { %586 = vmatprep.subr.mxu0 %v537_v3  ;;  %v530_v10 = vld [vmem:[%s1516_s26 + $0xb0] sm:$0xff]  ;;  %v529_v11 = vld [vmem:[%s1516_s26 + $0xa8] sm:$0xff]  ;;  %v528_v12 = vld [vmem:[%s1516_s26 + $0xa0] sm:$0xff] }
  0x63   : > { %587 = vmatpush1.msra.mxu0 %v536_v4  ;;  %v527_v13 = vld [vmem:[%s1516_s26 + $0x98] sm:$0xff]  ;;  %v526_v14 = vld [vmem:[%s1516_s26 + $0x90] sm:$0xff]  ;;  %v525_v15 = vld [vmem:[%s1516_s26 + $0x88] sm:$0xff] }
  0x64   : > { %588 = vmatprep.subr.mxu0 %v535_v5  ;;  %v524_v16 = vld [vmem:[%s1516_s26 + $0x80] sm:$0xff]  ;;  %v523_v17 = vld [vmem:[%s1516_s26 + $0x78] sm:$0xff]  ;;  %v522_v18 = vld [vmem:[%s1516_s26 + $0x70] sm:$0xff] }
  0x65   : > { %589 = vmatpush1.msra.mxu0 %v534_v6  ;;  %v521_v19 = vld [vmem:[%s1516_s26 + $0x68] sm:$0xff]  ;;  %v520_v20 = vld [vmem:[%s1516_s26 + $0x60] sm:$0xff]  ;;  %v519_v21 = vld [vmem:[%s1516_s26 + $0x58] sm:$0xff] }
  0x66   : > { %590 = vmatprep.subr.mxu0 %v533_v7  ;;  %v518_v22 = vld [vmem:[%s1516_s26 + $0x50] sm:$0xff]  ;;  %v517_v23 = vld [vmem:[%s1516_s26 + $0x48] sm:$0xff]  ;;  %v516_v24 = vld [vmem:[%s1516_s26 + $0x40] sm:$0xff] }
  0x67   : > { %591 = vmatpush1.msra.mxu0 %v532_v8  ;;  %v515_v25 = vld [vmem:[%s1516_s26 + $0x38] sm:$0xff]  ;;  %v690_v27 = vld [vmem:[%s1514_s22 + $0xf8] sm:$0xff]  ;;  %v689_v28 = vld [vmem:[%s1514_s22 + $0xf0] sm:$0xff] }
  0x68   : > { %592 = vmatprep.subr.mxu0 %v531_v9  ;;  %v1547_v26 = vld [vmem:[%s1505_s9 + $0x8] sm:$0xff]  ;;  %v514_v30 = vld [vmem:[%s1516_s26 + $0x30] sm:$0xff]  ;;  %723 = vmatprep.subr.mxu1 %v690_v27  ;;  %v513_v32 = vld [vmem:[%s1516_s26 + $0x28] sm:$0xff] }
  0x69   : > { %593 = vmatpush1.msra.mxu0 %v530_v10  ;;  %648 = vmatprep.mubr.f32.mxu0 %v1547_v26  ;;  %v688_v29 = vld [vmem:[%s1514_s22 + $0xe8] sm:$0xff]  ;;  %v687_v31 = vld [vmem:[%s1514_s22 + $0xe0] sm:$0xff]  ;;  %v686_v33 = vld [vmem:[%s1514_s22 + $0xd8] sm:$0xff] }
  0x6a   : > { %594 = vmatprep.subr.mxu0 %v529_v11  ;;  %724 = vmatpush1.msra.mxu1 %v689_v28  ;;  %v512_v34 = vld [vmem:[%s1516_s26 + $0x20] sm:$0xff]  ;;  %v511_v36 = vld [vmem:[%s1516_s26 + $0x18] sm:$0xff]  ;;  %v510_v38 = vld [vmem:[%s1516_s26 + $0x10] sm:$0xff] }
  0x6b   : > { %595 = vmatpush1.msra.mxu0 %v528_v12  ;;  %725 = vmatprep.subr.mxu1 %v688_v29  ;;  %v685_v35 = vld [vmem:[%s1514_s22 + $0xd0] sm:$0xff]  ;;  %v684_v37 = vld [vmem:[%s1514_s22 + $0xc8] sm:$0xff]  ;;  %v683_v39 = vld [vmem:[%s1514_s22 + $0xc0] sm:$0xff] }
  0x6c   : > { %596 = vmatprep.subr.mxu0 %v527_v13  ;;  %726 = vmatpush1.msra.mxu1 %v687_v31  ;;  %v509_v40 = vld [vmem:[%s1516_s26 + $0x8] sm:$0xff]  ;;  %v508_v42 = vld [vmem:[%s1516_s26] sm:$0xff]  ;;  %v571_v44 = vld [vmem:[%s1516_s26 + $0x1f8] sm:$0xff] }
  0x6d   : > { %597 = vmatpush1.msra.mxu0 %v526_v14  ;;  %727 = vmatprep.subr.mxu1 %v686_v33  ;;  %v682_v41 = vld [vmem:[%s1514_s22 + $0xb8] sm:$0xff]  ;;  %v681_v43 = vld [vmem:[%s1514_s22 + $0xb0] sm:$0xff]  ;;  %v680_v45 = vld [vmem:[%s1514_s22 + $0xa8] sm:$0xff] }
  0x6e   : > { %598 = vmatprep.subr.mxu0 %v525_v15  ;;  %728 = vmatpush1.msra.mxu1 %v685_v35  ;;  %v570_v46 = vld [vmem:[%s1516_s26 + $0x1f0] sm:$0xff]  ;;  %v569_v48 = vld [vmem:[%s1516_s26 + $0x1e8] sm:$0xff]  ;;  %v568_v50 = vld [vmem:[%s1516_s26 + $0x1e0] sm:$0xff] }
  0x6f   : > { %599 = vmatpush1.msra.mxu0 %v524_v16  ;;  %729 = vmatprep.subr.mxu1 %v684_v37  ;;  %v679_v47 = vld [vmem:[%s1514_s22 + $0xa0] sm:$0xff]  ;;  %v678_v49 = vld [vmem:[%s1514_s22 + $0x98] sm:$0xff]  ;;  %v677_v51 = vld [vmem:[%s1514_s22 + $0x90] sm:$0xff] }
  0x70   : > { %600 = vmatprep.subr.mxu0 %v523_v17  ;;  %730 = vmatpush1.msra.mxu1 %v683_v39  ;;  %v567_v52 = vld [vmem:[%s1516_s26 + $0x1d8] sm:$0xff]  ;;  %v566_v54 = vld [vmem:[%s1516_s26 + $0x1d0] sm:$0xff]  ;;  %v565_v56 = vld [vmem:[%s1516_s26 + $0x1c8] sm:$0xff] }
  0x71   : > { %601 = vmatpush1.msra.mxu0 %v522_v18  ;;  %731 = vmatprep.subr.mxu1 %v682_v41  ;;  %v676_v53 = vld [vmem:[%s1514_s22 + $0x88] sm:$0xff]  ;;  %v675_v55 = vld [vmem:[%s1514_s22 + $0x80] sm:$0xff]  ;;  %v674_v57 = vld [vmem:[%s1514_s22 + $0x78] sm:$0xff] }
  0x72   : > { %602 = vmatprep.subr.mxu0 %v521_v19  ;;  %732 = vmatpush1.msra.mxu1 %v681_v43  ;;  %v564_v58 = vld [vmem:[%s1516_s26 + $0x1c0] sm:$0xff]  ;;  %v563_v60 = vld [vmem:[%s1516_s26 + $0x1b8] sm:$0xff]  ;;  %v562_v62 = vld [vmem:[%s1516_s26 + $0x1b0] sm:$0xff] }
  0x73   : > { %603 = vmatpush1.msra.mxu0 %v520_v20  ;;  %733 = vmatprep.subr.mxu1 %v680_v45  ;;  %v673_v59 = vld [vmem:[%s1514_s22 + $0x70] sm:$0xff]  ;;  %v672_v61 = vld [vmem:[%s1514_s22 + $0x68] sm:$0xff]  ;;  %v671_v63 = vld [vmem:[%s1514_s22 + $0x60] sm:$0xff] }
  0x74   : > { %604 = vmatprep.subr.mxu0 %v519_v21  ;;  %734 = vmatpush1.msra.mxu1 %v679_v47  ;;  %v561_v0 = vld [vmem:[%s1516_s26 + $0x1a8] sm:$0xff]  ;;  %v560_v2 = vld [vmem:[%s1516_s26 + $0x1a0] sm:$0xff]  ;;  %v559_v4 = vld [vmem:[%s1516_s26 + $0x198] sm:$0xff] }
  0x75   : > { %605 = vmatpush1.msra.mxu0 %v518_v22  ;;  %735 = vmatprep.subr.mxu1 %v678_v49  ;;  %v670_v1 = vld [vmem:[%s1514_s22 + $0x58] sm:$0xff]  ;;  %v669_v3 = vld [vmem:[%s1514_s22 + $0x50] sm:$0xff]  ;;  %v668_v5 = vld [vmem:[%s1514_s22 + $0x48] sm:$0xff] }
  0x76   : > { %606 = vmatprep.subr.mxu0 %v517_v23  ;;  %736 = vmatpush1.msra.mxu1 %v677_v51  ;;  %v558_v6 = vld [vmem:[%s1516_s26 + $0x190] sm:$0xff]  ;;  %v557_v8 = vld [vmem:[%s1516_s26 + $0x188] sm:$0xff]  ;;  %v556_v10 = vld [vmem:[%s1516_s26 + $0x180] sm:$0xff] }
  0x77   : > { %607 = vmatpush1.msra.mxu0 %v516_v24  ;;  %737 = vmatprep.subr.mxu1 %v676_v53  ;;  %v667_v7 = vld [vmem:[%s1514_s22 + $0x40] sm:$0xff]  ;;  %v666_v9 = vld [vmem:[%s1514_s22 + $0x38] sm:$0xff]  ;;  %v665_v11 = vld [vmem:[%s1514_s22 + $0x30] sm:$0xff] }
  0x78   : > { %608 = vmatprep.subr.mxu0 %v515_v25  ;;  %738 = vmatpush1.msra.mxu1 %v675_v55  ;;  %v555_v12 = vld [vmem:[%s1516_s26 + $0x178] sm:$0xff]  ;;  %v554_v14 = vld [vmem:[%s1516_s26 + $0x170] sm:$0xff]  ;;  %v553_v16 = vld [vmem:[%s1516_s26 + $0x168] sm:$0xff] }
  0x79   : > { %609 = vmatpush1.msra.mxu0 %v514_v30  ;;  %739 = vmatprep.subr.mxu1 %v674_v57  ;;  %v664_v13 = vld [vmem:[%s1514_s22 + $0x28] sm:$0xff]  ;;  %v663_v15 = vld [vmem:[%s1514_s22 + $0x20] sm:$0xff]  ;;  %v662_v17 = vld [vmem:[%s1514_s22 + $0x18] sm:$0xff] }
  0x7a   : > { %610 = vmatprep.subr.mxu0 %v513_v32  ;;  %740 = vmatpush1.msra.mxu1 %v673_v59  ;;  %v552_v18 = vld [vmem:[%s1516_s26 + $0x160] sm:$0xff]  ;;  %v551_v20 = vld [vmem:[%s1516_s26 + $0x158] sm:$0xff]  ;;  %v550_v22 = vld [vmem:[%s1516_s26 + $0x150] sm:$0xff] }
  0x7b   : > { %611 = vmatpush1.msra.mxu0 %v512_v34  ;;  %741 = vmatprep.subr.mxu1 %v672_v61  ;;  %v661_v19 = vld [vmem:[%s1514_s22 + $0x10] sm:$0xff]  ;;  %v660_v21 = vld [vmem:[%s1514_s22 + $0x8] sm:$0xff]  ;;  %v659_v23 = vld [vmem:[%s1514_s22] sm:$0xff] }
  0x7c   : > { %612 = vmatprep.subr.mxu0 %v511_v36  ;;  %742 = vmatpush1.msra.mxu1 %v671_v63  ;;  %v549_v24 = vld [vmem:[%s1516_s26 + $0x148] sm:$0xff]  ;;  %v548_v27 = vld [vmem:[%s1516_s26 + $0x140] sm:$0xff]  ;;  %v547_v29 = vld [vmem:[%s1516_s26 + $0x138] sm:$0xff] }
  0x7d   : > { %613 = vmatpush1.msra.mxu0 %v510_v38  ;;  %743 = vmatprep.subr.mxu1 %v670_v1  ;;  %v722_v25 = vld [vmem:[%s1514_s22 + $0x1f8] sm:$0xff]  ;;  %v721_v28 = vld [vmem:[%s1514_s22 + $0x1f0] sm:$0xff]  ;;  %v720_v30 = vld [vmem:[%s1514_s22 + $0x1e8] sm:$0xff] }
  0x7e   : > { %614 = vmatprep.subr.mxu0 %v509_v40  ;;  %744 = vmatpush1.msra.mxu1 %v669_v3  ;;  %v546_v31 = vld [vmem:[%s1516_s26 + $0x130] sm:$0xff]  ;;  %v545_v33 = vld [vmem:[%s1516_s26 + $0x128] sm:$0xff]  ;;  %v544_v35 = vld [vmem:[%s1516_s26 + $0x120] sm:$0xff] }
  0x7f   : > { %615 = vmatpush1.msra.mxu0 %v508_v42  ;;  %745 = vmatprep.subr.mxu1 %v668_v5  ;;  %v719_v32 = vld [vmem:[%s1514_s22 + $0x1e0] sm:$0xff]  ;;  %v718_v34 = vld [vmem:[%s1514_s22 + $0x1d8] sm:$0xff]  ;;  %v717_v36 = vld [vmem:[%s1514_s22 + $0x1d0] sm:$0xff] }
  0x80   : > { %616 = vmatprep.subr.mxu0 %v571_v44  ;;  %746 = vmatpush1.msra.mxu1 %v667_v7  ;;  %v543_v37 = vld [vmem:[%s1516_s26 + $0x118] sm:$0xff]  ;;  %v542_v39 = vld [vmem:[%s1516_s26 + $0x110] sm:$0xff]  ;;  %v541_v41 = vld [vmem:[%s1516_s26 + $0x108] sm:$0xff] }
  0x81   : > { %617 = vmatpush2.msra.mxu0 %v570_v46  ;;  %747 = vmatprep.subr.mxu1 %v666_v9  ;;  %v716_v38 = vld [vmem:[%s1514_s22 + $0x1c8] sm:$0xff]  ;;  %v715_v40 = vld [vmem:[%s1514_s22 + $0x1c0] sm:$0xff]  ;;  %v714_v42 = vld [vmem:[%s1514_s22 + $0x1b8] sm:$0xff] }
  0x82   : > { %618 = vmatprep.subr.mxu0 %v569_v48  ;;  %748 = vmatpush1.msra.mxu1 %v665_v11  ;;  %v540_v43 = vld [vmem:[%s1516_s26 + $0x100] sm:$0xff]  ;;  %v1632_v45 = vld [vmem:[%s1505_s9] sm:$0xff]  ;;  %v712_v46 = vld [vmem:[%s1514_s22 + $0x1a8] sm:$0xff] }
  0x83   : > { %619 = vmatpush2.msra.mxu0 %v568_v50  ;;  %749 = vmatprep.subr.mxu1 %v664_v13  ;;  %v713_v44 = vld [vmem:[%s1514_s22 + $0x1b0] sm:$0xff]  ;;  %v711_v47 = vld [vmem:[%s1514_s22 + $0x1a0] sm:$0xff]  ;;  %v710_v48 = vld [vmem:[%s1514_s22 + $0x198] sm:$0xff] }
  0x84   : > { %620 = vmatprep.subr.mxu0 %v567_v52  ;;  %750 = vmatpush1.msra.mxu1 %v663_v15  ;;  %v709_v49 = vld [vmem:[%s1514_s22 + $0x190] sm:$0xff]  ;;  %v708_v50 = vld [vmem:[%s1514_s22 + $0x188] sm:$0xff]  ;;  %v707_v51 = vld [vmem:[%s1514_s22 + $0x180] sm:$0xff] }
  0x85   : > { %621 = vmatpush2.msra.mxu0 %v566_v54  ;;  %751 = vmatprep.subr.mxu1 %v662_v17  ;;  %v706_v52 = vld [vmem:[%s1514_s22 + $0x178] sm:$0xff]  ;;  %v705_v53 = vld [vmem:[%s1514_s22 + $0x170] sm:$0xff]  ;;  %v704_v54 = vld [vmem:[%s1514_s22 + $0x168] sm:$0xff] }
  0x86   : > { %622 = vmatprep.subr.mxu0 %v565_v56  ;;  %752 = vmatpush1.msra.mxu1 %v661_v19  ;;  %v703_v55 = vld [vmem:[%s1514_s22 + $0x160] sm:$0xff]  ;;  %v702_v56 = vld [vmem:[%s1514_s22 + $0x158] sm:$0xff]  ;;  %v701_v57 = vld [vmem:[%s1514_s22 + $0x150] sm:$0xff] }
  0x87   : > { %623 = vmatpush2.msra.mxu0 %v564_v58  ;;  %753 = vmatprep.subr.mxu1 %v660_v21  ;;  %v700_v58 = vld [vmem:[%s1514_s22 + $0x148] sm:$0xff]  ;;  %v699_v59 = vld [vmem:[%s1514_s22 + $0x140] sm:$0xff]  ;;  %v697_v61 = vld [vmem:[%s1514_s22 + $0x130] sm:$0xff] }
  0x88   : > { %624 = vmatprep.subr.mxu0 %v563_v60  ;;  %754 = vmatpush1.msra.mxu1 %v659_v23  ;;  %v698_v60 = vld [vmem:[%s1514_s22 + $0x138] sm:$0xff]  ;;  %v695_v63 = vld [vmem:[%s1514_s22 + $0x120] sm:$0xff]  ;;  %v693_v1 = vld [vmem:[%s1514_s22 + $0x110] sm:$0xff] }
  0x89   : > { %625 = vmatpush2.msra.mxu0 %v562_v62  ;;  %755 = vmatprep.subr.mxu1 %v722_v25  ;;  %v696_v62 = vld [vmem:[%s1514_s22 + $0x128] sm:$0xff]  ;;  %v691_v3 = vld [vmem:[%s1514_s22 + $0x100] sm:$0xff] }
  0x8a   : > { %626 = vmatprep.subr.mxu0 %v561_v0  ;;  %756 = vmatpush2.msra.mxu1 %v721_v28  ;;  %v694_v0 = vld [vmem:[%s1514_s22 + $0x118] sm:$0xff]  ;;  %v572_v7 = vld [vmem:[%s491_s14] sm:$0x3]  ;;  %v658_v19 = vld [vmem:[#allocation2 + $0x8] sm:$0xff] }
  0x8b   : > { %627 = vmatpush2.msra.mxu0 %v560_v2  ;;  %757 = vmatprep.subr.mxu1 %v720_v30  ;;  %v692_v2 = vld [vmem:[%s1514_s22 + $0x108] sm:$0xff]  ;;  %v657_v17 = vld [vmem:[#allocation2] sm:$0xff] }
  0x8c   : > { %628 = vmatprep.subr.mxu0 %v559_v4  ;;  %758 = vmatpush2.msra.mxu1 %v719_v32  ;;  %v574_v4 = vlaneseq }
  0x8d   : > { %629 = vmatpush2.msra.mxu0 %v558_v6  ;;  %759 = vmatprep.subr.mxu1 %v718_v34 }
  0x8e   : > { %630 = vmatprep.subr.mxu0 %v557_v8  ;;  %760 = vmatpush2.msra.mxu1 %v717_v36  ;;  %v575_v5 = vshrl.u32 %v574_v4, 7 }
  0x8f   : > { %631 = vmatpush2.msra.mxu0 %v556_v10  ;;  %761 = vmatprep.subr.mxu1 %v716_v38 }
  0x90   : > { %632 = vmatprep.subr.mxu0 %v555_v12  ;;  %762 = vmatpush2.msra.mxu1 %v715_v40  ;;  %v576_v6 = vsub.s32 0, %v575_v5  ;;  %v580_v8 = vsub.s32 1, %v575_v5 }
  0x91   : > { %633 = vmatpush2.msra.mxu0 %v554_v14  ;;  %763 = vmatprep.subr.mxu1 %v714_v42 }
  0x92   : > { %634 = vmatprep.subr.mxu0 %v553_v16  ;;  %764 = vmatpush2.msra.mxu1 %v713_v44  ;;  %v577_v9 = vrot.slane %v572_v7, %v576_v6  ;;  %v581_v10 = vrot.slane %v572_v7, %v580_v8 }
  0x93   : > { %635 = vmatpush2.msra.mxu0 %v552_v18  ;;  %765 = vmatprep.subr.mxu1 %v712_v46 }
  0x94   : > { %636 = vmatprep.subr.mxu0 %v551_v20  ;;  %766 = vmatpush2.msra.mxu1 %v711_v47 }
  0x95   : > { %637 = vmatpush2.msra.mxu0 %v550_v22  ;;  %767 = vmatprep.subr.mxu1 %v710_v48 }
  0x96   : > { %638 = vmatprep.subr.mxu0 %v549_v24  ;;  %768 = vmatpush2.msra.mxu1 %v709_v49 }
  0x97   : > { %639 = vmatpush2.msra.mxu0 %v548_v27  ;;  %769 = vmatprep.subr.mxu1 %v708_v50 }
  0x98   : > { %640 = vmatprep.subr.mxu0 %v547_v29  ;;  %770 = vmatpush2.msra.mxu1 %v707_v51 }
  0x99   : > { %641 = vmatpush2.msra.mxu0 %v546_v31  ;;  %771 = vmatprep.subr.mxu1 %v706_v52 }
  0x9a   : > { %642 = vmatprep.subr.mxu0 %v545_v33  ;;  %772 = vmatpush2.msra.mxu1 %v705_v53 }
  0x9b   : > { %643 = vmatpush2.msra.mxu0 %v544_v35  ;;  %773 = vmatprep.subr.mxu1 %v704_v54 }
  0x9c   : > { %644 = vmatprep.subr.mxu0 %v543_v37  ;;  %774 = vmatpush2.msra.mxu1 %v703_v55 }
  0x9d   : > { %645 = vmatpush2.msra.mxu0 %v542_v39  ;;  %775 = vmatprep.subr.mxu1 %v702_v56 }
  0x9e   : > { %646 = vmatprep.subr.mxu0 %v541_v41  ;;  %776 = vmatpush2.msra.mxu1 %v701_v57 }
  0x9f   : > { %647 = vmatpush2.msra.mxu0 %v540_v43  ;;  %777 = vmatprep.subr.mxu1 %v700_v58 }
  0xa0   : > { %649 = vmatmul.mubr.f32.vlgmr.msra.gmra.mxu0 %v1632_v45  ;;  %778 = vmatpush2.msra.mxu1 %v699_v59 }
  0xa1   : > { %779 = vmatprep.subr.mxu1 %v698_v60 }
  0xa2   : > { %780 = vmatpush2.msra.mxu1 %v697_v61 }
  0xa3   : > { %781 = vmatprep.subr.mxu1 %v696_v62 }
  0xa4   : > { %782 = vmatpush2.msra.mxu1 %v695_v63 }
  0xa5   : > { %783 = vmatprep.subr.mxu1 %v694_v0 }
  0xa6   : > { %784 = vmatpush2.msra.mxu1 %v693_v1 }
  0xa7   : > { %785 = vmatprep.subr.mxu1 %v692_v2 }
  0xa8   : > { %786 = vmatpush2.msra.mxu1 %v691_v3 }
 0x160   : > { %v650_v11 = vpop.f32.mrf.mxu0 }
 0x161   : > { %v651_v12 = vadd.f32 %v650_v11, %v577_v9 }
 0x162   : > { %v652_v13 = vpop.f32.mrf.mxu0 }
 0x163   : > { %v653_v14 = vadd.f32 %v652_v13, %v581_v10  ;;  %v655_v16 = vmax.f32 %v651_v12, 0.0 }
 0x165   : > { %v656_v15 = vmax.f32 %v653_v14, 0.0 }
 0x167   : > { %787 = vmatprep.mubr.f32.mxu1 %v656_v15 }
 0x168   : > { %788 = vmatmul.mubr.f32.vlgmr.msra.gmra.mxu1 %v655_v16 }
 0x228   : > { %v789_v18 = vpop.f32.mrf.mxu1 }
 0x229   : > { %v794_v20 = vadd.f32 %v789_v18, %v657_v17  ;;  %801 = sbr.rel (%p1008_p7) target bundleno = 880 (0x370), region = 79 }
 0x22a   : > { %v791_v21 = vpop.f32.mrf.mxu1 }
 0x22b   : > { %796 = vst [vmem:[#allocation2] sm:$0xff] %v794_v20  ;;  %v795_v22 = vadd.f32 %v791_v21, %v658_v19 }
 0x22d   : > { %797 = vst [vmem:[#allocation2 + $0x8] sm:$0xff] %v795_v22 }
 0x22e   : > { %v806_v25 = vld [vmem:[%s1733_s4] sm:$0x3] }
 0x22f   : > { %v811_v29 = vrot.slane %v806_v25, %v576_v6  ;;  %v815_v30 = vrot.slane %v806_v25, %v580_v8  ;;  %v851_v44 = vld [vmem:[%s1735_s6] sm:$0x3] }
 0x230   : > { %v856_v48 = vrot.slane %v851_v44, %v576_v6  ;;  %v860_v49 = vrot.slane %v851_v44, %v580_v8 }
 0x232   : > { %v802_v23 = vld [vmem:[#allocation2] sm:$0xff] }
 0x233   : > { %v804_v27 = vadd.f32 %v802_v23, %v1632_v45 }
 0x234   : > { %v803_v24 = vld [vmem:[#allocation2 + $0x8] sm:$0xff] }
 0x235   : > { %v805_v28 = vadd.f32 %v803_v24, %v1547_v26  ;;  %v818_v31 = vadd.f32 %v811_v29, %v804_v27  ;;  %v837_v26 = vld [vmem:[%s1734_s5] sm:$0x3] }
 0x236   : > { %v842_v45 = vrot.slane %v837_v26, %v576_v6  ;;  %v846_v46 = vrot.slane %v837_v26, %v580_v8 }
 0x237   : > { %v819_v32 = vadd.f32 %v815_v30, %v805_v28 }
 0x239   : > { %v820_v33 = vadd.f32 %v819_v32, %v818_v31 }
 0x23b   : > { %821 = vadd.xlane.f32.xlu0 %v820_v33 }
 0x2c4   : > { %v822_v34 = vpop.xlane.xlu0 %821 }
 0x2c5   : > { %v824_v35 = vmul.f32 0.00390625, %v822_v34 }
 0x2c7   : > { %v825_v36 = vsub.f32 %v818_v31, %v824_v35  ;;  %v826_v37 = vsub.f32 %v819_v32, %v824_v35 }
 0x2c9   : > { %v827_v38 = vmul.f32 %v825_v36, %v825_v36  ;;  %v828_v39 = vmul.f32 %v826_v37, %v826_v37 }
 0x2cb   : > { %v829_v40 = vadd.f32 %v828_v39, %v827_v38 }
 0x2cd   : > { %830 = vadd.xlane.f32.xlu0 %v829_v40 }
 0x356   : > { %v831_v41 = vpop.xlane.xlu0 %830 }
 0x357   : > { %v832_v42 = vmul.f32 0.00390625, %v831_v41 }
 0x359   : > { %v833_v43 = vadd.f32 1e-05, %v832_v42 }
 0x35b   : > { %1106 = vrsqrt.f32 %v833_v43 }
 0x368   : > { %v1107_v47 = vpop.eup %1106 }
 0x369   : > { %v835_v50 = vmul.f32 %v1107_v47, %v825_v36  ;;  %v836_v51 = vmul.f32 %v1107_v47, %v826_v37 }
 0x36b   : > { %v849_v52 = vmul.f32 %v842_v45, %v835_v50  ;;  %v850_v53 = vmul.f32 %v846_v46, %v836_v51 }
 0x36d   : > { %v863_v54 = vadd.f32 %v856_v48, %v849_v52  ;;  %v864_v55 = vadd.f32 %v860_v49, %v850_v53 }
 0x36f   : > { %865 = vst [vmem:[%s1518_s12] sm:$0xff] %v863_v54  ;;  %866 = vst [vmem:[%s1518_s12 + $0x8] sm:$0xff] %v864_v55 }
 0x370 PF: > { %s1017_s22 = sshll.u32 %s1204_s30, 8  ;;  %s882_s16 = sshll.u32 %s1518_s12, 4  ;;  %s883_s16 = int_to_ptr.vmem [resolvable:$true] %s882_s16 }
 0x371   : > { %s880_s15 = scalar_lea.hbm %s1736_s7, %s1017_s22  ;;  %s1757_s20 = sand.u32 1, %s1184_s25  }
 0x372   : > { %s868_s17 = scalar_lea.sflag [#allocation5], %s1757_s20  ;;  %s1108_s27 = scalar_lea.vmem %s883_s16, 256 }
 0x373   : > { %p1109_p8 = scmp.ne.s32.totalorder %s883_s16, %s1108_s27  ;;  %s1219_s14 = smov [#allocation4]  }
 0x374   : > { %s1112_s1 = sshll.u32 %s1219_s14, 4  ;;  %s1113_s1 = int_to_ptr.vmem [resolvable:$false] %s1112_s1 }
 0x375   : > { %p1110_p9 = pnand %p1109_p8, %p1339_p10  ;;  %s1114_s26 = scalar_lea.vmem %s1113_s1, 512 }
 0x376   : > { %p1115_p13 = scmp.lt.s32.totalorder %s883_s16, %s1113_s1  ;;  %p1116_p0 = scmp.lt.s32.totalorder %s1114_s26, %s1108_s27 }
 0x377   : > { %p1111_p11 = pneg %p1110_p9 }
 0x378   : > { %p1117_p1 = por %p1116_p0, %p1115_p13 }
 0x37a   : > { %p1118_p2 = pnand %p1117_p1, %p1111_p11 }
 0x37c   : > { %1121 = shalt.err (!%p1118_p2)
}
 0x37d   : > { %s1122_s30 = scalar_lea.hbm %s880_s15, 256  ;;  %s1126_s8 = scalar_lea.hbm %s1736_s7, 512 }
 0x37e   : > { %p1123_p3 = scmp.ne.s32.totalorder %s880_s15, %s1122_s30  ;;  %p1127_p6 = scmp.lt.s32.totalorder %s880_s15, %s1736_s7 }
 0x37f   : > { %p1128_p7 = scmp.lt.s32.totalorder %s1126_s8, %s1122_s30 }
 0x380   : > { %p1124_p4 = pnand %p1123_p3, %p1339_p10 }
 0x381   : > { %p1129_p8 = por %p1128_p7, %p1127_p6 }
 0x382   : > { %p1125_p5 = pneg %p1124_p4 }
 0x384   : > { %p1130_p9 = pnand %p1129_p8, %p1125_p5 }
 0x386   : > { %1133 = shalt.err (!%p1130_p9)
}
 0x387   : > { %1018 = dma.vmem_to_hbm [thread:$0]  (%p1339_p10), %s883_s16, 256, %s880_s15, %s868_s17  }
 0x388 PF: > { %p1024_p11 = scmp.ge.s32.totalorder %s1216_s10, 2  ;;  %s894_s13 = sand.u32 1, %s1180_s24  }
 0x389   : > { %s895_s19 = scalar_lea.sflag [#allocation5], %s894_s13 }
 0x38a   : > { %p1021_p13 = pnand %p1024_p11, %p1346_p12 }
 0x38c   : > { %p1022_p0 = pneg %p1021_p13 }
 0x38e   : > { %1175 = dma.done.wait (%p1022_p0), %s895_s19, 256  }
 0x38f   : > { %1177 = vsyncadd (%p1022_p0), %s895_s19, 4294967040  ;;  %s20_s10 = sadd.s32 1, %s1216_s10   ;;  %s1758_s22 = sld [smem:[#allocation7_spill]] }
 0x390   : > { %p17_p1 = scmp.ge.s32.totalorder %s20_s10, 10   ;;  %s1759_s26 = sld [smem:[#allocation14_spill]] }
 0x391   : > { %s1760_s27 = sld [smem:[#allocation8_spill]]  ;;  %s1766_s24 = smov %s1184_s25 }
 0x392   : > { %s1761_s28 = sld [smem:[#allocation13_spill]]  ;;  %19 = sbr.rel (!%p17_p1) target bundleno = 8 (0x8), region = 128 }
 0x393   : > { %s1762_s29 = sld [smem:[#allocation9_spill]] }
 0x394   : > { %s1763_s30 = sld [smem:[#allocation10_spill]] }
 0x395   : > { %s1764_s8 = sld [smem:[#allocation11_spill]]  ;;  %s1767_s25 = smov %s1758_s22 }
 0x396   : > { %s1765_s9 = sld [smem:[#allocation12_spill]] }
 0x397   :  { %900 = vsyncpa [#allocation5], 1 }
 0x398   :  { %902 = vsyncpa [#allocation5 + $0x1], 1 }

</bundles_post_ra>
